<compile_context>
chip_gen: v6e
topology: v6e:2x2x1
jax: 0.10.0
libtpu: 0.0.40
codegen_flags: <defaults>
</compile_context>

<pallas_src>
import functools
import math

import jax
import jax.numpy as jnp
from jax.experimental import pallas as pl
from jax.experimental.pallas import tpu as pltpu


# ---------------------------------------------------------------------------
# Geometry of the persistent flattened activation layout.
#   column (tq + idx)  <->  padded spatial position idx = n*Hp*Wp + r*Wp + c
#   columns [0, tq)    : zero prefix so negative (left) conv taps stay in bounds
# ---------------------------------------------------------------------------
def make_geometry(N, H, W, *, tq_max=2048, min_grid=8):
    p = 1                                           # all spatial convs are 3x3, pad 1
    Hp, Wp = H + 2 * p, W + 2 * p
    M = N * Hp * Wp
    max_shift = p * Wp + p                          # |largest centred tap offset|
    tB = 128 * max(1, pl.cdiv(max_shift, 128))      # halo width, lane aligned
    units = pl.cdiv(M, tB)
    upt = max(1, min(max(1, tq_max // tB), max(1, units // min_grid)))
    tq = upt * tB                                   # main tile (multiple of tB, of 128)
    grid = pl.cdiv(M, tq)
    if grid > 1 and grid % 2:
        grid += 1                                   # even grid: balance v7x's two TCs
    Wpad = grid * tq
    Wstore = tq + Wpad                              # zero prefix + data columns
    shifts = tuple((dy - p) * Wp + (dx - p)
                   for dy in range(2 * p + 1) for dx in range(2 * p + 1))
    return dict(N=N, H=H, W=W, Hp=Hp, Wp=Wp, M=M, tB=tB, tq=tq, grid=grid,
                Wpad=Wpad, Wstore=Wstore, shifts=shifts)


def make_mask_pool(geo):
    """mask: (1, Wstore), 1.0 at valid interior positions, else 0.
    pool: (Wstore, N), 1/(H*W) at valid positions of image n (CALayer avg pool)."""
    N, H, W = geo["N"], geo["H"], geo["W"]
    Hp, Wp, M = geo["Hp"], geo["Wp"], geo["M"]
    idx = jnp.arange(geo["Wpad"], dtype=jnp.int32)
    pos = idx % (Hp * Wp)
    r, c = pos // Wp, pos % Wp
    interior = (idx < M) & (r >= 1) & (r <= H) & (c >= 1) & (c <= W)
    mask = jnp.concatenate([jnp.zeros((geo["tq"],), jnp.float32),
                            interior.astype(jnp.float32)])[None, :]
    img = jnp.clip(idx // (Hp * Wp), 0, N - 1)
    onehot = (img[:, None] == jnp.arange(N, dtype=jnp.int32)[None, :]) & interior[:, None]
    pool = onehot.astype(jnp.float32) / float(H * W)
    pool = jnp.concatenate([jnp.zeros((geo["tq"], N), jnp.float32), pool], axis=0)
    return mask, pool


def to_flat(x_nchw, geo, dtype):
    """(N, C, H, W) -> (C, Wstore): one-time layout-in glue."""
    C = x_nchw.shape[1]
    xc = jnp.transpose(x_nchw, (1, 0, 2, 3))
    xp = jnp.pad(xc, ((0, 0), (0, 0), (1, 1), (1, 1)))
    flat = xp.reshape(C, geo["M"])
    flat = jnp.pad(flat, ((0, 0), (geo["tq"], geo["Wstore"] - geo["tq"] - geo["M"])))
    return flat.astype(dtype)


def from_flat(flat, C, geo):
    """(Cpad, Wstore) -> (N, C, H, W): one-time layout-out glue after the tail conv."""
    N, H, W, Hp, Wp = geo["N"], geo["H"], geo["W"], geo["Hp"], geo["Wp"]
    y = flat[:C, geo["tq"]:geo["tq"] + geo["M"]].astype(jnp.float32)
    y = y.reshape(C, N, Hp, Wp)[:, :, 1:H + 1, 1:W + 1]
    return jnp.transpose(y, (1, 0, 2, 3))


# ---------------------------------------------------------------------------
# Fused 3x3 conv kernel: per-tap MXU accumulation + bias / ReLU / scale /
# residual / mask epilogue.  num_in==2 sums two input streams (fused skip add).
# ---------------------------------------------------------------------------
def _conv3x3_kernel(*refs, shifts, num_in, apply_relu, out_scale, has_residual):
    it = iter(refs)
    streams = [(next(it), next(it), next(it)) for _ in range(num_in)]   # (left, main, right)
    mask_ref, w_ref, b_ref = next(it), next(it), next(it)
    res_ref = next(it) if has_residual else None
    o_ref = next(it)
    tq = o_ref.shape[-1]
    tB = streams[0][0].shape[-1]

    def slab_of(left, main, right):
        return jnp.concatenate([left[...], main[...], right[...]], axis=1)

    slab = slab_of(*streams[0])
    if num_in == 2:                                  # fused input add (SSPN long skip)
        slab = slab + slab_of(*streams[1])

    acc = None                                       # per-tap accumulation, no (K,tq) im2col
    for t, s in enumerate(shifts):
        part = jnp.dot(w_ref[t], slab[:, tB + s:tB + s + tq],
                       preferred_element_type=jnp.float32)
        acc = part if acc is None else acc + part
    acc = acc + b_ref[...]
    if apply_relu:
        acc = jnp.maximum(acc, 0.0)
    if out_scale != 1.0:
        acc = acc * out_scale
    if has_residual:
        acc = acc + res_ref[...].astype(jnp.float32)
    # NaN-safe zeroing of padding / out-of-image columns: the stored activation is a
    # correctly zero-padded input for the next 3x3 conv.
    acc = jnp.where(mask_ref[...] > 0.0, acc, 0.0)
    o_ref[...] = acc.astype(o_ref.dtype)


def conv3x3_flat(inputs, w, b, *, geo, mask, residual=None, apply_relu=False,
                 out_scale=1.0, compute_dtype=jnp.bfloat16):
    tq, tB, grid, Wstore = geo["tq"], geo["tB"], geo["grid"], geo["Wstore"]
    shifts = geo["shifts"]
    cin_store = inputs[0].shape[0]
    Cout = w.shape[0]
    Cout_pad = 8 * pl.cdiv(Cout, 8)
    itm = jnp.dtype(compute_dtype).itemsize

    # (Cout, Cin, 3, 3) -> (9, Cout_pad, cin_store); tap axis matches `shifts` order.
    wt = jnp.transpose(w, (2, 3, 0, 1)).reshape(len(shifts), Cout, w.shape[1])
    wt = jnp.pad(wt, ((0, 0), (0, Cout_pad - Cout), (0, cin_store - w.shape[1])))
    wt = wt.astype(compute_dtype)
    bt = jnp.pad(b.reshape(Cout, 1), ((0, Cout_pad - Cout), (0, 0))).astype(jnp.float32)

    r = tq // tB
    last_blk = Wstore // tB - 1                      # clamp target for the last right halo
    num_in = len(inputs)
    has_residual = residual is not None
    if has_residual:
        assert residual.shape[0] == Cout_pad

    in_specs, args = [], []
    for xin in inputs:
        assert xin.shape == (cin_store, Wstore)
        in_specs += [
            pl.BlockSpec((cin_store, tB), lambda i: (0, (i + 1) * r - 1)),      # left halo
            pl.BlockSpec((cin_store, tq), lambda i: (0, i + 1)),                # main tile
            pl.BlockSpec((cin_store, tB),                                       # right halo
                         lambda i: (0, jnp.minimum((i + 2) * r, last_blk))),
        ]
        args += [xin, xin, xin]
    in_specs.append(pl.BlockSpec((1, tq), lambda i: (0, i + 1)))                # mask
    args.append(mask)
    in_specs.append(pl.BlockSpec((len(shifts), Cout_pad, cin_store),            # weights
                                 lambda i: (0, 0, 0)))
    args.append(wt)
    in_specs.append(pl.BlockSpec((Cout_pad, 1), lambda i: (0, 0)))              # bias
    args.append(bt)
    if has_residual:
        in_specs.append(pl.BlockSpec((Cout_pad, tq), lambda i: (0, i + 1)))
        args.append(residual)

    kernel = functools.partial(_conv3x3_kernel, shifts=shifts, num_in=num_in,
                               apply_relu=apply_relu, out_scale=float(out_scale),
                               has_residual=has_residual)

    in_block = (num_in * cin_store * (tq + 2 * tB) * itm + tq * 4
                + len(shifts) * Cout_pad * cin_store * itm + Cout_pad * 4
                + (Cout_pad * tq * itm if has_residual else 0))
    out_block = Cout_pad * tq * itm
    vmem_limit = int(max(8 << 20, min(2 * (in_block + out_block) + (6 << 20), 48 << 20)))
    cost = pl.CostEstimate(
        flops=2 * grid * tq * len(shifts) * cin_store * Cout_pad,
        transcendentals=0,
        bytes_accessed=int(grid * (in_block + out_block)))

    return pl.pallas_call(
        kernel,
        out_shape=jax.ShapeDtypeStruct((Cout_pad, Wstore), compute_dtype),
        grid_spec=pltpu.PrefetchScalarGridSpec(
            num_scalar_prefetch=0, grid=(grid,),
            in_specs=in_specs,
            out_specs=pl.BlockSpec((Cout_pad, tq), lambda i: (0, i + 1))),
        compiler_params=pltpu.CompilerParams(
            dimension_semantics=("parallel",),
            vmem_limit_bytes=vmem_limit),
        cost_estimate=cost,
    )(*args)


# ---------------------------------------------------------------------------
# Fused spc pair: conv1x1 -> ReLU -> conv1x1 (intermediate stays in VMEM) plus
# per-tile pooled partial sums for the CALayer global average pool.
# ---------------------------------------------------------------------------
def _spc_fused_kernel(x_ref, mask_ref, pool_ref, w1_ref, b1_ref, w2_ref, b2_ref,
                      o_ref, p_ref):
    x = x_ref[...]
    u = jnp.dot(w1_ref[...], x, preferred_element_type=jnp.float32) + b1_ref[...]
    u = jnp.maximum(u, 0.0)
    y = jnp.dot(w2_ref[...], u.astype(w2_ref.dtype),
                preferred_element_type=jnp.float32) + b2_ref[...]
    y = jnp.where(mask_ref[...] > 0.0, y, 0.0)
    o_ref[...] = y.astype(o_ref.dtype)
    # pool already holds 1/(H*W) at valid positions of each image, 0 elsewhere.
    p_ref[0] = jnp.dot(y, pool_ref[...], preferred_element_type=jnp.float32)


def spc_fused(x, w1, b1, w2, b2, *, geo, mask, pool, compute_dtype=jnp.bfloat16):
    tq, grid, Wstore = geo["tq"], geo["grid"], geo["Wstore"]
    cin_store = x.shape[0]
    Npool = pool.shape[1]
    Cmid, Cout = w1.shape[0], w2.shape[0]
    Cmid_pad = 8 * pl.cdiv(Cmid, 8)
    Cout_pad = 8 * pl.cdiv(Cout, 8)
    itm = jnp.dtype(compute_dtype).itemsize

    w1m = jnp.pad(w1.reshape(Cmid, -1),
                  ((0, Cmid_pad - Cmid), (0, cin_store - w1.shape[1]))).astype(compute_dtype)
    b1m = jnp.pad(b1.reshape(Cmid, 1), ((0, Cmid_pad - Cmid), (0, 0))).astype(jnp.float32)
    w2m = jnp.pad(w2.reshape(Cout, -1),
                  ((0, Cout_pad - Cout), (0, Cmid_pad - w2.shape[1]))).astype(compute_dtype)
    b2m = jnp.pad(b2.reshape(Cout, 1), ((0, Cout_pad - Cout), (0, 0))).astype(jnp.float32)

    in_block = (cin_store * tq * itm + tq * 4 + tq * Npool * 4
                + Cmid_pad * cin_store * itm + Cmid_pad * 4
                + Cout_pad * Cmid_pad * itm + Cout_pad * 4)
    out_block = Cout_pad * tq * itm + Cout_pad * Npool * 4
    vmem_limit = int(max(8 << 20, min(2 * (in_block + out_block) + (6 << 20), 48 << 20)))
    cost = pl.CostEstimate(
        flops=2 * grid * tq * (Cmid_pad * cin_store + Cout_pad * Cmid_pad + Cout_pad * Npool),
        transcendentals=0,
        bytes_accessed=int(grid * (in_block + out_block)))

    out, pooled_parts = pl.pallas_call(
        _spc_fused_kernel,
        out_shape=(jax.ShapeDtypeStruct((Cout_pad, Wstore), compute_dtype),
                   jax.ShapeDtypeStruct((grid, Cout_pad, Npool), jnp.float32)),
        grid_spec=pltpu.PrefetchScalarGridSpec(
            num_scalar_prefetch=0, grid=(grid,),
            in_specs=[
                pl.BlockSpec((cin_store, tq), lambda i: (0, i + 1)),
                pl.BlockSpec((1, tq), lambda i: (0, i + 1)),
                pl.BlockSpec((tq, Npool), lambda i: (i + 1, 0)),
                pl.BlockSpec((Cmid_pad, cin_store), lambda i: (0, 0)),
                pl.BlockSpec((Cmid_pad, 1), lambda i: (0, 0)),
                pl.BlockSpec((Cout_pad, Cmid_pad), lambda i: (0, 0)),
                pl.BlockSpec((Cout_pad, 1), lambda i: (0, 0)),
            ],
            out_specs=[
                pl.BlockSpec((Cout_pad, tq), lambda i: (0, i + 1)),
                pl.BlockSpec((1, Cout_pad, Npool), lambda i: (i, 0, 0)),
            ]),
        compiler_params=pltpu.CompilerParams(
            dimension_semantics=("parallel",),
            vmem_limit_bytes=vmem_limit),
        cost_estimate=cost,
    )(x, mask, pool, w1m, b1m, w2m, b2m)

    pooled = jnp.sum(pooled_parts, axis=0)[:Cout, :]          # (Cout, N) global avg pool
    return out, pooled


# ---------------------------------------------------------------------------
# GroupUnit forward: everything heavy in Pallas, tiny CALayer glue in jnp.
# ---------------------------------------------------------------------------
def group_unit_pallas(x_nchw, params, res_scale, *, compute_dtype=jnp.bfloat16,
                      tq_max=2048):
    N, C0, H, W = x_nchw.shape
    geo = make_geometry(N, H, W, tq_max=tq_max)
    mask, pool = make_mask_pool(geo)
    conv = functools.partial(conv3x3_flat, geo=geo, mask=mask,
                             compute_dtype=compute_dtype)
    n_feats = params["hat_w"].shape[0]

    h = conv([to_flat(x_nchw, geo, compute_dtype)], params["hat_w"], params["hat_b"])
    skip = h                                                        # SSPN long skip
    img_id = jnp.clip(jnp.arange(geo["Wpad"]) // (geo["Hp"] * geo["Wp"]), 0, N - 1)

    for blk in params["blocks"]:
        # SSB.spa (ResBlock): conv3x3 + ReLU, conv3x3 with fused *res_scale and +h.
        t = conv([h], blk["spa_w1"], blk["spa_b1"], apply_relu=True)
        h = conv([t], blk["spa_w2"], blk["spa_b2"], out_scale=res_scale, residual=h)
        # SSB.spc (ResAttentionBlock): fused conv1x1 -> ReLU -> conv1x1 + pooled sums.
        t2, pooled = spc_fused(h, blk["spc_w1"], blk["spc_b1"], blk["spc_w2"],
                               blk["spc_b2"], geo=geo, mask=mask, pool=pool,
                               compute_dtype=compute_dtype)
        # CALayer squeeze-excite on the (C, N) pooled vector (a few KFLOP: plain jnp).
        cr = blk["ca_wd"].shape[0]
        z = jnp.maximum(
            jnp.matmul(blk["ca_wd"].reshape(cr, -1), pooled,
                       precision=jax.lax.Precision.HIGHEST) + blk["ca_bd"][:, None], 0.0)
        s = jax.nn.sigmoid(
            jnp.matmul(blk["ca_wu"].reshape(n_feats, cr), z,
                       precision=jax.lax.Precision.HIGHEST) + blk["ca_bu"][:, None])
        rows = t2.shape[0]
        s = jnp.pad(s, ((0, rows - n_feats), (0, 0)))
        # h <- h + res_scale * (attention * t2): a single fused elementwise XLA pass.
        # TODO(synk): cannot join the spc kernel because the attention depends on a
        # global pool over the whole tensor.
        s_cols = jnp.concatenate(
            [jnp.zeros((rows, geo["tq"]), jnp.float32), s[:, img_id]], axis=1)
        h = (h.astype(jnp.float32) + res_scale * s_cols * t2.astype(jnp.float32)
             ).astype(compute_dtype)

    # SSPN long skip fused into the tail conv's input (input = h + skip built in VMEM).
    y = conv([h, skip], params["tail_w"], params["tail_b"])
    return from_flat(y, C0, geo)


# ---------------------------------------------------------------------------
# Pure-JAX reference (lax.conv, HIGHEST precision) and parameter init.
# ---------------------------------------------------------------------------
def _conv2d_ref(x, w, b, pad):
    y = jax.lax.conv_general_dilated(
        x, w, window_strides=(1, 1), padding=[(pad, pad), (pad, pad)],
        dimension_numbers=("NCHW", "OIHW", "NCHW"),
        precision=jax.lax.Precision.HIGHEST)
    return y + b.reshape(1, -1, 1, 1)


def group_unit_reference(x, params, res_scale):
    h = _conv2d_ref(x, params["hat_w"], params["hat_b"], 1)
    skip = h
    for blk in params["blocks"]:
        t = jnp.maximum(_conv2d_ref(h, blk["spa_w1"], blk["spa_b1"], 1), 0.0)
        t = _conv2d_ref(t, blk["spa_w2"], blk["spa_b2"], 1)
        h = h + res_scale * t
        t = jnp.maximum(_conv2d_ref(h, blk["spc_w1"], blk["spc_b1"], 0), 0.0)
        t = _conv2d_ref(t, blk["spc_w2"], blk["spc_b2"], 0)
        pooled = jnp.mean(t, axis=(2, 3), keepdims=True)
        z = jnp.maximum(_conv2d_ref(pooled, blk["ca_wd"], blk["ca_bd"], 0), 0.0)
        s = jax.nn.sigmoid(_conv2d_ref(z, blk["ca_wu"], blk["ca_bu"], 0))
        t = t * s
        h = h + res_scale * t
    h = h + skip
    return _conv2d_ref(h, params["tail_w"], params["tail_b"], 1)


def _conv_init(key, cin, cout, k):
    kw, kb = jax.random.split(key)
    bound = 1.0 / math.sqrt(cin * k * k)
    w = jax.random.uniform(kw, (cout, cin, k, k), dtype=jnp.float32,
                           minval=-bound, maxval=bound)
    b = jax.random.uniform(kb, (cout,), dtype=jnp.float32,
                           minval=-bound, maxval=bound)
    return w, b


def init_group_unit_params(key, n_colors, n_feats, n_blocks, reduction=16):
    keys = jax.random.split(key, n_blocks + 2)
    hat_w, hat_b = _conv_init(keys[0], n_colors, n_feats, 3)
    tail_w, tail_b = _conv_init(keys[1], n_feats, n_colors, 3)
    cr = max(1, n_feats // reduction)
    blocks = []
    for i in range(n_blocks):
        ks = jax.random.split(keys[2 + i], 6)
        spa_w1, spa_b1 = _conv_init(ks[0], n_feats, n_feats, 3)
        spa_w2, spa_b2 = _conv_init(ks[1], n_feats, n_feats, 3)
        spc_w1, spc_b1 = _conv_init(ks[2], n_feats, n_feats, 1)
        spc_w2, spc_b2 = _conv_init(ks[3], n_feats, n_feats, 1)
        ca_wd, ca_bd = _conv_init(ks[4], n_feats, cr, 1)
        ca_wu, ca_bu = _conv_init(ks[5], cr, n_feats, 1)
        blocks.append(dict(
            spa_w1=spa_w1, spa_b1=spa_b1, spa_w2=spa_w2, spa_b2=spa_b2,
            spc_w1=spc_w1, spc_b1=spc_b1, spc_w2=spc_w2, spc_b2=spc_b2,
            ca_wd=ca_wd, ca_bd=ca_bd, ca_wu=ca_wu, ca_bu=ca_bu))
    return dict(hat_w=hat_w, hat_b=hat_b, tail_w=tail_w, tail_b=tail_b,
                blocks=blocks)


if __name__ == "__main__":
    # GroupUnit(n_colors=8, n_feats=32, n_blocks=2, act=ReLU, res_scale=0.1, use_tail=True)
    N, n_colors, H, W = 2, 8, 16, 16
    n_feats, n_blocks, res_scale = 32, 2, 0.1

    kp, kx = jax.random.split(jax.random.PRNGKey(0))
    params = init_group_unit_params(kp, n_colors, n_feats, n_blocks)
    x = jax.random.normal(kx, (N, n_colors, H, W), dtype=jnp.float32)

    fwd = jax.jit(functools.partial(group_unit_pallas, res_scale=res_scale))
    out = jax.block_until_ready(fwd(x, params))

    ref = jax.block_until_ready(group_unit_reference(x, params, res_scale))
    assert out.shape == ref.shape == (N, n_colors, H, W), (out.shape, ref.shape)
    # bf16 operands / activations (f32 accumulation) -> loose-but-meaningful tolerance.
    err = float(jnp.max(jnp.abs(out - ref)))
    assert err < 5e-2, f"max abs error vs reference: {err}"

    print("KERNEL_OK")
</pallas_src>

<mosaic_0001>
module attributes {stable_mosaic.version = 11 : i64} {
  func.func @_conv3x3_kernel(%arg0: i32, %arg1: memref<8x128xbf16, #tpu.memory_space<vmem>>, %arg2: memref<8x128xbf16, #tpu.memory_space<vmem>>, %arg3: memref<8x128xbf16, #tpu.memory_space<vmem>>, %arg4: memref<1x128xf32, #tpu.memory_space<vmem>>, %arg5: memref<9x32x8xbf16, #tpu.memory_space<vmem>>, %arg6: memref<32x1xf32, #tpu.memory_space<vmem>>, %arg7: memref<32x128xbf16, #tpu.memory_space<vmem>>) attributes {dimension_semantics = [#tpu.dimension_semantics<parallel>], iteration_bounds = array<i64: 6>, scalar_prefetch = 0 : i64, scratch_operands = 0 : i64, tpu.core_type = #tpu.core_type<tc>, window_params = [{transform_indices = @transform_0, window_bounds = array<i64: 8, 128>}, {transform_indices = @transform_1, window_bounds = array<i64: 8, 128>}, {transform_indices = @transform_2, window_bounds = array<i64: 8, 128>}, {transform_indices = @transform_3, window_bounds = array<i64: 1, 128>}, {pipeline_mode = #tpu.pipeline_mode<synchronous>, transform_indices = @transform_4, window_bounds = array<i64: 9, 32, 8>}, {pipeline_mode = #tpu.pipeline_mode<synchronous>, transform_indices = @transform_5, window_bounds = array<i64: 32, 1>}, {transform_indices = @transform_6, window_bounds = array<i64: 32, 128>}]} {
    %c0 = arith.constant 0 : index
    %c0_0 = arith.constant 0 : index
    %0 = vector.load %arg1[%c0, %c0_0] : memref<8x128xbf16, #tpu.memory_space<vmem>>, vector<8x128xbf16>
    %c0_1 = arith.constant 0 : index
    %c0_2 = arith.constant 0 : index
    %1 = vector.load %arg2[%c0_1, %c0_2] : memref<8x128xbf16, #tpu.memory_space<vmem>>, vector<8x128xbf16>
    %c0_3 = arith.constant 0 : index
    %c0_4 = arith.constant 0 : index
    %2 = vector.load %arg3[%c0_3, %c0_4] : memref<8x128xbf16, #tpu.memory_space<vmem>>, vector<8x128xbf16>
    %3 = tpu.concatenate %0, %1, %2 in 1 : vector<8x128xbf16>, vector<8x128xbf16>, vector<8x128xbf16> -> vector<8x384xbf16>
    %c0_5 = arith.constant 0 : index
    %c0_6 = arith.constant 0 : index
    %c0_7 = arith.constant 0 : index
    %4 = vector.load %arg5[%c0_5, %c0_6, %c0_7] : memref<9x32x8xbf16, #tpu.memory_space<vmem>>, vector<1x32x8xbf16>
    %5 = vector.shape_cast %4 : vector<1x32x8xbf16> to vector<32x8xbf16>
    %6 = vector.extract_strided_slice %3 {offsets = [0, 109], sizes = [8, 128], strides = [1, 1]} : vector<8x384xbf16> to vector<8x128xbf16>
    %cst = arith.constant dense<0.000000e+00> : vector<32x128xf32>
    %7 = tpu.matmul %5, %6, %cst {dimension_numbers = #tpu.dot_dimension_numbers<[1], [0], [0], [1], [0, 0, 1, 1], [], []>} : vector<32x8xbf16>, vector<8x128xbf16>, vector<32x128xf32> -> vector<32x128xf32>
    %c1 = arith.constant 1 : index
    %c0_8 = arith.constant 0 : index
    %c0_9 = arith.constant 0 : index
    %8 = vector.load %arg5[%c1, %c0_8, %c0_9] : memref<9x32x8xbf16, #tpu.memory_space<vmem>>, vector<1x32x8xbf16>
    %9 = vector.shape_cast %8 : vector<1x32x8xbf16> to vector<32x8xbf16>
    %10 = vector.extract_strided_slice %3 {offsets = [0, 110], sizes = [8, 128], strides = [1, 1]} : vector<8x384xbf16> to vector<8x128xbf16>
    %cst_10 = arith.constant dense<0.000000e+00> : vector<32x128xf32>
    %11 = tpu.matmul %9, %10, %cst_10 {dimension_numbers = #tpu.dot_dimension_numbers<[1], [0], [0], [1], [0, 0, 1, 1], [], []>} : vector<32x8xbf16>, vector<8x128xbf16>, vector<32x128xf32> -> vector<32x128xf32>
    %12 = arith.addf %7, %11 : vector<32x128xf32>
    %c2 = arith.constant 2 : index
    %c0_11 = arith.constant 0 : index
    %c0_12 = arith.constant 0 : index
    %13 = vector.load %arg5[%c2, %c0_11, %c0_12] : memref<9x32x8xbf16, #tpu.memory_space<vmem>>, vector<1x32x8xbf16>
    %14 = vector.shape_cast %13 : vector<1x32x8xbf16> to vector<32x8xbf16>
    %15 = vector.extract_strided_slice %3 {offsets = [0, 111], sizes = [8, 128], strides = [1, 1]} : vector<8x384xbf16> to vector<8x128xbf16>
    %cst_13 = arith.constant dense<0.000000e+00> : vector<32x128xf32>
    %16 = tpu.matmul %14, %15, %cst_13 {dimension_numbers = #tpu.dot_dimension_numbers<[1], [0], [0], [1], [0, 0, 1, 1], [], []>} : vector<32x8xbf16>, vector<8x128xbf16>, vector<32x128xf32> -> vector<32x128xf32>
    %17 = arith.addf %12, %16 : vector<32x128xf32>
    %c3 = arith.constant 3 : index
    %c0_14 = arith.constant 0 : index
    %c0_15 = arith.constant 0 : index
    %18 = vector.load %arg5[%c3, %c0_14, %c0_15] : memref<9x32x8xbf16, #tpu.memory_space<vmem>>, vector<1x32x8xbf16>
    %19 = vector.shape_cast %18 : vector<1x32x8xbf16> to vector<32x8xbf16>
    %20 = vector.extract_strided_slice %3 {offsets = [0, 127], sizes = [8, 128], strides = [1, 1]} : vector<8x384xbf16> to vector<8x128xbf16>
    %cst_16 = arith.constant dense<0.000000e+00> : vector<32x128xf32>
    %21 = tpu.matmul %19, %20, %cst_16 {dimension_numbers = #tpu.dot_dimension_numbers<[1], [0], [0], [1], [0, 0, 1, 1], [], []>} : vector<32x8xbf16>, vector<8x128xbf16>, vector<32x128xf32> -> vector<32x128xf32>
    %22 = arith.addf %17, %21 : vector<32x128xf32>
    %c4 = arith.constant 4 : index
    %c0_17 = arith.constant 0 : index
    %c0_18 = arith.constant 0 : index
    %23 = vector.load %arg5[%c4, %c0_17, %c0_18] : memref<9x32x8xbf16, #tpu.memory_space<vmem>>, vector<1x32x8xbf16>
    %24 = vector.shape_cast %23 : vector<1x32x8xbf16> to vector<32x8xbf16>
    %25 = vector.extract_strided_slice %3 {offsets = [0, 128], sizes = [8, 128], strides = [1, 1]} : vector<8x384xbf16> to vector<8x128xbf16>
    %cst_19 = arith.constant dense<0.000000e+00> : vector<32x128xf32>
    %26 = tpu.matmul %24, %25, %cst_19 {dimension_numbers = #tpu.dot_dimension_numbers<[1], [0], [0], [1], [0, 0, 1, 1], [], []>} : vector<32x8xbf16>, vector<8x128xbf16>, vector<32x128xf32> -> vector<32x128xf32>
    %27 = arith.addf %22, %26 : vector<32x128xf32>
    %c5 = arith.constant 5 : index
    %c0_20 = arith.constant 0 : index
    %c0_21 = arith.constant 0 : index
    %28 = vector.load %arg5[%c5, %c0_20, %c0_21] : memref<9x32x8xbf16, #tpu.memory_space<vmem>>, vector<1x32x8xbf16>
    %29 = vector.shape_cast %28 : vector<1x32x8xbf16> to vector<32x8xbf16>
    %30 = vector.extract_strided_slice %3 {offsets = [0, 129], sizes = [8, 128], strides = [1, 1]} : vector<8x384xbf16> to vector<8x128xbf16>
    %cst_22 = arith.constant dense<0.000000e+00> : vector<32x128xf32>
    %31 = tpu.matmul %29, %30, %cst_22 {dimension_numbers = #tpu.dot_dimension_numbers<[1], [0], [0], [1], [0, 0, 1, 1], [], []>} : vector<32x8xbf16>, vector<8x128xbf16>, vector<32x128xf32> -> vector<32x128xf32>
    %32 = arith.addf %27, %31 : vector<32x128xf32>
    %c6 = arith.constant 6 : index
    %c0_23 = arith.constant 0 : index
    %c0_24 = arith.constant 0 : index
    %33 = vector.load %arg5[%c6, %c0_23, %c0_24] : memref<9x32x8xbf16, #tpu.memory_space<vmem>>, vector<1x32x8xbf16>
    %34 = vector.shape_cast %33 : vector<1x32x8xbf16> to vector<32x8xbf16>
    %35 = vector.extract_strided_slice %3 {offsets = [0, 145], sizes = [8, 128], strides = [1, 1]} : vector<8x384xbf16> to vector<8x128xbf16>
    %cst_25 = arith.constant dense<0.000000e+00> : vector<32x128xf32>
    %36 = tpu.matmul %34, %35, %cst_25 {dimension_numbers = #tpu.dot_dimension_numbers<[1], [0], [0], [1], [0, 0, 1, 1], [], []>} : vector<32x8xbf16>, vector<8x128xbf16>, vector<32x128xf32> -> vector<32x128xf32>
    %37 = arith.addf %32, %36 : vector<32x128xf32>
    %c7 = arith.constant 7 : index
    %c0_26 = arith.constant 0 : index
    %c0_27 = arith.constant 0 : index
    %38 = vector.load %arg5[%c7, %c0_26, %c0_27] : memref<9x32x8xbf16, #tpu.memory_space<vmem>>, vector<1x32x8xbf16>
    %39 = vector.shape_cast %38 : vector<1x32x8xbf16> to vector<32x8xbf16>
    %40 = vector.extract_strided_slice %3 {offsets = [0, 146], sizes = [8, 128], strides = [1, 1]} : vector<8x384xbf16> to vector<8x128xbf16>
    %cst_28 = arith.constant dense<0.000000e+00> : vector<32x128xf32>
    %41 = tpu.matmul %39, %40, %cst_28 {dimension_numbers = #tpu.dot_dimension_numbers<[1], [0], [0], [1], [0, 0, 1, 1], [], []>} : vector<32x8xbf16>, vector<8x128xbf16>, vector<32x128xf32> -> vector<32x128xf32>
    %42 = arith.addf %37, %41 : vector<32x128xf32>
    %c8 = arith.constant 8 : index
    %c0_29 = arith.constant 0 : index
    %c0_30 = arith.constant 0 : index
    %43 = vector.load %arg5[%c8, %c0_29, %c0_30] : memref<9x32x8xbf16, #tpu.memory_space<vmem>>, vector<1x32x8xbf16>
    %44 = vector.shape_cast %43 : vector<1x32x8xbf16> to vector<32x8xbf16>
    %45 = vector.extract_strided_slice %3 {offsets = [0, 147], sizes = [8, 128], strides = [1, 1]} : vector<8x384xbf16> to vector<8x128xbf16>
    %cst_31 = arith.constant dense<0.000000e+00> : vector<32x128xf32>
    %46 = tpu.matmul %44, %45, %cst_31 {dimension_numbers = #tpu.dot_dimension_numbers<[1], [0], [0], [1], [0, 0, 1, 1], [], []>} : vector<32x8xbf16>, vector<8x128xbf16>, vector<32x128xf32> -> vector<32x128xf32>
    %47 = arith.addf %42, %46 : vector<32x128xf32>
    %c0_32 = arith.constant 0 : index
    %c0_33 = arith.constant 0 : index
    %48 = vector.load %arg6[%c0_32, %c0_33] : memref<32x1xf32, #tpu.memory_space<vmem>>, vector<32x1xf32>
    %49 = vector.broadcast %48 : vector<32x1xf32> to vector<32x128xf32>
    %50 = arith.addf %47, %49 : vector<32x128xf32>
    %c0_34 = arith.constant 0 : index
    %c0_35 = arith.constant 0 : index
    %51 = vector.load %arg4[%c0_34, %c0_35] : memref<1x128xf32, #tpu.memory_space<vmem>>, vector<1x128xf32>
    %cst_36 = arith.constant 0.000000e+00 : f32
    %52 = vector.broadcast %cst_36 : f32 to vector<1x128xf32>
    %53 = arith.cmpf ogt, %51, %52 : vector<1x128xf32>
    %cst_37 = arith.constant 0.000000e+00 : f32
    %54 = vector.shape_cast %53 : vector<1x128xi1> to vector<1x128xi1>
    %55 = vector.broadcast %54 : vector<1x128xi1> to vector<32x128xi1>
    %56 = vector.broadcast %cst_37 : f32 to vector<32x128xf32>
    %57 = arith.select %55, %50, %56 : vector<32x128xi1>, vector<32x128xf32>
    %58 = arith.truncf %57 : vector<32x128xf32> to vector<32x128xbf16>
    %c0_38 = arith.constant 0 : index
    %c0_39 = arith.constant 0 : index
    %59 = vector.load %arg7[%c0_38, %c0_39] : memref<32x128xbf16, #tpu.memory_space<vmem>>, vector<32x128xbf16>
    tpu.vector_store %arg7[%c0_38, %c0_39], %58 {strides = array<i32>} : memref<32x128xbf16, #tpu.memory_space<vmem>>, vector<32x128xbf16>,
    return
  }
  func.func @transform_0(%arg0: i32) -> (i32, i32) {
    %c1_i32 = arith.constant 1 : i32
    %0 = arith.addi %arg0, %c1_i32 : i32
    %c1_i32_0 = arith.constant 1 : i32
    %1 = arith.muli %0, %c1_i32_0 : i32
    %c1_i32_1 = arith.constant 1 : i32
    %2 = arith.subi %1, %c1_i32_1 : i32
    %c0_i32 = arith.constant 0 : i32
    %c0_i32_2 = arith.constant 0 : i32
    return %c0_i32, %2 : i32, i32
  }
  func.func @transform_1(%arg0: i32) -> (i32, i32) {
    %c1_i32 = arith.constant 1 : i32
    %0 = arith.addi %arg0, %c1_i32 : i32
    %c0_i32 = arith.constant 0 : i32
    %c0_i32_0 = arith.constant 0 : i32
    return %c0_i32, %0 : i32, i32
  }
  func.func @transform_2(%arg0: i32) -> (i32, i32) {
    %c2_i32 = arith.constant 2 : i32
    %0 = arith.addi %arg0, %c2_i32 : i32
    %c1_i32 = arith.constant 1 : i32
    %1 = arith.muli %0, %c1_i32 : i32
    %c6_i32 = arith.constant 6 : i32
    %2 = arith.minsi %1, %c6_i32 : i32
    %c0_i32 = arith.constant 0 : i32
    %c0_i32_0 = arith.constant 0 : i32
    return %c0_i32, %2 : i32, i32
  }
  func.func @transform_3(%arg0: i32) -> (i32, i32) {
    %c1_i32 = arith.constant 1 : i32
    %0 = arith.addi %arg0, %c1_i32 : i32
    %c0_i32 = arith.constant 0 : i32
    %c0_i32_0 = arith.constant 0 : i32
    return %c0_i32, %0 : i32, i32
  }
  func.func @transform_4(%arg0: i32) -> (i32, i32, i32) {
    %c0_i32 = arith.constant 0 : i32
    %c0_i32_0 = arith.constant 0 : i32
    %c0_i32_1 = arith.constant 0 : i32
    %c0_i32_2 = arith.constant 0 : i32
    return %c0_i32, %c0_i32_0, %c0_i32_1 : i32, i32, i32
  }
  func.func @transform_5(%arg0: i32) -> (i32, i32) {
    %c0_i32 = arith.constant 0 : i32
    %c0_i32_0 = arith.constant 0 : i32
    %c0_i32_1 = arith.constant 0 : i32
    return %c0_i32, %c0_i32_0 : i32, i32
  }
  func.func @transform_6(%arg0: i32) -> (i32, i32) {
    %c1_i32 = arith.constant 1 : i32
    %0 = arith.addi %arg0, %c1_i32 : i32
    %c0_i32 = arith.constant 0 : i32
    %c0_i32_0 = arith.constant 0 : i32
    return %c0_i32, %0 : i32, i32
  }
}

module attributes {stable_mosaic.version = 11 : i64} {
  func.func @_conv3x3_kernel(%arg0: i32, %arg1: memref<32x128xbf16, #tpu.memory_space<vmem>>, %arg2: memref<32x128xbf16, #tpu.memory_space<vmem>>, %arg3: memref<32x128xbf16, #tpu.memory_space<vmem>>, %arg4: memref<1x128xf32, #tpu.memory_space<vmem>>, %arg5: memref<9x32x32xbf16, #tpu.memory_space<vmem>>, %arg6: memref<32x1xf32, #tpu.memory_space<vmem>>, %arg7: memref<32x128xbf16, #tpu.memory_space<vmem>>) attributes {dimension_semantics = [#tpu.dimension_semantics<parallel>], iteration_bounds = array<i64: 6>, scalar_prefetch = 0 : i64, scratch_operands = 0 : i64, tpu.core_type = #tpu.core_type<tc>, window_params = [{transform_indices = @transform_0, window_bounds = array<i64: 32, 128>}, {transform_indices = @transform_1, window_bounds = array<i64: 32, 128>}, {transform_indices = @transform_2, window_bounds = array<i64: 32, 128>}, {transform_indices = @transform_3, window_bounds = array<i64: 1, 128>}, {pipeline_mode = #tpu.pipeline_mode<synchronous>, transform_indices = @transform_4, window_bounds = array<i64: 9, 32, 32>}, {pipeline_mode = #tpu.pipeline_mode<synchronous>, transform_indices = @transform_5, window_bounds = array<i64: 32, 1>}, {transform_indices = @transform_6, window_bounds = array<i64: 32, 128>}]} {
    %c0 = arith.constant 0 : index
    %c0_0 = arith.constant 0 : index
    %0 = vector.load %arg1[%c0, %c0_0] : memref<32x128xbf16, #tpu.memory_space<vmem>>, vector<32x128xbf16>
    %c0_1 = arith.constant 0 : index
    %c0_2 = arith.constant 0 : index
    %1 = vector.load %arg2[%c0_1, %c0_2] : memref<32x128xbf16, #tpu.memory_space<vmem>>, vector<32x128xbf16>
    %c0_3 = arith.constant 0 : index
    %c0_4 = arith.constant 0 : index
    %2 = vector.load %arg3[%c0_3, %c0_4] : memref<32x128xbf16, #tpu.memory_space<vmem>>, vector<32x128xbf16>
    %3 = tpu.concatenate %0, %1, %2 in 1 : vector<32x128xbf16>, vector<32x128xbf16>, vector<32x128xbf16> -> vector<32x384xbf16>
    %c0_5 = arith.constant 0 : index
    %c0_6 = arith.constant 0 : index
    %c0_7 = arith.constant 0 : index
    %4 = vector.load %arg5[%c0_5, %c0_6, %c0_7] : memref<9x32x32xbf16, #tpu.memory_space<vmem>>, vector<1x32x32xbf16>
    %5 = vector.shape_cast %4 : vector<1x32x32xbf16> to vector<32x32xbf16>
    %6 = vector.extract_strided_slice %3 {offsets = [0, 109], sizes = [32, 128], strides = [1, 1]} : vector<32x384xbf16> to vector<32x128xbf16>
    %cst = arith.constant dense<0.000000e+00> : vector<32x128xf32>
    %7 = tpu.matmul %5, %6, %cst {dimension_numbers = #tpu.dot_dimension_numbers<[1], [0], [0], [1], [0, 0, 1, 1], [], []>} : vector<32x32xbf16>, vector<32x128xbf16>, vector<32x128xf32> -> vector<32x128xf32>
    %c1 = arith.constant 1 : index
    %c0_8 = arith.constant 0 : index
    %c0_9 = arith.constant 0 : index
    %8 = vector.load %arg5[%c1, %c0_8, %c0_9] : memref<9x32x32xbf16, #tpu.memory_space<vmem>>, vector<1x32x32xbf16>
    %9 = vector.shape_cast %8 : vector<1x32x32xbf16> to vector<32x32xbf16>
    %10 = vector.extract_strided_slice %3 {offsets = [0, 110], sizes = [32, 128], strides = [1, 1]} : vector<32x384xbf16> to vector<32x128xbf16>
    %cst_10 = arith.constant dense<0.000000e+00> : vector<32x128xf32>
    %11 = tpu.matmul %9, %10, %cst_10 {dimension_numbers = #tpu.dot_dimension_numbers<[1], [0], [0], [1], [0, 0, 1, 1], [], []>} : vector<32x32xbf16>, vector<32x128xbf16>, vector<32x128xf32> -> vector<32x128xf32>
    %12 = arith.addf %7, %11 : vector<32x128xf32>
    %c2 = arith.constant 2 : index
    %c0_11 = arith.constant 0 : index
    %c0_12 = arith.constant 0 : index
    %13 = vector.load %arg5[%c2, %c0_11, %c0_12] : memref<9x32x32xbf16, #tpu.memory_space<vmem>>, vector<1x32x32xbf16>
    %14 = vector.shape_cast %13 : vector<1x32x32xbf16> to vector<32x32xbf16>
    %15 = vector.extract_strided_slice %3 {offsets = [0, 111], sizes = [32, 128], strides = [1, 1]} : vector<32x384xbf16> to vector<32x128xbf16>
    %cst_13 = arith.constant dense<0.000000e+00> : vector<32x128xf32>
    %16 = tpu.matmul %14, %15, %cst_13 {dimension_numbers = #tpu.dot_dimension_numbers<[1], [0], [0], [1], [0, 0, 1, 1], [], []>} : vector<32x32xbf16>, vector<32x128xbf16>, vector<32x128xf32> -> vector<32x128xf32>
    %17 = arith.addf %12, %16 : vector<32x128xf32>
    %c3 = arith.constant 3 : index
    %c0_14 = arith.constant 0 : index
    %c0_15 = arith.constant 0 : index
    %18 = vector.load %arg5[%c3, %c0_14, %c0_15] : memref<9x32x32xbf16, #tpu.memory_space<vmem>>, vector<1x32x32xbf16>
    %19 = vector.shape_cast %18 : vector<1x32x32xbf16> to vector<32x32xbf16>
    %20 = vector.extract_strided_slice %3 {offsets = [0, 127], sizes = [32, 128], strides = [1, 1]} : vector<32x384xbf16> to vector<32x128xbf16>
    %cst_16 = arith.constant dense<0.000000e+00> : vector<32x128xf32>
    %21 = tpu.matmul %19, %20, %cst_16 {dimension_numbers = #tpu.dot_dimension_numbers<[1], [0], [0], [1], [0, 0, 1, 1], [], []>} : vector<32x32xbf16>, vector<32x128xbf16>, vector<32x128xf32> -> vector<32x128xf32>
    %22 = arith.addf %17, %21 : vector<32x128xf32>
    %c4 = arith.constant 4 : index
    %c0_17 = arith.constant 0 : index
    %c0_18 = arith.constant 0 : index
    %23 = vector.load %arg5[%c4, %c0_17, %c0_18] : memref<9x32x32xbf16, #tpu.memory_space<vmem>>, vector<1x32x32xbf16>
    %24 = vector.shape_cast %23 : vector<1x32x32xbf16> to vector<32x32xbf16>
    %25 = vector.extract_strided_slice %3 {offsets = [0, 128], sizes = [32, 128], strides = [1, 1]} : vector<32x384xbf16> to vector<32x128xbf16>
    %cst_19 = arith.constant dense<0.000000e+00> : vector<32x128xf32>
    %26 = tpu.matmul %24, %25, %cst_19 {dimension_numbers = #tpu.dot_dimension_numbers<[1], [0], [0], [1], [0, 0, 1, 1], [], []>} : vector<32x32xbf16>, vector<32x128xbf16>, vector<32x128xf32> -> vector<32x128xf32>
    %27 = arith.addf %22, %26 : vector<32x128xf32>
    %c5 = arith.constant 5 : index
    %c0_20 = arith.constant 0 : index
    %c0_21 = arith.constant 0 : index
    %28 = vector.load %arg5[%c5, %c0_20, %c0_21] : memref<9x32x32xbf16, #tpu.memory_space<vmem>>, vector<1x32x32xbf16>
    %29 = vector.shape_cast %28 : vector<1x32x32xbf16> to vector<32x32xbf16>
    %30 = vector.extract_strided_slice %3 {offsets = [0, 129], sizes = [32, 128], strides = [1, 1]} : vector<32x384xbf16> to vector<32x128xbf16>
    %cst_22 = arith.constant dense<0.000000e+00> : vector<32x128xf32>
    %31 = tpu.matmul %29, %30, %cst_22 {dimension_numbers = #tpu.dot_dimension_numbers<[1], [0], [0], [1], [0, 0, 1, 1], [], []>} : vector<32x32xbf16>, vector<32x128xbf16>, vector<32x128xf32> -> vector<32x128xf32>
    %32 = arith.addf %27, %31 : vector<32x128xf32>
    %c6 = arith.constant 6 : index
    %c0_23 = arith.constant 0 : index
    %c0_24 = arith.constant 0 : index
    %33 = vector.load %arg5[%c6, %c0_23, %c0_24] : memref<9x32x32xbf16, #tpu.memory_space<vmem>>, vector<1x32x32xbf16>
    %34 = vector.shape_cast %33 : vector<1x32x32xbf16> to vector<32x32xbf16>
    %35 = vector.extract_strided_slice %3 {offsets = [0, 145], sizes = [32, 128], strides = [1, 1]} : vector<32x384xbf16> to vector<32x128xbf16>
    %cst_25 = arith.constant dense<0.000000e+00> : vector<32x128xf32>
    %36 = tpu.matmul %34, %35, %cst_25 {dimension_numbers = #tpu.dot_dimension_numbers<[1], [0], [0], [1], [0, 0, 1, 1], [], []>} : vector<32x32xbf16>, vector<32x128xbf16>, vector<32x128xf32> -> vector<32x128xf32>
    %37 = arith.addf %32, %36 : vector<32x128xf32>
    %c7 = arith.constant 7 : index
    %c0_26 = arith.constant 0 : index
    %c0_27 = arith.constant 0 : index
    %38 = vector.load %arg5[%c7, %c0_26, %c0_27] : memref<9x32x32xbf16, #tpu.memory_space<vmem>>, vector<1x32x32xbf16>
    %39 = vector.shape_cast %38 : vector<1x32x32xbf16> to vector<32x32xbf16>
    %40 = vector.extract_strided_slice %3 {offsets = [0, 146], sizes = [32, 128], strides = [1, 1]} : vector<32x384xbf16> to vector<32x128xbf16>
    %cst_28 = arith.constant dense<0.000000e+00> : vector<32x128xf32>
    %41 = tpu.matmul %39, %40, %cst_28 {dimension_numbers = #tpu.dot_dimension_numbers<[1], [0], [0], [1], [0, 0, 1, 1], [], []>} : vector<32x32xbf16>, vector<32x128xbf16>, vector<32x128xf32> -> vector<32x128xf32>
    %42 = arith.addf %37, %41 : vector<32x128xf32>
    %c8 = arith.constant 8 : index
    %c0_29 = arith.constant 0 : index
    %c0_30 = arith.constant 0 : index
    %43 = vector.load %arg5[%c8, %c0_29, %c0_30] : memref<9x32x32xbf16, #tpu.memory_space<vmem>>, vector<1x32x32xbf16>
    %44 = vector.shape_cast %43 : vector<1x32x32xbf16> to vector<32x32xbf16>
    %45 = vector.extract_strided_slice %3 {offsets = [0, 147], sizes = [32, 128], strides = [1, 1]} : vector<32x384xbf16> to vector<32x128xbf16>
    %cst_31 = arith.constant dense<0.000000e+00> : vector<32x128xf32>
    %46 = tpu.matmul %44, %45, %cst_31 {dimension_numbers = #tpu.dot_dimension_numbers<[1], [0], [0], [1], [0, 0, 1, 1], [], []>} : vector<32x32xbf16>, vector<32x128xbf16>, vector<32x128xf32> -> vector<32x128xf32>
    %47 = arith.addf %42, %46 : vector<32x128xf32>
    %c0_32 = arith.constant 0 : index
    %c0_33 = arith.constant 0 : index
    %48 = vector.load %arg6[%c0_32, %c0_33] : memref<32x1xf32, #tpu.memory_space<vmem>>, vector<32x1xf32>
    %49 = vector.broadcast %48 : vector<32x1xf32> to vector<32x128xf32>
    %50 = arith.addf %47, %49 : vector<32x128xf32>
    %cst_34 = arith.constant 0.000000e+00 : f32
    %51 = vector.broadcast %cst_34 : f32 to vector<32x128xf32>
    %52 = arith.maximumf %50, %51 : vector<32x128xf32>
    %c0_35 = arith.constant 0 : index
    %c0_36 = arith.constant 0 : index
    %53 = vector.load %arg4[%c0_35, %c0_36] : memref<1x128xf32, #tpu.memory_space<vmem>>, vector<1x128xf32>
    %cst_37 = arith.constant 0.000000e+00 : f32
    %54 = vector.broadcast %cst_37 : f32 to vector<1x128xf32>
    %55 = arith.cmpf ogt, %53, %54 : vector<1x128xf32>
    %cst_38 = arith.constant 0.000000e+00 : f32
    %56 = vector.shape_cast %55 : vector<1x128xi1> to vector<1x128xi1>
    %57 = vector.broadcast %56 : vector<1x128xi1> to vector<32x128xi1>
    %58 = vector.broadcast %cst_38 : f32 to vector<32x128xf32>
    %59 = arith.select %57, %52, %58 : vector<32x128xi1>, vector<32x128xf32>
    %60 = arith.truncf %59 : vector<32x128xf32> to vector<32x128xbf16>
    %c0_39 = arith.constant 0 : index
    %c0_40 = arith.constant 0 : index
    %61 = vector.load %arg7[%c0_39, %c0_40] : memref<32x128xbf16, #tpu.memory_space<vmem>>, vector<32x128xbf16>
    tpu.vector_store %arg7[%c0_39, %c0_40], %60 {strides = array<i32>} : memref<32x128xbf16, #tpu.memory_space<vmem>>, vector<32x128xbf16>,
    return
  }
  func.func @transform_0(%arg0: i32) -> (i32, i32) {
    %c1_i32 = arith.constant 1 : i32
    %0 = arith.addi %arg0, %c1_i32 : i32
    %c1_i32_0 = arith.constant 1 : i32
    %1 = arith.muli %0, %c1_i32_0 : i32
    %c1_i32_1 = arith.constant 1 : i32
    %2 = arith.subi %1, %c1_i32_1 : i32
    %c0_i32 = arith.constant 0 : i32
    %c0_i32_2 = arith.constant 0 : i32
    return %c0_i32, %2 : i32, i32
  }
  func.func @transform_1(%arg0: i32) -> (i32, i32) {
    %c1_i32 = arith.constant 1 : i32
    %0 = arith.addi %arg0, %c1_i32 : i32
    %c0_i32 = arith.constant 0 : i32
    %c0_i32_0 = arith.constant 0 : i32
    return %c0_i32, %0 : i32, i32
  }
  func.func @transform_2(%arg0: i32) -> (i32, i32) {
    %c2_i32 = arith.constant 2 : i32
    %0 = arith.addi %arg0, %c2_i32 : i32
    %c1_i32 = arith.constant 1 : i32
    %1 = arith.muli %0, %c1_i32 : i32
    %c6_i32 = arith.constant 6 : i32
    %2 = arith.minsi %1, %c6_i32 : i32
    %c0_i32 = arith.constant 0 : i32
    %c0_i32_0 = arith.constant 0 : i32
    return %c0_i32, %2 : i32, i32
  }
  func.func @transform_3(%arg0: i32) -> (i32, i32) {
    %c1_i32 = arith.constant 1 : i32
    %0 = arith.addi %arg0, %c1_i32 : i32
    %c0_i32 = arith.constant 0 : i32
    %c0_i32_0 = arith.constant 0 : i32
    return %c0_i32, %0 : i32, i32
  }
  func.func @transform_4(%arg0: i32) -> (i32, i32, i32) {
    %c0_i32 = arith.constant 0 : i32
    %c0_i32_0 = arith.constant 0 : i32
    %c0_i32_1 = arith.constant 0 : i32
    %c0_i32_2 = arith.constant 0 : i32
    return %c0_i32, %c0_i32_0, %c0_i32_1 : i32, i32, i32
  }
  func.func @transform_5(%arg0: i32) -> (i32, i32) {
    %c0_i32 = arith.constant 0 : i32
    %c0_i32_0 = arith.constant 0 : i32
    %c0_i32_1 = arith.constant 0 : i32
    return %c0_i32, %c0_i32_0 : i32, i32
  }
  func.func @transform_6(%arg0: i32) -> (i32, i32) {
    %c1_i32 = arith.constant 1 : i32
    %0 = arith.addi %arg0, %c1_i32 : i32
    %c0_i32 = arith.constant 0 : i32
    %c0_i32_0 = arith.constant 0 : i32
    return %c0_i32, %0 : i32, i32
  }
}

module attributes {stable_mosaic.version = 11 : i64} {
  func.func @_conv3x3_kernel(%arg0: i32, %arg1: memref<32x128xbf16, #tpu.memory_space<vmem>>, %arg2: memref<32x128xbf16, #tpu.memory_space<vmem>>, %arg3: memref<32x128xbf16, #tpu.memory_space<vmem>>, %arg4: memref<1x128xf32, #tpu.memory_space<vmem>>, %arg5: memref<9x32x32xbf16, #tpu.memory_space<vmem>>, %arg6: memref<32x1xf32, #tpu.memory_space<vmem>>, %arg7: memref<32x128xbf16, #tpu.memory_space<vmem>>, %arg8: memref<32x128xbf16, #tpu.memory_space<vmem>>) attributes {dimension_semantics = [#tpu.dimension_semantics<parallel>], iteration_bounds = array<i64: 6>, scalar_prefetch = 0 : i64, scratch_operands = 0 : i64, tpu.core_type = #tpu.core_type<tc>, window_params = [{transform_indices = @transform_0, window_bounds = array<i64: 32, 128>}, {transform_indices = @transform_1, window_bounds = array<i64: 32, 128>}, {transform_indices = @transform_2, window_bounds = array<i64: 32, 128>}, {transform_indices = @transform_3, window_bounds = array<i64: 1, 128>}, {pipeline_mode = #tpu.pipeline_mode<synchronous>, transform_indices = @transform_4, window_bounds = array<i64: 9, 32, 32>}, {pipeline_mode = #tpu.pipeline_mode<synchronous>, transform_indices = @transform_5, window_bounds = array<i64: 32, 1>}, {transform_indices = @transform_6, window_bounds = array<i64: 32, 128>}, {transform_indices = @transform_7, window_bounds = array<i64: 32, 128>}]} {
    %c0 = arith.constant 0 : index
    %c0_0 = arith.constant 0 : index
    %0 = vector.load %arg1[%c0, %c0_0] : memref<32x128xbf16, #tpu.memory_space<vmem>>, vector<32x128xbf16>
    %c0_1 = arith.constant 0 : index
    %c0_2 = arith.constant 0 : index
    %1 = vector.load %arg2[%c0_1, %c0_2] : memref<32x128xbf16, #tpu.memory_space<vmem>>, vector<32x128xbf16>
    %c0_3 = arith.constant 0 : index
    %c0_4 = arith.constant 0 : index
    %2 = vector.load %arg3[%c0_3, %c0_4] : memref<32x128xbf16, #tpu.memory_space<vmem>>, vector<32x128xbf16>
    %3 = tpu.concatenate %0, %1, %2 in 1 : vector<32x128xbf16>, vector<32x128xbf16>, vector<32x128xbf16> -> vector<32x384xbf16>
    %c0_5 = arith.constant 0 : index
    %c0_6 = arith.constant 0 : index
    %c0_7 = arith.constant 0 : index
    %4 = vector.load %arg5[%c0_5, %c0_6, %c0_7] : memref<9x32x32xbf16, #tpu.memory_space<vmem>>, vector<1x32x32xbf16>
    %5 = vector.shape_cast %4 : vector<1x32x32xbf16> to vector<32x32xbf16>
    %6 = vector.extract_strided_slice %3 {offsets = [0, 109], sizes = [32, 128], strides = [1, 1]} : vector<32x384xbf16> to vector<32x128xbf16>
    %cst = arith.constant dense<0.000000e+00> : vector<32x128xf32>
    %7 = tpu.matmul %5, %6, %cst {dimension_numbers = #tpu.dot_dimension_numbers<[1], [0], [0], [1], [0, 0, 1, 1], [], []>} : vector<32x32xbf16>, vector<32x128xbf16>, vector<32x128xf32> -> vector<32x128xf32>
    %c1 = arith.constant 1 : index
    %c0_8 = arith.constant 0 : index
    %c0_9 = arith.constant 0 : index
    %8 = vector.load %arg5[%c1, %c0_8, %c0_9] : memref<9x32x32xbf16, #tpu.memory_space<vmem>>, vector<1x32x32xbf16>
    %9 = vector.shape_cast %8 : vector<1x32x32xbf16> to vector<32x32xbf16>
    %10 = vector.extract_strided_slice %3 {offsets = [0, 110], sizes = [32, 128], strides = [1, 1]} : vector<32x384xbf16> to vector<32x128xbf16>
    %cst_10 = arith.constant dense<0.000000e+00> : vector<32x128xf32>
    %11 = tpu.matmul %9, %10, %cst_10 {dimension_numbers = #tpu.dot_dimension_numbers<[1], [0], [0], [1], [0, 0, 1, 1], [], []>} : vector<32x32xbf16>, vector<32x128xbf16>, vector<32x128xf32> -> vector<32x128xf32>
    %12 = arith.addf %7, %11 : vector<32x128xf32>
    %c2 = arith.constant 2 : index
    %c0_11 = arith.constant 0 : index
    %c0_12 = arith.constant 0 : index
    %13 = vector.load %arg5[%c2, %c0_11, %c0_12] : memref<9x32x32xbf16, #tpu.memory_space<vmem>>, vector<1x32x32xbf16>
    %14 = vector.shape_cast %13 : vector<1x32x32xbf16> to vector<32x32xbf16>
    %15 = vector.extract_strided_slice %3 {offsets = [0, 111], sizes = [32, 128], strides = [1, 1]} : vector<32x384xbf16> to vector<32x128xbf16>
    %cst_13 = arith.constant dense<0.000000e+00> : vector<32x128xf32>
    %16 = tpu.matmul %14, %15, %cst_13 {dimension_numbers = #tpu.dot_dimension_numbers<[1], [0], [0], [1], [0, 0, 1, 1], [], []>} : vector<32x32xbf16>, vector<32x128xbf16>, vector<32x128xf32> -> vector<32x128xf32>
    %17 = arith.addf %12, %16 : vector<32x128xf32>
    %c3 = arith.constant 3 : index
    %c0_14 = arith.constant 0 : index
    %c0_15 = arith.constant 0 : index
    %18 = vector.load %arg5[%c3, %c0_14, %c0_15] : memref<9x32x32xbf16, #tpu.memory_space<vmem>>, vector<1x32x32xbf16>
    %19 = vector.shape_cast %18 : vector<1x32x32xbf16> to vector<32x32xbf16>
    %20 = vector.extract_strided_slice %3 {offsets = [0, 127], sizes = [32, 128], strides = [1, 1]} : vector<32x384xbf16> to vector<32x128xbf16>
    %cst_16 = arith.constant dense<0.000000e+00> : vector<32x128xf32>
    %21 = tpu.matmul %19, %20, %cst_16 {dimension_numbers = #tpu.dot_dimension_numbers<[1], [0], [0], [1], [0, 0, 1, 1], [], []>} : vector<32x32xbf16>, vector<32x128xbf16>, vector<32x128xf32> -> vector<32x128xf32>
    %22 = arith.addf %17, %21 : vector<32x128xf32>
    %c4 = arith.constant 4 : index
    %c0_17 = arith.constant 0 : index
    %c0_18 = arith.constant 0 : index
    %23 = vector.load %arg5[%c4, %c0_17, %c0_18] : memref<9x32x32xbf16, #tpu.memory_space<vmem>>, vector<1x32x32xbf16>
    %24 = vector.shape_cast %23 : vector<1x32x32xbf16> to vector<32x32xbf16>
    %25 = vector.extract_strided_slice %3 {offsets = [0, 128], sizes = [32, 128], strides = [1, 1]} : vector<32x384xbf16> to vector<32x128xbf16>
    %cst_19 = arith.constant dense<0.000000e+00> : vector<32x128xf32>
    %26 = tpu.matmul %24, %25, %cst_19 {dimension_numbers = #tpu.dot_dimension_numbers<[1], [0], [0], [1], [0, 0, 1, 1], [], []>} : vector<32x32xbf16>, vector<32x128xbf16>, vector<32x128xf32> -> vector<32x128xf32>
    %27 = arith.addf %22, %26 : vector<32x128xf32>
    %c5 = arith.constant 5 : index
    %c0_20 = arith.constant 0 : index
    %c0_21 = arith.constant 0 : index
    %28 = vector.load %arg5[%c5, %c0_20, %c0_21] : memref<9x32x32xbf16, #tpu.memory_space<vmem>>, vector<1x32x32xbf16>
    %29 = vector.shape_cast %28 : vector<1x32x32xbf16> to vector<32x32xbf16>
    %30 = vector.extract_strided_slice %3 {offsets = [0, 129], sizes = [32, 128], strides = [1, 1]} : vector<32x384xbf16> to vector<32x128xbf16>
    %cst_22 = arith.constant dense<0.000000e+00> : vector<32x128xf32>
    %31 = tpu.matmul %29, %30, %cst_22 {dimension_numbers = #tpu.dot_dimension_numbers<[1], [0], [0], [1], [0, 0, 1, 1], [], []>} : vector<32x32xbf16>, vector<32x128xbf16>, vector<32x128xf32> -> vector<32x128xf32>
    %32 = arith.addf %27, %31 : vector<32x128xf32>
    %c6 = arith.constant 6 : index
    %c0_23 = arith.constant 0 : index
    %c0_24 = arith.constant 0 : index
    %33 = vector.load %arg5[%c6, %c0_23, %c0_24] : memref<9x32x32xbf16, #tpu.memory_space<vmem>>, vector<1x32x32xbf16>
    %34 = vector.shape_cast %33 : vector<1x32x32xbf16> to vector<32x32xbf16>
    %35 = vector.extract_strided_slice %3 {offsets = [0, 145], sizes = [32, 128], strides = [1, 1]} : vector<32x384xbf16> to vector<32x128xbf16>
    %cst_25 = arith.constant dense<0.000000e+00> : vector<32x128xf32>
    %36 = tpu.matmul %34, %35, %cst_25 {dimension_numbers = #tpu.dot_dimension_numbers<[1], [0], [0], [1], [0, 0, 1, 1], [], []>} : vector<32x32xbf16>, vector<32x128xbf16>, vector<32x128xf32> -> vector<32x128xf32>
    %37 = arith.addf %32, %36 : vector<32x128xf32>
    %c7 = arith.constant 7 : index
    %c0_26 = arith.constant 0 : index
    %c0_27 = arith.constant 0 : index
    %38 = vector.load %arg5[%c7, %c0_26, %c0_27] : memref<9x32x32xbf16, #tpu.memory_space<vmem>>, vector<1x32x32xbf16>
    %39 = vector.shape_cast %38 : vector<1x32x32xbf16> to vector<32x32xbf16>
    %40 = vector.extract_strided_slice %3 {offsets = [0, 146], sizes = [32, 128], strides = [1, 1]} : vector<32x384xbf16> to vector<32x128xbf16>
    %cst_28 = arith.constant dense<0.000000e+00> : vector<32x128xf32>
    %41 = tpu.matmul %39, %40, %cst_28 {dimension_numbers = #tpu.dot_dimension_numbers<[1], [0], [0], [1], [0, 0, 1, 1], [], []>} : vector<32x32xbf16>, vector<32x128xbf16>, vector<32x128xf32> -> vector<32x128xf32>
    %42 = arith.addf %37, %41 : vector<32x128xf32>
    %c8 = arith.constant 8 : index
    %c0_29 = arith.constant 0 : index
    %c0_30 = arith.constant 0 : index
    %43 = vector.load %arg5[%c8, %c0_29, %c0_30] : memref<9x32x32xbf16, #tpu.memory_space<vmem>>, vector<1x32x32xbf16>
    %44 = vector.shape_cast %43 : vector<1x32x32xbf16> to vector<32x32xbf16>
    %45 = vector.extract_strided_slice %3 {offsets = [0, 147], sizes = [32, 128], strides = [1, 1]} : vector<32x384xbf16> to vector<32x128xbf16>
    %cst_31 = arith.constant dense<0.000000e+00> : vector<32x128xf32>
    %46 = tpu.matmul %44, %45, %cst_31 {dimension_numbers = #tpu.dot_dimension_numbers<[1], [0], [0], [1], [0, 0, 1, 1], [], []>} : vector<32x32xbf16>, vector<32x128xbf16>, vector<32x128xf32> -> vector<32x128xf32>
    %47 = arith.addf %42, %46 : vector<32x128xf32>
    %c0_32 = arith.constant 0 : index
    %c0_33 = arith.constant 0 : index
    %48 = vector.load %arg6[%c0_32, %c0_33] : memref<32x1xf32, #tpu.memory_space<vmem>>, vector<32x1xf32>
    %49 = vector.broadcast %48 : vector<32x1xf32> to vector<32x128xf32>
    %50 = arith.addf %47, %49 : vector<32x128xf32>
    %cst_34 = arith.constant 1.000000e-01 : f32
    %51 = vector.broadcast %cst_34 : f32 to vector<32x128xf32>
    %52 = arith.mulf %50, %51 : vector<32x128xf32>
    %c0_35 = arith.constant 0 : index
    %c0_36 = arith.constant 0 : index
    %53 = vector.load %arg7[%c0_35, %c0_36] : memref<32x128xbf16, #tpu.memory_space<vmem>>, vector<32x128xbf16>
    %54 = arith.extf %53 : vector<32x128xbf16> to vector<32x128xf32>
    %55 = arith.addf %52, %54 : vector<32x128xf32>
    %c0_37 = arith.constant 0 : index
    %c0_38 = arith.constant 0 : index
    %56 = vector.load %arg4[%c0_37, %c0_38] : memref<1x128xf32, #tpu.memory_space<vmem>>, vector<1x128xf32>
    %cst_39 = arith.constant 0.000000e+00 : f32
    %57 = vector.broadcast %cst_39 : f32 to vector<1x128xf32>
    %58 = arith.cmpf ogt, %56, %57 : vector<1x128xf32>
    %cst_40 = arith.constant 0.000000e+00 : f32
    %59 = vector.shape_cast %58 : vector<1x128xi1> to vector<1x128xi1>
    %60 = vector.broadcast %59 : vector<1x128xi1> to vector<32x128xi1>
    %61 = vector.broadcast %cst_40 : f32 to vector<32x128xf32>
    %62 = arith.select %60, %55, %61 : vector<32x128xi1>, vector<32x128xf32>
    %63 = arith.truncf %62 : vector<32x128xf32> to vector<32x128xbf16>
    %c0_41 = arith.constant 0 : index
    %c0_42 = arith.constant 0 : index
    %64 = vector.load %arg8[%c0_41, %c0_42] : memref<32x128xbf16, #tpu.memory_space<vmem>>, vector<32x128xbf16>
    tpu.vector_store %arg8[%c0_41, %c0_42], %63 {strides = array<i32>} : memref<32x128xbf16, #tpu.memory_space<vmem>>, vector<32x128xbf16>,
    return
  }
  func.func @transform_0(%arg0: i32) -> (i32, i32) {
    %c1_i32 = arith.constant 1 : i32
    %0 = arith.addi %arg0, %c1_i32 : i32
    %c1_i32_0 = arith.constant 1 : i32
    %1 = arith.muli %0, %c1_i32_0 : i32
    %c1_i32_1 = arith.constant 1 : i32
    %2 = arith.subi %1, %c1_i32_1 : i32
    %c0_i32 = arith.constant 0 : i32
    %c0_i32_2 = arith.constant 0 : i32
    return %c0_i32, %2 : i32, i32
  }
  func.func @transform_1(%arg0: i32) -> (i32, i32) {
    %c1_i32 = arith.constant 1 : i32
    %0 = arith.addi %arg0, %c1_i32 : i32
    %c0_i32 = arith.constant 0 : i32
    %c0_i32_0 = arith.constant 0 : i32
    return %c0_i32, %0 : i32, i32
  }
  func.func @transform_2(%arg0: i32) -> (i32, i32) {
    %c2_i32 = arith.constant 2 : i32
    %0 = arith.addi %arg0, %c2_i32 : i32
    %c1_i32 = arith.constant 1 : i32
    %1 = arith.muli %0, %c1_i32 : i32
    %c6_i32 = arith.constant 6 : i32
    %2 = arith.minsi %1, %c6_i32 : i32
    %c0_i32 = arith.constant 0 : i32
    %c0_i32_0 = arith.constant 0 : i32
    return %c0_i32, %2 : i32, i32
  }
  func.func @transform_3(%arg0: i32) -> (i32, i32) {
    %c1_i32 = arith.constant 1 : i32
    %0 = arith.addi %arg0, %c1_i32 : i32
    %c0_i32 = arith.constant 0 : i32
    %c0_i32_0 = arith.constant 0 : i32
    return %c0_i32, %0 : i32, i32
  }
  func.func @transform_4(%arg0: i32) -> (i32, i32, i32) {
    %c0_i32 = arith.constant 0 : i32
    %c0_i32_0 = arith.constant 0 : i32
    %c0_i32_1 = arith.constant 0 : i32
    %c0_i32_2 = arith.constant 0 : i32
    return %c0_i32, %c0_i32_0, %c0_i32_1 : i32, i32, i32
  }
  func.func @transform_5(%arg0: i32) -> (i32, i32) {
    %c0_i32 = arith.constant 0 : i32
    %c0_i32_0 = arith.constant 0 : i32
    %c0_i32_1 = arith.constant 0 : i32
    return %c0_i32, %c0_i32_0 : i32, i32
  }
  func.func @transform_6(%arg0: i32) -> (i32, i32) {
    %c1_i32 = arith.constant 1 : i32
    %0 = arith.addi %arg0, %c1_i32 : i32
    %c0_i32 = arith.constant 0 : i32
    %c0_i32_0 = arith.constant 0 : i32
    return %c0_i32, %0 : i32, i32
  }
  func.func @transform_7(%arg0: i32) -> (i32, i32) {
    %c1_i32 = arith.constant 1 : i32
    %0 = arith.addi %arg0, %c1_i32 : i32
    %c0_i32 = arith.constant 0 : i32
    %c0_i32_0 = arith.constant 0 : i32
    return %c0_i32, %0 : i32, i32
  }
}

module attributes {stable_mosaic.version = 11 : i64} {
  func.func @_spc_fused_kernel(%arg0: i32, %arg1: memref<32x128xbf16, #tpu.memory_space<vmem>>, %arg2: memref<1x128xf32, #tpu.memory_space<vmem>>, %arg3: memref<128x2xf32, #tpu.memory_space<vmem>>, %arg4: memref<32x32xbf16, #tpu.memory_space<vmem>>, %arg5: memref<32x1xf32, #tpu.memory_space<vmem>>, %arg6: memref<32x32xbf16, #tpu.memory_space<vmem>>, %arg7: memref<32x1xf32, #tpu.memory_space<vmem>>, %arg8: memref<32x128xbf16, #tpu.memory_space<vmem>>, %arg9: memref<1x32x2xf32, #tpu.memory_space<vmem>>) attributes {dimension_semantics = [#tpu.dimension_semantics<parallel>], iteration_bounds = array<i64: 6>, scalar_prefetch = 0 : i64, scratch_operands = 0 : i64, tpu.core_type = #tpu.core_type<tc>, window_params = [{transform_indices = @transform_0, window_bounds = array<i64: 32, 128>}, {transform_indices = @transform_1, window_bounds = array<i64: 1, 128>}, {transform_indices = @transform_2, window_bounds = array<i64: 128, 2>}, {pipeline_mode = #tpu.pipeline_mode<synchronous>, transform_indices = @transform_3, window_bounds = array<i64: 32, 32>}, {pipeline_mode = #tpu.pipeline_mode<synchronous>, transform_indices = @transform_4, window_bounds = array<i64: 32, 1>}, {pipeline_mode = #tpu.pipeline_mode<synchronous>, transform_indices = @transform_5, window_bounds = array<i64: 32, 32>}, {pipeline_mode = #tpu.pipeline_mode<synchronous>, transform_indices = @transform_6, window_bounds = array<i64: 32, 1>}, {transform_indices = @transform_7, window_bounds = array<i64: 32, 128>}, {transform_indices = @transform_8, window_bounds = array<i64: 1, 32, 2>}]} {
    %c0 = arith.constant 0 : index
    %c0_0 = arith.constant 0 : index
    %0 = vector.load %arg1[%c0, %c0_0] : memref<32x128xbf16, #tpu.memory_space<vmem>>, vector<32x128xbf16>
    %c0_1 = arith.constant 0 : index
    %c0_2 = arith.constant 0 : index
    %1 = vector.load %arg4[%c0_1, %c0_2] : memref<32x32xbf16, #tpu.memory_space<vmem>>, vector<32x32xbf16>
    %cst = arith.constant dense<0.000000e+00> : vector<32x128xf32>
    %2 = tpu.matmul %1, %0, %cst {dimension_numbers = #tpu.dot_dimension_numbers<[1], [0], [0], [1], [0, 0, 1, 1], [], []>} : vector<32x32xbf16>, vector<32x128xbf16>, vector<32x128xf32> -> vector<32x128xf32>
    %c0_3 = arith.constant 0 : index
    %c0_4 = arith.constant 0 : index
    %3 = vector.load %arg5[%c0_3, %c0_4] : memref<32x1xf32, #tpu.memory_space<vmem>>, vector<32x1xf32>
    %4 = vector.broadcast %3 : vector<32x1xf32> to vector<32x128xf32>
    %5 = arith.addf %2, %4 : vector<32x128xf32>
    %cst_5 = arith.constant 0.000000e+00 : f32
    %6 = vector.broadcast %cst_5 : f32 to vector<32x128xf32>
    %7 = arith.maximumf %5, %6 : vector<32x128xf32>
    %c0_6 = arith.constant 0 : index
    %c0_7 = arith.constant 0 : index
    %8 = vector.load %arg6[%c0_6, %c0_7] : memref<32x32xbf16, #tpu.memory_space<vmem>>, vector<32x32xbf16>
    %9 = arith.truncf %7 : vector<32x128xf32> to vector<32x128xbf16>
    %cst_8 = arith.constant dense<0.000000e+00> : vector<32x128xf32>
    %10 = tpu.matmul %8, %9, %cst_8 {dimension_numbers = #tpu.dot_dimension_numbers<[1], [0], [0], [1], [0, 0, 1, 1], [], []>} : vector<32x32xbf16>, vector<32x128xbf16>, vector<32x128xf32> -> vector<32x128xf32>
    %c0_9 = arith.constant 0 : index
    %c0_10 = arith.constant 0 : index
    %11 = vector.load %arg7[%c0_9, %c0_10] : memref<32x1xf32, #tpu.memory_space<vmem>>, vector<32x1xf32>
    %12 = vector.broadcast %11 : vector<32x1xf32> to vector<32x128xf32>
    %13 = arith.addf %10, %12 : vector<32x128xf32>
    %c0_11 = arith.constant 0 : index
    %c0_12 = arith.constant 0 : index
    %14 = vector.load %arg2[%c0_11, %c0_12] : memref<1x128xf32, #tpu.memory_space<vmem>>, vector<1x128xf32>
    %cst_13 = arith.constant 0.000000e+00 : f32
    %15 = vector.broadcast %cst_13 : f32 to vector<1x128xf32>
    %16 = arith.cmpf ogt, %14, %15 : vector<1x128xf32>
    %cst_14 = arith.constant 0.000000e+00 : f32
    %17 = vector.shape_cast %16 : vector<1x128xi1> to vector<1x128xi1>
    %18 = vector.broadcast %17 : vector<1x128xi1> to vector<32x128xi1>
    %19 = vector.broadcast %cst_14 : f32 to vector<32x128xf32>
    %20 = arith.select %18, %13, %19 : vector<32x128xi1>, vector<32x128xf32>
    %21 = arith.truncf %20 : vector<32x128xf32> to vector<32x128xbf16>
    %c0_15 = arith.constant 0 : index
    %c0_16 = arith.constant 0 : index
    %22 = vector.load %arg8[%c0_15, %c0_16] : memref<32x128xbf16, #tpu.memory_space<vmem>>, vector<32x128xbf16>
    tpu.vector_store %arg8[%c0_15, %c0_16], %21 {strides = array<i32>} : memref<32x128xbf16, #tpu.memory_space<vmem>>, vector<32x128xbf16>,
    %c0_17 = arith.constant 0 : index
    %c0_18 = arith.constant 0 : index
    %23 = vector.load %arg3[%c0_17, %c0_18] : memref<128x2xf32, #tpu.memory_space<vmem>>, vector<128x2xf32>
    %cst_19 = arith.constant dense<0.000000e+00> : vector<32x2xf32>
    %24 = tpu.matmul %20, %23, %cst_19 {dimension_numbers = #tpu.dot_dimension_numbers<[1], [0], [0], [1], [0, 0, 1, 1], [], []>} : vector<32x128xf32>, vector<128x2xf32>, vector<32x2xf32> -> vector<32x2xf32>
    %c0_20 = arith.constant 0 : index
    %c0_21 = arith.constant 0 : index
    %c0_22 = arith.constant 0 : index
    %25 = vector.load %arg9[%c0_20, %c0_21, %c0_22] : memref<1x32x2xf32, #tpu.memory_space<vmem>>, vector<1x32x2xf32>
    %26 = vector.shape_cast %25 : vector<1x32x2xf32> to vector<32x2xf32>
    %27 = vector.shape_cast %24 : vector<32x2xf32> to vector<1x32x2xf32>
    tpu.vector_store %arg9[%c0_20, %c0_21, %c0_22], %27 {strides = array<i32>} : memref<1x32x2xf32, #tpu.memory_space<vmem>>, vector<1x32x2xf32>,
    return
  }
  func.func @transform_0(%arg0: i32) -> (i32, i32) {
    %c1_i32 = arith.constant 1 : i32
    %0 = arith.addi %arg0, %c1_i32 : i32
    %c0_i32 = arith.constant 0 : i32
    %c0_i32_0 = arith.constant 0 : i32
    return %c0_i32, %0 : i32, i32
  }
  func.func @transform_1(%arg0: i32) -> (i32, i32) {
    %c1_i32 = arith.constant 1 : i32
    %0 = arith.addi %arg0, %c1_i32 : i32
    %c0_i32 = arith.constant 0 : i32
    %c0_i32_0 = arith.constant 0 : i32
    return %c0_i32, %0 : i32, i32
  }
  func.func @transform_2(%arg0: i32) -> (i32, i32) {
    %c1_i32 = arith.constant 1 : i32
    %0 = arith.addi %arg0, %c1_i32 : i32
    %c0_i32 = arith.constant 0 : i32
    %c0_i32_0 = arith.constant 0 : i32
    return %0, %c0_i32 : i32, i32
  }
  func.func @transform_3(%arg0: i32) -> (i32, i32) {
    %c0_i32 = arith.constant 0 : i32
    %c0_i32_0 = arith.constant 0 : i32
    %c0_i32_1 = arith.constant 0 : i32
    return %c0_i32, %c0_i32_0 : i32, i32
  }
  func.func @transform_4(%arg0: i32) -> (i32, i32) {
    %c0_i32 = arith.constant 0 : i32
    %c0_i32_0 = arith.constant 0 : i32
    %c0_i32_1 = arith.constant 0 : i32
    return %c0_i32, %c0_i32_0 : i32, i32
  }
  func.func @transform_5(%arg0: i32) -> (i32, i32) {
    %c0_i32 = arith.constant 0 : i32
    %c0_i32_0 = arith.constant 0 : i32
    %c0_i32_1 = arith.constant 0 : i32
    return %c0_i32, %c0_i32_0 : i32, i32
  }
  func.func @transform_6(%arg0: i32) -> (i32, i32) {
    %c0_i32 = arith.constant 0 : i32
    %c0_i32_0 = arith.constant 0 : i32
    %c0_i32_1 = arith.constant 0 : i32
    return %c0_i32, %c0_i32_0 : i32, i32
  }
  func.func @transform_7(%arg0: i32) -> (i32, i32) {
    %c1_i32 = arith.constant 1 : i32
    %0 = arith.addi %arg0, %c1_i32 : i32
    %c0_i32 = arith.constant 0 : i32
    %c0_i32_0 = arith.constant 0 : i32
    return %c0_i32, %0 : i32, i32
  }
  func.func @transform_8(%arg0: i32) -> (i32, i32, i32) {
    %c0_i32 = arith.constant 0 : i32
    %c0_i32_0 = arith.constant 0 : i32
    %c0_i32_1 = arith.constant 0 : i32
    return %arg0, %c0_i32, %c0_i32_0 : i32, i32, i32
  }
}

module attributes {stable_mosaic.version = 11 : i64} {
  func.func @_conv3x3_kernel(%arg0: i32, %arg1: memref<32x128xbf16, #tpu.memory_space<vmem>>, %arg2: memref<32x128xbf16, #tpu.memory_space<vmem>>, %arg3: memref<32x128xbf16, #tpu.memory_space<vmem>>, %arg4: memref<32x128xbf16, #tpu.memory_space<vmem>>, %arg5: memref<32x128xbf16, #tpu.memory_space<vmem>>, %arg6: memref<32x128xbf16, #tpu.memory_space<vmem>>, %arg7: memref<1x128xf32, #tpu.memory_space<vmem>>, %arg8: memref<9x8x32xbf16, #tpu.memory_space<vmem>>, %arg9: memref<8x1xf32, #tpu.memory_space<vmem>>, %arg10: memref<8x128xbf16, #tpu.memory_space<vmem>>) attributes {dimension_semantics = [#tpu.dimension_semantics<parallel>], iteration_bounds = array<i64: 6>, scalar_prefetch = 0 : i64, scratch_operands = 0 : i64, tpu.core_type = #tpu.core_type<tc>, window_params = [{transform_indices = @transform_0, window_bounds = array<i64: 32, 128>}, {transform_indices = @transform_1, window_bounds = array<i64: 32, 128>}, {transform_indices = @transform_2, window_bounds = array<i64: 32, 128>}, {transform_indices = @transform_3, window_bounds = array<i64: 32, 128>}, {transform_indices = @transform_4, window_bounds = array<i64: 32, 128>}, {transform_indices = @transform_5, window_bounds = array<i64: 32, 128>}, {transform_indices = @transform_6, window_bounds = array<i64: 1, 128>}, {pipeline_mode = #tpu.pipeline_mode<synchronous>, transform_indices = @transform_7, window_bounds = array<i64: 9, 8, 32>}, {pipeline_mode = #tpu.pipeline_mode<synchronous>, transform_indices = @transform_8, window_bounds = array<i64: 8, 1>}, {transform_indices = @transform_9, window_bounds = array<i64: 8, 128>}]} {
    %c0 = arith.constant 0 : index
    %c0_0 = arith.constant 0 : index
    %0 = vector.load %arg1[%c0, %c0_0] : memref<32x128xbf16, #tpu.memory_space<vmem>>, vector<32x128xbf16>
    %c0_1 = arith.constant 0 : index
    %c0_2 = arith.constant 0 : index
    %1 = vector.load %arg2[%c0_1, %c0_2] : memref<32x128xbf16, #tpu.memory_space<vmem>>, vector<32x128xbf16>
    %c0_3 = arith.constant 0 : index
    %c0_4 = arith.constant 0 : index
    %2 = vector.load %arg3[%c0_3, %c0_4] : memref<32x128xbf16, #tpu.memory_space<vmem>>, vector<32x128xbf16>
    %3 = tpu.concatenate %0, %1, %2 in 1 : vector<32x128xbf16>, vector<32x128xbf16>, vector<32x128xbf16> -> vector<32x384xbf16>
    %c0_5 = arith.constant 0 : index
    %c0_6 = arith.constant 0 : index
    %4 = vector.load %arg4[%c0_5, %c0_6] : memref<32x128xbf16, #tpu.memory_space<vmem>>, vector<32x128xbf16>
    %c0_7 = arith.constant 0 : index
    %c0_8 = arith.constant 0 : index
    %5 = vector.load %arg5[%c0_7, %c0_8] : memref<32x128xbf16, #tpu.memory_space<vmem>>, vector<32x128xbf16>
    %c0_9 = arith.constant 0 : index
    %c0_10 = arith.constant 0 : index
    %6 = vector.load %arg6[%c0_9, %c0_10] : memref<32x128xbf16, #tpu.memory_space<vmem>>, vector<32x128xbf16>
    %7 = tpu.concatenate %4, %5, %6 in 1 : vector<32x128xbf16>, vector<32x128xbf16>, vector<32x128xbf16> -> vector<32x384xbf16>
    %8 = arith.addf %3, %7 : vector<32x384xbf16>
    %c0_11 = arith.constant 0 : index
    %c0_12 = arith.constant 0 : index
    %c0_13 = arith.constant 0 : index
    %9 = vector.load %arg8[%c0_11, %c0_12, %c0_13] : memref<9x8x32xbf16, #tpu.memory_space<vmem>>, vector<1x8x32xbf16>
    %10 = vector.shape_cast %9 : vector<1x8x32xbf16> to vector<8x32xbf16>
    %11 = vector.extract_strided_slice %8 {offsets = [0, 109], sizes = [32, 128], strides = [1, 1]} : vector<32x384xbf16> to vector<32x128xbf16>
    %cst = arith.constant dense<0.000000e+00> : vector<8x128xf32>
    %12 = tpu.matmul %10, %11, %cst {dimension_numbers = #tpu.dot_dimension_numbers<[1], [0], [0], [1], [0, 0, 1, 1], [], []>} : vector<8x32xbf16>, vector<32x128xbf16>, vector<8x128xf32> -> vector<8x128xf32>
    %c1 = arith.constant 1 : index
    %c0_14 = arith.constant 0 : index
    %c0_15 = arith.constant 0 : index
    %13 = vector.load %arg8[%c1, %c0_14, %c0_15] : memref<9x8x32xbf16, #tpu.memory_space<vmem>>, vector<1x8x32xbf16>
    %14 = vector.shape_cast %13 : vector<1x8x32xbf16> to vector<8x32xbf16>
    %15 = vector.extract_strided_slice %8 {offsets = [0, 110], sizes = [32, 128], strides = [1, 1]} : vector<32x384xbf16> to vector<32x128xbf16>
    %cst_16 = arith.constant dense<0.000000e+00> : vector<8x128xf32>
    %16 = tpu.matmul %14, %15, %cst_16 {dimension_numbers = #tpu.dot_dimension_numbers<[1], [0], [0], [1], [0, 0, 1, 1], [], []>} : vector<8x32xbf16>, vector<32x128xbf16>, vector<8x128xf32> -> vector<8x128xf32>
    %17 = arith.addf %12, %16 : vector<8x128xf32>
    %c2 = arith.constant 2 : index
    %c0_17 = arith.constant 0 : index
    %c0_18 = arith.constant 0 : index
    %18 = vector.load %arg8[%c2, %c0_17, %c0_18] : memref<9x8x32xbf16, #tpu.memory_space<vmem>>, vector<1x8x32xbf16>
    %19 = vector.shape_cast %18 : vector<1x8x32xbf16> to vector<8x32xbf16>
    %20 = vector.extract_strided_slice %8 {offsets = [0, 111], sizes = [32, 128], strides = [1, 1]} : vector<32x384xbf16> to vector<32x128xbf16>
    %cst_19 = arith.constant dense<0.000000e+00> : vector<8x128xf32>
    %21 = tpu.matmul %19, %20, %cst_19 {dimension_numbers = #tpu.dot_dimension_numbers<[1], [0], [0], [1], [0, 0, 1, 1], [], []>} : vector<8x32xbf16>, vector<32x128xbf16>, vector<8x128xf32> -> vector<8x128xf32>
    %22 = arith.addf %17, %21 : vector<8x128xf32>
    %c3 = arith.constant 3 : index
    %c0_20 = arith.constant 0 : index
    %c0_21 = arith.constant 0 : index
    %23 = vector.load %arg8[%c3, %c0_20, %c0_21] : memref<9x8x32xbf16, #tpu.memory_space<vmem>>, vector<1x8x32xbf16>
    %24 = vector.shape_cast %23 : vector<1x8x32xbf16> to vector<8x32xbf16>
    %25 = vector.extract_strided_slice %8 {offsets = [0, 127], sizes = [32, 128], strides = [1, 1]} : vector<32x384xbf16> to vector<32x128xbf16>
    %cst_22 = arith.constant dense<0.000000e+00> : vector<8x128xf32>
    %26 = tpu.matmul %24, %25, %cst_22 {dimension_numbers = #tpu.dot_dimension_numbers<[1], [0], [0], [1], [0, 0, 1, 1], [], []>} : vector<8x32xbf16>, vector<32x128xbf16>, vector<8x128xf32> -> vector<8x128xf32>
    %27 = arith.addf %22, %26 : vector<8x128xf32>
    %c4 = arith.constant 4 : index
    %c0_23 = arith.constant 0 : index
    %c0_24 = arith.constant 0 : index
    %28 = vector.load %arg8[%c4, %c0_23, %c0_24] : memref<9x8x32xbf16, #tpu.memory_space<vmem>>, vector<1x8x32xbf16>
    %29 = vector.shape_cast %28 : vector<1x8x32xbf16> to vector<8x32xbf16>
    %30 = vector.extract_strided_slice %8 {offsets = [0, 128], sizes = [32, 128], strides = [1, 1]} : vector<32x384xbf16> to vector<32x128xbf16>
    %cst_25 = arith.constant dense<0.000000e+00> : vector<8x128xf32>
    %31 = tpu.matmul %29, %30, %cst_25 {dimension_numbers = #tpu.dot_dimension_numbers<[1], [0], [0], [1], [0, 0, 1, 1], [], []>} : vector<8x32xbf16>, vector<32x128xbf16>, vector<8x128xf32> -> vector<8x128xf32>
    %32 = arith.addf %27, %31 : vector<8x128xf32>
    %c5 = arith.constant 5 : index
    %c0_26 = arith.constant 0 : index
    %c0_27 = arith.constant 0 : index
    %33 = vector.load %arg8[%c5, %c0_26, %c0_27] : memref<9x8x32xbf16, #tpu.memory_space<vmem>>, vector<1x8x32xbf16>
    %34 = vector.shape_cast %33 : vector<1x8x32xbf16> to vector<8x32xbf16>
    %35 = vector.extract_strided_slice %8 {offsets = [0, 129], sizes = [32, 128], strides = [1, 1]} : vector<32x384xbf16> to vector<32x128xbf16>
    %cst_28 = arith.constant dense<0.000000e+00> : vector<8x128xf32>
    %36 = tpu.matmul %34, %35, %cst_28 {dimension_numbers = #tpu.dot_dimension_numbers<[1], [0], [0], [1], [0, 0, 1, 1], [], []>} : vector<8x32xbf16>, vector<32x128xbf16>, vector<8x128xf32> -> vector<8x128xf32>
    %37 = arith.addf %32, %36 : vector<8x128xf32>
    %c6 = arith.constant 6 : index
    %c0_29 = arith.constant 0 : index
    %c0_30 = arith.constant 0 : index
    %38 = vector.load %arg8[%c6, %c0_29, %c0_30] : memref<9x8x32xbf16, #tpu.memory_space<vmem>>, vector<1x8x32xbf16>
    %39 = vector.shape_cast %38 : vector<1x8x32xbf16> to vector<8x32xbf16>
    %40 = vector.extract_strided_slice %8 {offsets = [0, 145], sizes = [32, 128], strides = [1, 1]} : vector<32x384xbf16> to vector<32x128xbf16>
    %cst_31 = arith.constant dense<0.000000e+00> : vector<8x128xf32>
    %41 = tpu.matmul %39, %40, %cst_31 {dimension_numbers = #tpu.dot_dimension_numbers<[1], [0], [0], [1], [0, 0, 1, 1], [], []>} : vector<8x32xbf16>, vector<32x128xbf16>, vector<8x128xf32> -> vector<8x128xf32>
    %42 = arith.addf %37, %41 : vector<8x128xf32>
    %c7 = arith.constant 7 : index
    %c0_32 = arith.constant 0 : index
    %c0_33 = arith.constant 0 : index
    %43 = vector.load %arg8[%c7, %c0_32, %c0_33] : memref<9x8x32xbf16, #tpu.memory_space<vmem>>, vector<1x8x32xbf16>
    %44 = vector.shape_cast %43 : vector<1x8x32xbf16> to vector<8x32xbf16>
    %45 = vector.extract_strided_slice %8 {offsets = [0, 146], sizes = [32, 128], strides = [1, 1]} : vector<32x384xbf16> to vector<32x128xbf16>
    %cst_34 = arith.constant dense<0.000000e+00> : vector<8x128xf32>
    %46 = tpu.matmul %44, %45, %cst_34 {dimension_numbers = #tpu.dot_dimension_numbers<[1], [0], [0], [1], [0, 0, 1, 1], [], []>} : vector<8x32xbf16>, vector<32x128xbf16>, vector<8x128xf32> -> vector<8x128xf32>
    %47 = arith.addf %42, %46 : vector<8x128xf32>
    %c8 = arith.constant 8 : index
    %c0_35 = arith.constant 0 : index
    %c0_36 = arith.constant 0 : index
    %48 = vector.load %arg8[%c8, %c0_35, %c0_36] : memref<9x8x32xbf16, #tpu.memory_space<vmem>>, vector<1x8x32xbf16>
    %49 = vector.shape_cast %48 : vector<1x8x32xbf16> to vector<8x32xbf16>
    %50 = vector.extract_strided_slice %8 {offsets = [0, 147], sizes = [32, 128], strides = [1, 1]} : vector<32x384xbf16> to vector<32x128xbf16>
    %cst_37 = arith.constant dense<0.000000e+00> : vector<8x128xf32>
    %51 = tpu.matmul %49, %50, %cst_37 {dimension_numbers = #tpu.dot_dimension_numbers<[1], [0], [0], [1], [0, 0, 1, 1], [], []>} : vector<8x32xbf16>, vector<32x128xbf16>, vector<8x128xf32> -> vector<8x128xf32>
    %52 = arith.addf %47, %51 : vector<8x128xf32>
    %c0_38 = arith.constant 0 : index
    %c0_39 = arith.constant 0 : index
    %53 = vector.load %arg9[%c0_38, %c0_39] : memref<8x1xf32, #tpu.memory_space<vmem>>, vector<8x1xf32>
    %54 = vector.broadcast %53 : vector<8x1xf32> to vector<8x128xf32>
    %55 = arith.addf %52, %54 : vector<8x128xf32>
    %c0_40 = arith.constant 0 : index
    %c0_41 = arith.constant 0 : index
    %56 = vector.load %arg7[%c0_40, %c0_41] : memref<1x128xf32, #tpu.memory_space<vmem>>, vector<1x128xf32>
    %cst_42 = arith.constant 0.000000e+00 : f32
    %57 = vector.broadcast %cst_42 : f32 to vector<1x128xf32>
    %58 = arith.cmpf ogt, %56, %57 : vector<1x128xf32>
    %cst_43 = arith.constant 0.000000e+00 : f32
    %59 = vector.shape_cast %58 : vector<1x128xi1> to vector<1x128xi1>
    %60 = vector.broadcast %59 : vector<1x128xi1> to vector<8x128xi1>
    %61 = vector.broadcast %cst_43 : f32 to vector<8x128xf32>
    %62 = arith.select %60, %55, %61 : vector<8x128xi1>, vector<8x128xf32>
    %63 = arith.truncf %62 : vector<8x128xf32> to vector<8x128xbf16>
    %c0_44 = arith.constant 0 : index
    %c0_45 = arith.constant 0 : index
    %64 = vector.load %arg10[%c0_44, %c0_45] : memref<8x128xbf16, #tpu.memory_space<vmem>>, vector<8x128xbf16>
    tpu.vector_store %arg10[%c0_44, %c0_45], %63 {strides = array<i32>} : memref<8x128xbf16, #tpu.memory_space<vmem>>, vector<8x128xbf16>,
    return
  }
  func.func @transform_0(%arg0: i32) -> (i32, i32) {
    %c1_i32 = arith.constant 1 : i32
    %0 = arith.addi %arg0, %c1_i32 : i32
    %c1_i32_0 = arith.constant 1 : i32
    %1 = arith.muli %0, %c1_i32_0 : i32
    %c1_i32_1 = arith.constant 1 : i32
    %2 = arith.subi %1, %c1_i32_1 : i32
    %c0_i32 = arith.constant 0 : i32
    %c0_i32_2 = arith.constant 0 : i32
    return %c0_i32, %2 : i32, i32
  }
  func.func @transform_1(%arg0: i32) -> (i32, i32) {
    %c1_i32 = arith.constant 1 : i32
    %0 = arith.addi %arg0, %c1_i32 : i32
    %c0_i32 = arith.constant 0 : i32
    %c0_i32_0 = arith.constant 0 : i32
    return %c0_i32, %0 : i32, i32
  }
  func.func @transform_2(%arg0: i32) -> (i32, i32) {
    %c2_i32 = arith.constant 2 : i32
    %0 = arith.addi %arg0, %c2_i32 : i32
    %c1_i32 = arith.constant 1 : i32
    %1 = arith.muli %0, %c1_i32 : i32
    %c6_i32 = arith.constant 6 : i32
    %2 = arith.minsi %1, %c6_i32 : i32
    %c0_i32 = arith.constant 0 : i32
    %c0_i32_0 = arith.constant 0 : i32
    return %c0_i32, %2 : i32, i32
  }
  func.func @transform_3(%arg0: i32) -> (i32, i32) {
    %c1_i32 = arith.constant 1 : i32
    %0 = arith.addi %arg0, %c1_i32 : i32
    %c1_i32_0 = arith.constant 1 : i32
    %1 = arith.muli %0, %c1_i32_0 : i32
    %c1_i32_1 = arith.constant 1 : i32
    %2 = arith.subi %1, %c1_i32_1 : i32
    %c0_i32 = arith.constant 0 : i32
    %c0_i32_2 = arith.constant 0 : i32
    return %c0_i32, %2 : i32, i32
  }
  func.func @transform_4(%arg0: i32) -> (i32, i32) {
    %c1_i32 = arith.constant 1 : i32
    %0 = arith.addi %arg0, %c1_i32 : i32
    %c0_i32 = arith.constant 0 : i32
    %c0_i32_0 = arith.constant 0 : i32
    return %c0_i32, %0 : i32, i32
  }
  func.func @transform_5(%arg0: i32) -> (i32, i32) {
    %c2_i32 = arith.constant 2 : i32
    %0 = arith.addi %arg0, %c2_i32 : i32
    %c1_i32 = arith.constant 1 : i32
    %1 = arith.muli %0, %c1_i32 : i32
    %c6_i32 = arith.constant 6 : i32
    %2 = arith.minsi %1, %c6_i32 : i32
    %c0_i32 = arith.constant 0 : i32
    %c0_i32_0 = arith.constant 0 : i32
    return %c0_i32, %2 : i32, i32
  }
  func.func @transform_6(%arg0: i32) -> (i32, i32) {
    %c1_i32 = arith.constant 1 : i32
    %0 = arith.addi %arg0, %c1_i32 : i32
    %c0_i32 = arith.constant 0 : i32
    %c0_i32_0 = arith.constant 0 : i32
    return %c0_i32, %0 : i32, i32
  }
  func.func @transform_7(%arg0: i32) -> (i32, i32, i32) {
    %c0_i32 = arith.constant 0 : i32
    %c0_i32_0 = arith.constant 0 : i32
    %c0_i32_1 = arith.constant 0 : i32
    %c0_i32_2 = arith.constant 0 : i32
    return %c0_i32, %c0_i32_0, %c0_i32_1 : i32, i32, i32
  }
  func.func @transform_8(%arg0: i32) -> (i32, i32) {
    %c0_i32 = arith.constant 0 : i32
    %c0_i32_0 = arith.constant 0 : i32
    %c0_i32_1 = arith.constant 0 : i32
    return %c0_i32, %c0_i32_0 : i32, i32
  }
  func.func @transform_9(%arg0: i32) -> (i32, i32) {
    %c1_i32 = arith.constant 1 : i32
    %0 = arith.addi %arg0, %c1_i32 : i32
    %c0_i32 = arith.constant 0 : i32
    %c0_i32_0 = arith.constant 0 : i32
    return %c0_i32, %0 : i32, i32
  }
}

</mosaic_0001>

<bundles_post_ra>
// kernel: group_unit_pallas.8
= control target key start
LH: loop header
LB: loop body
LE: loop exit
PB: predicated region body
PF: predicated region fallthrough
CT: control target
= control target key end

     0   :  { %s1595_s21 = smov 0   ;;  %s1597_s22 = smov 0   ;;  %s1779_s0 = inlined_call_operand.vmem [shape: bf16[8,896], index: 0, kind: input, shape index: {}, may-alias: {0,1,2}]   ;;  %s1780_s1 = inlined_call_operand.vmem [shape: bf16[8,896], index: 1, kind: input, shape index: {}, may-alias: {0,1,2}]   ;;  %s1781_s2 = inlined_call_operand.vmem [shape: bf16[8,896], index: 2, kind: input, shape index: {}, may-alias: {0,1,2}]   ;;  %s1782_s3 = inlined_call_operand.vmem [shape: f32[1,896], index: 3, kind: input, shape index: {}]   ;;  %s1783_s4 = inlined_call_operand.vmem [shape: bf16[9,32,8], index: 4, kind: input, shape index: {}]   ;;  %s1784_s5 = inlined_call_operand.vmem [shape: f32[32,1], index: 5, kind: input, shape index: {}]   ;;  %s1785_s6 = inlined_call_operand.vmem [shape: bf16[32,896], index: 6, kind: output, shape index: {}]  }
   0x1   :  { %s1599_s23 = smov 0  }
   0x2 LB: > { %s1608_s24 = sadd.s32 4294967295, %s1549_s23   ;;  %s1610_s25 = sadd.s32 1, %s1549_s23   ;;  %s1549_s23 = sphi %s1599_s23, %s1789_s23   ;;  %s1545_s22 = sphi %s1597_s22, %s1788_s22   ;;  %s1541_s21 = sphi %s1595_s21, %s1787_s21  }
   0x3   : > { %s177_s26 = sadd.s32 1, %s1610_s25  ;;  %s181_s27 = sadd.s32 1, %s1545_s22 }
   0x4   : > { %s178_s28 = ssub.s32 %s1610_s25, %s177_s26  ;;  %p191_p0 = scmp.ne.s32.totalorder %s1545_s22, %s1541_s21 }
   0x5   : > { %p179_p1 = scmp.eq.s32.totalorder %s178_s28, 0  ;;  %p192_p2 = scmp.eq.s32.totalorder %s1608_s24, 5 }
   0x6   : > { %p1281_p3 = scmp.ge.s32.totalorder %s1549_s23, 1  ;;  %p259_p4 = scmp.lt.s32.totalorder %s1549_s23, 7 }
   0x7   : > { %s1619_s29 = scalar_select %p179_p1, %s1545_s22, %s181_s27  }
   0x8   : > { %p1621_p5 = por %p192_p2, %p191_p0  ;;  %p260_p6 = pnand %p1281_p3, %p259_p4 }
   0x9   : > { %p303_p7 = scmp.lt.s32.totalorder (!%p260_p6), %s1608_s24, 6  ;;  %s307_s9 = sadd.s32 (!%p260_p6), 1, %s1608_s24 }
   0xa   : > { %263 = sbr.rel (%p260_p6) target bundleno = 391 (0x187), region = 44  ;;  %p308_p8 = scmp.lt.s32.totalorder (!%p260_p6), %s307_s9, 6 }
   0xb   : > { %s313_s17 = sadd.s32 (!%p260_p6), 2, %s1608_s24  ;;  %s1551_s18 = smov (!%p260_p6), 19  }
   0xc   : > { %s1552_s19 = smov (!%p260_p6), 18   ;;  %p314_p9 = scmp.lt.s32.totalorder (!%p260_p6), %s313_s17, 6 }
   0xd   : > { %s1553_s7 = smov (!%p260_p6), 17   ;;  %s1554_s12 = smov (!%p260_p6), 1  }
   0xe   : > { %s1556_s14 = smov (!%p260_p6), 111   ;;  %s1557_s15 = smov (!%p260_p6), 110  }
   0xf   : > { %v1509_v0 = vld [vmem:[%s1783_s4 + $0x10] sm:$0xff]   ;;  %vm360_vm0 = vcmask 64512   ;;  %s304_s10 = scalar_select %p303_p7, %s1608_s24, 6  ;;  %v1510_v1 = vld [vmem:[%s1783_s4] sm:$0xff]   ;;  %v1559_v5 = vmov 0   ;;  %v1071_v7 = vld [vmem:[%s1784_s5 + $0x8] sm:$0xff] }
  0x10   : > { %1413 = vmatprep.mubr.msk.bf16.mxu0 %vm360_vm0, %v1509_v0  ;;  %1419 = vmatprep.mubr.msk.bf16.mxu1 %vm360_vm0, %v1510_v1  ;;  %s1791_s9 = smov (!%p308_p8, %s307_s9), 6  ;;  %s1793_s17 = smov (!%p314_p9, %s313_s17), 6  ;;  %v1070_v8 = vld [vmem:[%s1784_s5] sm:$0xff]  ;;  %v1072_v10 = vld [vmem:[%s1784_s5 + $0x10] sm:$0xff]  ;;  %v1073_v11 = vld [vmem:[%s1784_s5 + $0x18] sm:$0xff]  ;;  %vm358_vm2 = vcmask 146432  }
  0x11   : > { %s1283_s13 = sshll.u32 %s304_s10, 2  ;;  %s1284_s20 = sshll.u32 %s1791_s9, 2  ;;  %1508 = vset.pattern.permute.xlu1 %v1559_v5  ;;  %1507 = vset.pattern.permute.xlu0 %v1559_v5  ;;  %vm434_vm3 = vcmask 154624   ;;  %vm367_vm4 = vcmask 1043456   ;;  %vm513_vm5 = vcmask 138240   ;;  %v1511_v20 = vld [vmem:[%s1783_s4 + $0x18] sm:$0xff]  }
  0x12   : > { %s306_s16 = scalar_lea.vmem %s1779_s0, %s1283_s13  ;;  %s311_s27 = scalar_lea.vmem %s1780_s1, %s1284_s20  ;;  %v1512_v21 = vld [vmem:[%s1783_s4 + $0x8] sm:$0xff]   ;;  %v1513_v22 = vld [vmem:[%s1783_s4 + $0x20] sm:$0xff]   ;;  %v1515_v25 = vld [vmem:[%s1783_s4 + $0x30] sm:$0xff]   ;;  %vm596_vm6 = vcmask 7168   ;;  %vm757_vm7 = vcmask 1039360   ;;  %vm840_vm8 = vcmask 908288  }
  0x13   : > { %v330_v2 = vld [vmem:[%s306_s16] sm:$0xf]  ;;  %s1795_s17 = smov (!%p314_p9, %s1793_s17), 6  ;;  %s1555_s13 = smov 127   ;;  %v1514_v32 = vld [vmem:[%s1783_s4 + $0x28] sm:$0xff]   ;;  %v1516_v33 = vld [vmem:[%s1783_s4 + $0x38] sm:$0xff]  }
  0x14   : > { %430 = vrot.lane.b32.xlu1 %v330_v2, %s1551_s18  ;;  %354 = vrot.lane.b32.xlu0 %v330_v2, %s1552_s19  ;;  %v1646_v3 = vld [vmem:[%s311_s27] sm:$0xf]  ;;  %s1288_s28 = sshll.u32 %s1795_s17, 2  ;;  %s1558_s16 = smov 109   ;;  %v1519_v39 = vld [vmem:[%s1783_s4 + $0x50] sm:$0xff]   ;;  %vm923_vm9 = vcmask 900096  }
  0x15   : > { %s319_s11 = scalar_lea.vmem %s1781_s2, %s1288_s28  ;;  %v682_v34 = vsel %vm367_vm4, %v1646_v3, 0  ;;  %v1517_v37 = vld [vmem:[%s1783_s4 + $0x40] sm:$0xff]   ;;  %v1518_v44 = vld [vmem:[%s1783_s4 + $0x48] sm:$0xff]   ;;  %v1520_v45 = vld [vmem:[%s1783_s4 + $0x58] sm:$0xff]   ;;  %vm1006_vm10 = vcmask 891904   ;;  %s300_s28 = sand.u32 1, %s1541_s21  }
  0x16   : > { %v332_v4 = vld [vmem:[%s319_s11] sm:$0xf]  ;;  %v1523_v51 = vld [vmem:[%s1783_s4 + $0x70] sm:$0xff]   ;;  %v1522_v56 = vld [vmem:[%s1783_s4 + $0x68] sm:$0xff]   ;;  %s1362_s21 = sshll.u32 (%p1621_p5), %s1608_s24, 2 }
  0x17   : > { %v1521_v49 = vld [vmem:[%s1783_s4 + $0x60] sm:$0xff]   ;;  %v1524_v57 = vld [vmem:[%s1783_s4 + $0x78] sm:$0xff]   ;;  %v1526_v60 = vld [vmem:[%s1783_s4 + $0x88] sm:$0xff]   ;;  %s1231_s11 = scalar_lea.vmem (%p1621_p5), %s1785_s6, %s1362_s21 }
  0x18   : > { %432 = vrot.lane.b32.xlu1 %v1646_v3, %s1551_s18  ;;  %356 = vrot.lane.b32.xlu0 %v1646_v3, %s1552_s19  ;;  %s326_s19 = scalar_lea.vmem %s1782_s3, %s1791_s9  ;;  %v1525_v58 = vld [vmem:[%s1783_s4 + $0x80] sm:$0xff]  }
  0x19   : > { %v1098_v6 = vld [vmem:[%s326_s19] sm:$0x1] }
  0x1a   : > { %vm1099_vm1 = vcmp.gt.f32.partialorder %v1098_v6, 0.0 }
  0x1b   : > { %v1669_v9 = vsel %vm1099_vm1, 1, %v1559_v5 }
  0x1c   : > { %511 = vrot.lane.b32.xlu1 %v1646_v3, %s1553_s7  ;;  %509 = vrot.lane.b32.xlu0 %v330_v2, %s1553_s7  ;;  %s1282_s7 = sshll.u32 %s300_s28, 4 }
  0x1d   : > { %s302_s9 = scalar_lea.vmem [#allocation2], %s1282_s7 }
  0x20   : > { %594 = vrot.lane.b32.xlu1 %v1646_v3, %s1554_s12  ;;  %592 = vrot.lane.b32.xlu0 %v330_v2, %s1554_s12 }
  0x24   : > { %755 = vrot.lane.b32.xlu1 %v332_v4, %s1555_s13  ;;  %753 = vrot.lane.b32.xlu0 %v1646_v3, %s1555_s13 }
  0x28   : > { %838 = vrot.lane.b32.xlu1 %v332_v4, %s1556_s14  ;;  %836 = vrot.lane.b32.xlu0 %v1646_v3, %s1556_s14 }
  0x2c   : > { %921 = vrot.lane.b32.xlu1 %v332_v4, %s1557_s15  ;;  %919 = vrot.lane.b32.xlu0 %v1646_v3, %s1557_s15 }
  0x30   : > { %1004 = vrot.lane.b32.xlu1 %v332_v4, %s1558_s16  ;;  %1002 = vrot.lane.b32.xlu0 %v1646_v3, %s1558_s16 }
  0x34   : > { %1081 = vperm.xlu1 %1508, %v1071_v7   ;;  %1076 = vperm.xlu0 %1507, %v1070_v8  }
  0x38   : > { %1086 = vperm.xlu1 %1508, %v1072_v10   ;;  %1091 = vperm.xlu0 %1507, %v1073_v11  }
  0x86   : > { %v431_v12 = vpop.permute.xlu1 %430  ;;  %v355_v13 = vpop.permute.xlu0 %354 }
  0x8a   : > { %v433_v14 = vpop.permute.xlu1 %432  ;;  %v357_v15 = vpop.permute.xlu0 %356 }
  0x8b   : > { %v359_v16 = vsel %vm358_vm2, %v355_v13, %v357_v15  ;;  %v435_v17 = vsel %vm434_vm3, %v431_v12, %v433_v14 }
  0x8c   : > { %1465 = vmatprep.subr.msk.bf16.mxu0 %vm367_vm4, %v359_v16  ;;  %1466 = vmatprep.subr.msk.bf16.mxu1 %vm367_vm4, %v435_v17  ;;  %v369_v18 = vsel %vm367_vm4, %v359_v16, 0  ;;  %v443_v19 = vsel %vm367_vm4, %v435_v17, 0 }
  0x8d   : > { %1412 = vmatpush3.bf16.msra.mxu0 %v369_v18  ;;  %1418 = vmatpush3.bf16.msra.mxu1 %v443_v19 }
  0x8e   : > { %v512_v23 = vpop.permute.xlu1 %511  ;;  %v510_v24 = vpop.permute.xlu0 %509 }
  0x8f   : > { %v514_v26 = vsel %vm513_vm5, %v510_v24, %v512_v23 }
  0x90   : > { %v522_v27 = vsel %vm367_vm4, %v514_v26, 0  ;;  %1414 = vmatmul.mubr.msk.bf16.vlgmr.msra.gmra.mxu0 %vm360_vm0, %v1511_v20  ;;  %1420 = vmatmul.mubr.msk.bf16.vlgmr.msra.gmra.mxu1 %vm360_vm0, %v1512_v21 }
  0x91   : > { %1467 = vmatprep.subr.msk.bf16.mxu0 %vm367_vm4, %v514_v26  ;;  %1425 = vmatprep.mubr.msk.bf16.mxu0 %vm360_vm0, %v1513_v22 }
  0x92   : > { %1424 = vmatpush3.bf16.msra.mxu0 %v522_v27  ;;  %v595_v28 = vpop.permute.xlu1 %594  ;;  %v593_v29 = vpop.permute.xlu0 %592  ;;  %1431 = vmatprep.mubr.msk.bf16.mxu1 %vm360_vm0, %v1515_v25 }
  0x93   : > { %v597_v30 = vsel %vm596_vm6, %v593_v29, %v595_v28  ;;  %1469 = vmatprep.subr.msk.bf16.mxu0 %vm367_vm4, %v1646_v3 }
  0x94   : > { %v605_v31 = vsel %vm367_vm4, %v597_v30, 0  ;;  %1468 = vmatprep.subr.msk.bf16.mxu1 %vm367_vm4, %v597_v30 }
  0x95   : > { %1430 = vmatpush3.bf16.msra.mxu1 %v605_v31  ;;  %v1101_v31 = vlaneseq }
  0x96   : > { %v756_v35 = vpop.permute.xlu1 %755  ;;  %v754_v36 = vpop.permute.xlu0 %753 }
  0x97   : > { %v758_v38 = vsel %vm757_vm7, %v754_v36, %v756_v35 }
  0x98   : > { %1426 = vmatmul.mubr.msk.bf16.vlgmr.msra.gmra.mxu0 %vm360_vm0, %v1514_v32  ;;  %1432 = vmatmul.mubr.msk.bf16.vlgmr.msra.gmra.mxu1 %vm360_vm0, %v1516_v33  ;;  %v766_v40 = vsel %vm367_vm4, %v758_v38, 0 }
  0x99   : > { %1436 = vmatpush3.bf16.msra.mxu0 %v682_v34  ;;  %1470 = vmatprep.subr.msk.bf16.mxu1 %vm367_vm4, %v758_v38 }
  0x9a   : > { %1442 = vmatpush3.bf16.msra.mxu1 %v766_v40  ;;  %v839_v41 = vpop.permute.xlu1 %838  ;;  %v837_v42 = vpop.permute.xlu0 %836  ;;  %1437 = vmatprep.mubr.msk.bf16.mxu0 %vm360_vm0, %v1517_v37 }
  0x9b   : > { %v841_v43 = vsel %vm840_vm8, %v837_v42, %v839_v41  ;;  %1443 = vmatprep.mubr.msk.bf16.mxu1 %vm360_vm0, %v1519_v39  ;;  %v1102_v41 = vshrl.u32 %v1101_v31, 7 }
  0x9c   : > { %1471 = vmatprep.subr.msk.bf16.mxu0 %vm367_vm4, %v841_v43  ;;  %v849_v46 = vsel %vm367_vm4, %v841_v43, 0 }
  0x9e   : > { %v922_v47 = vpop.permute.xlu1 %921  ;;  %v920_v48 = vpop.permute.xlu0 %919 }
  0x9f   : > { %v924_v50 = vsel %vm923_vm9, %v920_v48, %v922_v47 }
  0xa0   : > { %1438 = vmatmul.mubr.msk.bf16.vlgmr.msra.gmra.mxu0 %vm360_vm0, %v1518_v44  ;;  %1444 = vmatmul.mubr.msk.bf16.vlgmr.msra.gmra.mxu1 %vm360_vm0, %v1520_v45  ;;  %v932_v52 = vsel %vm367_vm4, %v924_v50, 0 }
  0xa1   : > { %1448 = vmatpush3.bf16.msra.mxu0 %v849_v46  ;;  %1472 = vmatprep.subr.msk.bf16.mxu1 %vm367_vm4, %v924_v50 }
  0xa2   : > { %1454 = vmatpush3.bf16.msra.mxu1 %v932_v52  ;;  %v1005_v53 = vpop.permute.xlu1 %1004  ;;  %v1003_v54 = vpop.permute.xlu0 %1002  ;;  %1449 = vmatprep.mubr.msk.bf16.mxu0 %vm360_vm0, %v1521_v49 }
  0xa3   : > { %v1007_v55 = vsel %vm1006_vm10, %v1003_v54, %v1005_v53  ;;  %1455 = vmatprep.mubr.msk.bf16.mxu1 %vm360_vm0, %v1523_v51  ;;  %v1103_v51 = vsub.s32 0, %v1102_v41 }
  0xa4   : > { %1473 = vmatprep.subr.msk.bf16.mxu0 %vm367_vm4, %v1007_v55  ;;  %v1015_v59 = vsel %vm367_vm4, %v1007_v55, 0 }
  0xa8   : > { %1450 = vmatmul.mubr.msk.bf16.vlgmr.msra.gmra.mxu0 %vm360_vm0, %v1522_v56  ;;  %1456 = vmatmul.mubr.msk.bf16.vlgmr.msra.gmra.mxu1 %vm360_vm0, %v1524_v57 }
  0xa9   : > { %1460 = vmatpush3.bf16.msra.mxu0 %v1015_v59  ;;  %1461 = vmatprep.mubr.msk.bf16.mxu0 %vm360_vm0, %v1525_v58 }
  0xaf   : > { %v1082_v46 = vpop.permute.xlu1 %1081  ;;  %v1077_v56 = vpop.permute.xlu0 %1076 }
  0xb0   : > { %1462 = vmatmul.mubr.msk.bf16.vlgmr.msra.gmra.mxu0 %vm360_vm0, %v1526_v60 }
 0x150   : > { %v1415_v61 = vpop.f32.mrf.mxu0  ;;  %v1421_v62 = vpop.f32.mrf.mxu1 }
 0x151   : > { %v488_v12 = vadd.f32 %v1421_v62, %v1415_v61  ;;  %v1104_v62 = vrot.slane %v1669_v9, %v1103_v51 }
 0x152   : > { %v405_v63 = vpop.f32.mrf.mxu0  ;;  %v479_v0 = vpop.f32.mrf.mxu1 }
 0x153   : > { %v480_v15 = vadd.f32 %v479_v0, %v405_v63  ;;  %v1087_v63 = vpop.permute.xlu1 %1086  ;;  %vm1105_vm11 = vcmp.eq.s32.totalorder %v1104_v62, 1 }
 0x154   : > { %v1416_v1 = vpop.f32.mrf.mxu0  ;;  %v1422_v2 = vpop.f32.mrf.mxu1 }
 0x155   : > { %v491_v19 = vadd.f32 %v1422_v2, %v1416_v1 }
 0x156   : > { %v408_v3 = vpop.f32.mrf.mxu0  ;;  %v482_v4 = vpop.f32.mrf.mxu1 }
 0x157   : > { %v483_v23 = vadd.f32 %v482_v4, %v408_v3 }
 0x158   : > { %v1427_v5 = vpop.f32.mrf.mxu0  ;;  %v1433_v6 = vpop.f32.mrf.mxu1 }
 0x159   : > { %v575_v16 = vadd.f32 %v1427_v5, %v488_v12 }
 0x15a   : > { %v558_v7 = vpop.f32.mrf.mxu0  ;;  %v641_v8 = vpop.f32.mrf.mxu1 }
 0x15b   : > { %v573_v20 = vadd.f32 %v558_v7, %v480_v15  ;;  %v658_v24 = vadd.f32 %v1433_v6, %v575_v16 }
 0x15c   : > { %v1428_v10 = vpop.f32.mrf.mxu0  ;;  %v1434_v11 = vpop.f32.mrf.mxu1 }
 0x15d   : > { %v576_v25 = vadd.f32 %v1428_v10, %v491_v19  ;;  %v656_v28 = vadd.f32 %v641_v8, %v573_v20  ;;  %v1092_v8 = vpop.permute.xlu0 %1091 }
 0x15e   : > { %v561_v13 = vpop.f32.mrf.mxu0  ;;  %v644_v14 = vpop.f32.mrf.mxu1 }
 0x15f   : > { %v574_v29 = vadd.f32 %v561_v13, %v483_v23  ;;  %v659_v34 = vadd.f32 %v1434_v11, %v576_v25 }
 0x160   : > { %v1439_v17 = vpop.f32.mrf.mxu0  ;;  %v1445_v18 = vpop.f32.mrf.mxu1 }
 0x161   : > { %v735_v30 = vadd.f32 %v1439_v17, %v658_v24  ;;  %v657_v38 = vadd.f32 %v644_v14, %v574_v29 }
 0x162   : > { %v718_v21 = vpop.f32.mrf.mxu0  ;;  %v802_v22 = vpop.f32.mrf.mxu1 }
 0x163   : > { %v733_v35 = vadd.f32 %v718_v21, %v656_v28  ;;  %v819_v39 = vadd.f32 %v1445_v18, %v735_v30 }
 0x164   : > { %v1440_v26 = vpop.f32.mrf.mxu0  ;;  %v1446_v27 = vpop.f32.mrf.mxu1 }
 0x165   : > { %v736_v40 = vadd.f32 %v1440_v26, %v659_v34  ;;  %v817_v43 = vadd.f32 %v802_v22, %v733_v35 }
 0x166   : > { %v721_v32 = vpop.f32.mrf.mxu0  ;;  %v805_v33 = vpop.f32.mrf.mxu1 }
 0x167   : > { %v734_v44 = vadd.f32 %v721_v32, %v657_v38  ;;  %v820_v49 = vadd.f32 %v1446_v27, %v736_v40 }
 0x168   : > { %v1451_v36 = vpop.f32.mrf.mxu0  ;;  %v1457_v37 = vpop.f32.mrf.mxu1 }
 0x169   : > { %v902_v45 = vadd.f32 %v1451_v36, %v819_v39  ;;  %v818_v53 = vadd.f32 %v805_v33, %v734_v44 }
 0x16a   : > { %v885_v42 = vpop.f32.mrf.mxu0  ;;  %v968_v47 = vpop.f32.mrf.mxu1 }
 0x16b   : > { %v900_v50 = vadd.f32 %v885_v42, %v817_v43  ;;  %v985_v54 = vadd.f32 %v1457_v37, %v902_v45 }
 0x16c   : > { %v1452_v48 = vpop.f32.mrf.mxu0  ;;  %v1458_v57 = vpop.f32.mrf.mxu1 }
 0x16d   : > { %v903_v55 = vadd.f32 %v1452_v48, %v820_v49  ;;  %v983_v59 = vadd.f32 %v968_v47, %v900_v50 }
 0x16e   : > { %v888_v52 = vpop.f32.mrf.mxu0  ;;  %v971_v3 = vpop.f32.mrf.mxu1 }
 0x16f   : > { %v901_v60 = vadd.f32 %v888_v52, %v818_v53  ;;  %v986_v1 = vadd.f32 %v1458_v57, %v903_v55 }
 0x170   : > { %v1463_v58 = vpop.f32.mrf.mxu0 }
 0x171   : > { %v1068_v61 = vadd.f32 %v1463_v58, %v985_v54  ;;  %v984_v5 = vadd.f32 %v971_v3, %v901_v60 }
 0x172   : > { %v1051_v0 = vpop.f32.mrf.mxu0 }
 0x173   : > { %v1066_v2 = vadd.f32 %v1051_v0, %v983_v59  ;;  %v1096_v6 = vadd.f32 %v1087_v63, %v1068_v61 }
 0x174   : > { %v1464_v4 = vpop.f32.mrf.mxu0 }
 0x175   : > { %v1069_v7 = vadd.f32 %v1464_v4, %v986_v1  ;;  %v1094_v11 = vadd.f32 %v1077_v56, %v1066_v2  ;;  %v1108_v14 = vsel %vm1105_vm11, %v1096_v6, 0.0 }
 0x176   : > { %v1054_v10 = vpop.f32.mrf.mxu0 }
 0x177   : > { %v1097_v12 = vadd.f32 %v1092_v8, %v1069_v7  ;;  %v1067_v13 = vadd.f32 %v1054_v10, %v984_v5  ;;  %v1106_v17 = vsel %vm1105_vm11, %v1094_v11, 0.0 }
 0x179   : > { %v1109_v15 = vsel %vm1105_vm11, %v1097_v12, 0.0  ;;  %v1095_v9 = vadd.f32 %v1082_v46, %v1067_v13 }
 0x17a   : > { %v1381_v16 = vpack.c.bf16 %v1109_v15, %v1108_v14  ;;  %1136 = sbr.rel (!%p1621_p5) target bundleno = 391 (0x187), region = 48 }
 0x17b   : > { %v1107_v18 = vsel %vm1105_vm11, %v1095_v9, 0.0 }
 0x17c   : > { %1383 = vst [vmem:[%s302_s9 + $0x8] sm:$0xff] %v1381_v16   ;;  %v1376_v19 = vpack.c.bf16 %v1107_v18, %v1106_v17 }
 0x17e   : > { %1377 = vst [vmem:[%s302_s9] sm:$0xff] %v1376_v19  }
 0x183   : > { %v1160_v22 = vld [vmem:[%s302_s9 + $0x8] sm:$0xf]  ;;  %v1162_v23 = vld [vmem:[%s302_s9 + $0xc] sm:$0xf] }
 0x184   : > { %1365 = vst [vmem:[%s1231_s11 + $0x3c] sm:$0xf] %v1160_v22  ;;  %1366 = vst [vmem:[%s1231_s11 + $0x58] sm:$0xf] %v1162_v23 }
 0x185   : > { %v1156_v20 = vld [vmem:[%s302_s9] sm:$0xf]  ;;  %v1158_v21 = vld [vmem:[%s302_s9 + $0x4] sm:$0xf] }
 0x186   : > { %1363 = vst [vmem:[%s1231_s11 + $0x4] sm:$0xf] %v1156_v20  ;;  %1364 = vst [vmem:[%s1231_s11 + $0x20] sm:$0xf] %v1158_v21 }
 0x187 PF: > { %p13_p10 = scmp.ge.s32.totalorder %s1610_s25, 8   ;;  %s1787_s21 = smov %s1545_s22 }
 0x188   : > { %s1788_s22 = smov %s1619_s29  ;;  %s1789_s23 = smov %s1610_s25 }
 0x189   :  { %15 = sbr.rel (!%p13_p10) target bundleno = 2 (0x2), region = 132 }

// kernel: group_unit_pallas.9
= control target key start
LH: loop header
LB: loop body
LE: loop exit
PB: predicated region body
PF: predicated region fallthrough
CT: control target
= control target key end

     0   :  { %s1947_s21 = smov 0   ;;  %s1949_s22 = smov 0   ;;  %s2236_s0 = inlined_call_operand.vmem [shape: bf16[32,896], index: 0, kind: input, shape index: {}, may-alias: {0,1,2}]   ;;  %s2237_s1 = inlined_call_operand.vmem [shape: bf16[32,896], index: 1, kind: input, shape index: {}, may-alias: {0,1,2}]   ;;  %s2238_s2 = inlined_call_operand.vmem [shape: bf16[32,896], index: 2, kind: input, shape index: {}, may-alias: {0,1,2}]   ;;  %s2239_s3 = inlined_call_operand.vmem [shape: f32[1,896], index: 3, kind: input, shape index: {}]   ;;  %s2240_s4 = inlined_call_operand.vmem [shape: bf16[9,32,32], index: 4, kind: input, shape index: {}]   ;;  %s2241_s5 = inlined_call_operand.vmem [shape: f32[32,1], index: 5, kind: input, shape index: {}]   ;;  %s2242_s6 = inlined_call_operand.vmem [shape: bf16[32,896], index: 6, kind: output, shape index: {}]  }
   0x1   :  { %s1951_s23 = smov 0   ;;  %s1953_s24 = smov 0  }
   0x2   :  { %s1955_s25 = smov 0   ;;  %s1957_s26 = smov 0  }
   0x3   :  { %s1959_s27 = smov 0  }
   0x4 LB: > { %s1983_s28 = sadd.s32 1, %s1901_s27   ;;  %s23_s30 = sadd.s32 1, %s1897_s26  ;;  %s1901_s27 = sphi %s1959_s27, %s2257_s27   ;;  %s1897_s26 = sphi %s1957_s26, %s2256_s26   ;;  %s1893_s25 = sphi %s1955_s25, %s2255_s25   ;;  %s1889_s24 = sphi %s1953_s24, %s2254_s24   ;;  %s1885_s23 = sphi %s1951_s23, %s2253_s23   ;;  %s1881_s22 = sphi %s1949_s22, %s2252_s22   ;;  %s1877_s21 = sphi %s1947_s21, %s2251_s21  }
   0x5   : > { %s20_s29 = ssub.s32 %s1901_s27, %s1983_s28  ;;  %p30_p1 = scmp.ne.s32.totalorder %s1897_s26, %s1893_s25 }
   0x6   : > { %p21_p0 = scmp.eq.s32.totalorder %s20_s29, 0  ;;  %p31_p2 = scmp.eq.s32.totalorder %s1901_s27, 0 }
   0x7   : > { %s47_s7 = sadd.s32 1, %s1983_s28  ;;  %s51_s11 = sadd.s32 1, %s1889_s24 }
   0x8   : > { %s1993_s8 = scalar_select %p21_p0, %s1897_s26, %s23_s30  }
   0x9   : > { %p1997_p3 = por %p31_p2, %p30_p1  ;;  %s48_s10 = ssub.s32 %s1983_s28, %s47_s7 }
   0xa   : > { %2243 = sst [smem:[#allocation6_spill]] %s1993_s8  ;;  %p49_p4 = scmp.eq.s32.totalorder %s48_s10, 0 }
   0xb   : > { %p58_p5 = scmp.ne.s32.totalorder %s1889_s24, %s1885_s23  ;;  %s74_s12 = sadd.s32 2, %s1901_s27 }
   0xc   : > { %s2007_s13 = scalar_select %p49_p4, %s1889_s24, %s51_s11  }
   0xd   : > { %p2014_p6 = por %p58_p5, %p31_p2  ;;  %p75_p7 = scmp.lt.s32.totalorder %s74_s12, 6 }
   0xe   : > { %2245 = sst [smem:[#allocation7_spill]] %s2007_s13  ;;  %s2019_s15 = sadd.s32 4294967295, %s1901_s27  }
   0xf   : > { %s77_s16 = sadd.s32 2, %s1983_s28  ;;  %s2259_s12 = smov (!%p75_p7, %s74_s12), 6 }
  0x10   : > { %p78_p8 = scmp.lt.s32.totalorder %s77_s16, 6  ;;  %p90_p9 = scmp.ne.s32.totalorder %s1881_s22, %s1877_s21 }
  0x11   : > { %p192_p10 = scmp.eq.s32.totalorder %s2019_s15, 5  ;;  %s83_s20 = sadd.s32 1, %s1881_s22 }
  0x12   : > { %s2261_s16 = smov (!%p78_p8, %s77_s16), 6  ;;  %p2029_p11 = por %p90_p9, %p31_p2 }
  0x13   : > { %p2036_p12 = por %p192_p10, %p58_p5  ;;  %s80_s19 = ssub.s32 %s2259_s12, %s2261_s16 }
  0x14   : > { %p81_p13 = scmp.eq.s32.totalorder %s80_s19, 0  ;;  %p1531_p0 = scmp.ge.s32.totalorder %s1901_s27, 6 }
  0x16   : > { %s2043_s29 = scalar_select %p81_p13, %s1881_s22, %s83_s20  }
  0x17   : > { %220 = sbr.rel (%p1531_p0) target bundleno = 46 (0x2e), region = 24 }
  0x1c   : > { %223 = sbr.rel (!%p1997_p3) target bundleno = 34 (0x22), region = 28  ;;  %s225_s30 = sand.u32 (%p1997_p3), 1, %s1897_s26  }
  0x1d   : > { %s1533_s7 = sshll.u32 (%p1997_p3), %s1901_s27, 2  ;;  %s1532_s10 = sshll.u32 (%p1997_p3), %s225_s30, 4 }
  0x1e   : > { %s229_s13 = scalar_lea.vmem (%p1997_p3), %s2236_s0, %s1533_s7  ;;  %s227_s16 = scalar_lea.vmem (%p1997_p3), [#allocation2], %s1532_s10 }
  0x1f   : > { %v246_v0 = vld [vmem:[%s229_s13] sm:$0xf] (%p1997_p3)  ;;  %v248_v1 = vld [vmem:[%s229_s13 + $0x1c] sm:$0xf] (%p1997_p3)  ;;  %v250_v2 = vld [vmem:[%s229_s13 + $0x38] sm:$0xf] (%p1997_p3) }
  0x20   : > { %247 = vst [vmem:[%s227_s16] sm:$0xf] (%p1997_p3), %v246_v0  ;;  %249 = vst [vmem:[%s227_s16 + $0x4] sm:$0xf] (%p1997_p3), %v248_v1  ;;  %v252_v3 = vld [vmem:[%s229_s13 + $0x54] sm:$0xf] (%p1997_p3) }
  0x21   : > { %251 = vst [vmem:[%s227_s16 + $0x8] sm:$0xf] %v250_v2  ;;  %253 = vst [vmem:[%s227_s16 + $0xc] sm:$0xf] %v252_v3 }
  0x22 PF: > { %285 = sbr.rel (!%p2014_p6) target bundleno = 40 (0x28), region = 69  ;;  %s287_s9 = sand.u32 (%p2014_p6), 1, %s1889_s24  }
  0x23   : > { %s1535_s19 = sshll.u32 (%p2014_p6), %s1901_s27, 2  ;;  %s1534_s20 = sshll.u32 (%p2014_p6), %s287_s9, 4 }
  0x24   : > { %s1444_s7 = scalar_lea.vmem (%p2014_p6), %s2237_s1, %s1535_s19  ;;  %s289_s10 = scalar_lea.vmem (%p2014_p6), [#allocation3], %s1534_s20 }
  0x25   : > { %v1536_v4 = vld [vmem:[%s1444_s7 + $0x4] sm:$0xf] (%p2014_p6)  ;;  %v1537_v5 = vld [vmem:[%s1444_s7 + $0x20] sm:$0xf] (%p2014_p6)  ;;  %v1538_v6 = vld [vmem:[%s1444_s7 + $0x3c] sm:$0xf] (%p2014_p6) }
  0x26   : > { %310 = vst [vmem:[%s289_s10] sm:$0xf] (%p2014_p6), %v1536_v4  ;;  %312 = vst [vmem:[%s289_s10 + $0x4] sm:$0xf] (%p2014_p6), %v1537_v5  ;;  %v1539_v7 = vld [vmem:[%s1444_s7 + $0x58] sm:$0xf] (%p2014_p6) }
  0x27   : > { %314 = vst [vmem:[%s289_s10 + $0x8] sm:$0xf] %v1538_v6  ;;  %316 = vst [vmem:[%s289_s10 + $0xc] sm:$0xf] %v1539_v7 }
  0x28 PF: > { %348 = sbr.rel (!%p2029_p11) target bundleno = 46 (0x2e), region = 110  ;;  %s350_s13 = sand.u32 (%p2029_p11), 1, %s1881_s22  }
  0x29   : > { %s1541_s14 = sshll.u32 (%p2029_p11), %s2259_s12, 2  ;;  %s1540_s11 = sshll.u32 (%p2029_p11), %s350_s13, 4 }
  0x2a   : > { %s357_s19 = scalar_lea.vmem (%p2029_p11), %s2238_s2, %s1541_s14  ;;  %s352_s20 = scalar_lea.vmem (%p2029_p11), [#allocation4], %s1540_s11 }
  0x2b   : > { %v374_v8 = vld [vmem:[%s357_s19] sm:$0xf] (%p2029_p11)  ;;  %v376_v9 = vld [vmem:[%s357_s19 + $0x1c] sm:$0xf] (%p2029_p11)  ;;  %v378_v10 = vld [vmem:[%s357_s19 + $0x38] sm:$0xf] (%p2029_p11) }
  0x2c   : > { %375 = vst [vmem:[%s352_s20] sm:$0xf] (%p2029_p11), %v374_v8  ;;  %377 = vst [vmem:[%s352_s20 + $0x4] sm:$0xf] (%p2029_p11), %v376_v9  ;;  %v380_v11 = vld [vmem:[%s357_s19 + $0x54] sm:$0xf] (%p2029_p11) }
  0x2d   : > { %379 = vst [vmem:[%s352_s20 + $0x8] sm:$0xf] %v378_v10  ;;  %381 = vst [vmem:[%s352_s20 + $0xc] sm:$0xf] %v380_v11 }
  0x2e PF: > { %p1542_p1 = scmp.ge.s32.totalorder %s1901_s27, 1  ;;  %p420_p2 = scmp.lt.s32.totalorder %s1901_s27, 7 }
  0x30   : > { %p421_p3 = pnand %p1542_p1, %p420_p2 }
  0x31   : > { %s427_s12 = sand.u32 (!%p421_p3), 1, %s1893_s25   ;;  %s434_s8 = sand.u32 (!%p421_p3), 1, %s1885_s23  }
  0x32   : > { %424 = sbr.rel (%p421_p3) target bundleno = 453 (0x1c5), region = 155  ;;  %s1543_s17 = sshll.u32 (!%p421_p3), %s427_s12, 4 }
  0x33   : > { %s2071_s30 = sshll.u32 (!%p421_p3), %s434_s8, 4  ;;  %s429_s7 = scalar_lea.vmem (!%p421_p3), [#allocation2], %s1543_s17 }
  0x34   : > { %s1903_s10 = smov (!%p421_p3), 18   ;;  %s436_s13 = scalar_lea.vmem (!%p421_p3), [#allocation3], %s2071_s30 }
  0x35   : > { %s441_s27 = sand.u32 (!%p421_p3), 1, %s1877_s21   ;;  %s1904_s16 = smov (!%p421_p3), 19  }
  0x36   : > { %s2082_s23 = sshll.u32 (!%p421_p3), %s441_s27, 4  ;;  %s1905_s19 = smov (!%p421_p3), 17  }
  0x37   : > { %v1823_v12 = vld [vmem:[%s429_s7 + $0x8] sm:$0xff]   ;;  %v1824_v13 = vld [vmem:[%s429_s7] sm:$0xff]   ;;  %vm568_vm0 = vcmask 261120   ;;  %s443_s25 = scalar_lea.vmem [#allocation4], %s2082_s23  ;;  %s1906_s20 = smov 1   ;;  %v1911_v20 = vmov 0  }
  0x38   : > { %559 = vrot.lane.b32.xlu0 %v1823_v12, %s1903_s10  ;;  %v2074_v14 = vld [vmem:[%s436_s13 + $0x8] sm:$0xff]   ;;  %555 = vrot.lane.b32.xlu1 %v1824_v13, %s1903_s10  ;;  %v2076_v15 = vld [vmem:[%s436_s13] sm:$0xff]   ;;  %s1907_s12 = smov 127   ;;  %s1908_s17 = smov 111   ;;  %vm563_vm1 = vcmask 146432   ;;  %vm642_vm2 = vcmask 154624  }
  0x39   : > { %v1829_v16 = vld [vmem:[%s2240_s4 + $0x10] sm:$0xff]   ;;  %v1831_v17 = vld [vmem:[%s2240_s4] sm:$0xff]   ;;  %v1827_v18 = vld [vmem:[%s443_s25 + $0x8] sm:$0xff]   ;;  %s1909_s8 = smov 110   ;;  %s1910_s7 = smov 109   ;;  %1822 = vset.pattern.permute.xlu1 %v1911_v20  ;;  %1821 = vset.pattern.permute.xlu0 %v1911_v20  ;;  %vm725_vm3 = vcmask 138240  }
  0x3a   : > { %1688 = vmatprep.mubr.msk.bf16.mxu0 %vm568_vm0, %v1829_v16  ;;  %1696 = vmatprep.mubr.msk.bf16.mxu1 %vm568_vm0, %v1831_v17  ;;  %v1828_v19 = vld [vmem:[%s443_s25] sm:$0xff]   ;;  %v1299_v22 = vld [vmem:[%s2241_s5 + $0x8] sm:$0xff]  ;;  %v1301_v23 = vld [vmem:[%s2241_s5 + $0x18] sm:$0xff]  ;;  %vm812_vm4 = vcmask 7168   ;;  %vm973_vm5 = vcmask 1039360   ;;  %vm1060_vm6 = vcmask 908288  }
  0x3b   : > { %v1298_v21 = vld [vmem:[%s2241_s5] sm:$0xff]  ;;  %v1300_v24 = vld [vmem:[%s2241_s5 + $0x10] sm:$0xff]  ;;  %v1830_v34 = vld [vmem:[%s2240_s4 + $0x18] sm:$0xff]   ;;  %vm1147_vm7 = vcmask 900096   ;;  %vm1234_vm8 = vcmask 891904   ;;  %s485_s21 = sadd.s32 1, %s2019_s15 }
  0x3c   : > { %561 = vrot.lane.b32.xlu0 %v2074_v14, %s1903_s10  ;;  %557 = vrot.lane.b32.xlu1 %v2076_v15, %s1903_s10  ;;  %v1833_v35 = vld [vmem:[%s2240_s4 + $0x20] sm:$0xff]   ;;  %v1832_v42 = vld [vmem:[%s2240_s4 + $0x8] sm:$0xff]   ;;  %p486_p4 = scmp.lt.s32.totalorder %s485_s21, 6 }
  0x3d   : > { %v1835_v44 = vld [vmem:[%s2240_s4 + $0x30] sm:$0xff]   ;;  %v1834_v47 = vld [vmem:[%s2240_s4 + $0x28] sm:$0xff]   ;;  %v1837_v50 = vld [vmem:[%s2240_s4 + $0x40] sm:$0xff]  }
  0x3e   : > { %v1836_v55 = vld [vmem:[%s2240_s4 + $0x38] sm:$0xff]   ;;  %v1838_v57 = vld [vmem:[%s2240_s4 + $0x48] sm:$0xff]   ;;  %v1839_v59 = vld [vmem:[%s2240_s4 + $0x50] sm:$0xff]   ;;  %s2263_s21 = smov (!%p486_p4, %s485_s21), 6 }
  0x3f   : > { %v1841_v60 = vld [vmem:[%s2240_s4 + $0x60] sm:$0xff]   ;;  %v1840_v4 = vld [vmem:[%s2240_s4 + $0x58] sm:$0xff]   ;;  %v1843_v6 = vld [vmem:[%s2240_s4 + $0x70] sm:$0xff]  }
  0x40   : > { %638 = vrot.lane.b32.xlu0 %v1823_v12, %s1904_s16  ;;  %640 = vrot.lane.b32.xlu1 %v2074_v14, %s1904_s16  ;;  %v1842_v9 = vld [vmem:[%s2240_s4 + $0x68] sm:$0xff]   ;;  %v1845_v11 = vld [vmem:[%s2240_s4 + $0x80] sm:$0xff]  }
  0x44   : > { %721 = vrot.lane.b32.xlu0 %v1823_v12, %s1905_s19  ;;  %723 = vrot.lane.b32.xlu1 %v2074_v14, %s1905_s19 }
  0x48   : > { %634 = vrot.lane.b32.xlu0 %v1824_v13, %s1904_s16  ;;  %636 = vrot.lane.b32.xlu1 %v2076_v15, %s1904_s16 }
  0x4c   : > { %717 = vrot.lane.b32.xlu0 %v1824_v13, %s1905_s19  ;;  %719 = vrot.lane.b32.xlu1 %v2076_v15, %s1905_s19 }
  0x50   : > { %808 = vrot.lane.b32.xlu0 %v1823_v12, %s1906_s20  ;;  %810 = vrot.lane.b32.xlu1 %v2074_v14, %s1906_s20 }
  0x54   : > { %804 = vrot.lane.b32.xlu0 %v1824_v13, %s1906_s20  ;;  %806 = vrot.lane.b32.xlu1 %v2076_v15, %s1906_s20  ;;  %s488_s20 = scalar_lea.vmem %s2239_s3, %s2263_s21 }
  0x58   : > { %969 = vrot.lane.b32.xlu0 %v2074_v14, %s1907_s12  ;;  %971 = vrot.lane.b32.xlu1 %v1827_v18, %s1907_s12 }
  0x5c   : > { %1056 = vrot.lane.b32.xlu0 %v2074_v14, %s1908_s17  ;;  %1058 = vrot.lane.b32.xlu1 %v1827_v18, %s1908_s17 }
  0x60   : > { %965 = vrot.lane.b32.xlu0 %v2076_v15, %s1907_s12  ;;  %967 = vrot.lane.b32.xlu1 %v1828_v19, %s1907_s12  ;;  %s480_s12 = scalar_lea.vmem [#allocation5], %s2071_s30 }
  0x64   : > { %1052 = vrot.lane.b32.xlu0 %v2076_v15, %s1908_s17  ;;  %1054 = vrot.lane.b32.xlu1 %v1828_v19, %s1908_s17  ;;  %s1626_s17 = sshll.u32 (%p2036_p12), %s2019_s15, 2 }
  0x65   : > { %s1470_s10 = scalar_lea.vmem (%p2036_p12), %s2242_s6, %s1626_s17 }
  0x68   : > { %1143 = vrot.lane.b32.xlu0 %v2074_v14, %s1909_s8  ;;  %1145 = vrot.lane.b32.xlu1 %v1827_v18, %s1909_s8 }
  0x6c   : > { %1230 = vrot.lane.b32.xlu0 %v2074_v14, %s1910_s7  ;;  %1232 = vrot.lane.b32.xlu1 %v1827_v18, %s1910_s7 }
  0x70   : > { %1139 = vrot.lane.b32.xlu0 %v2076_v15, %s1909_s8  ;;  %1141 = vrot.lane.b32.xlu1 %v1828_v19, %s1909_s8 }
  0x74   : > { %1226 = vrot.lane.b32.xlu0 %v2076_v15, %s1910_s7  ;;  %1228 = vrot.lane.b32.xlu1 %v1828_v19, %s1910_s7 }
  0x78   : > { %1304 = vperm.xlu0 %1821, %v1298_v21   ;;  %1309 = vperm.xlu1 %1822, %v1299_v22   ;;  %v1844_v21 = vld [vmem:[%s2240_s4 + $0x78] sm:$0xff]  }
  0x7c   : > { %1319 = vperm.xlu0 %1821, %v1301_v23   ;;  %1314 = vperm.xlu1 %1822, %v1300_v24  }
  0xaa   : > { %v560_v25 = vpop.permute.xlu0 %559  ;;  %v556_v26 = vpop.permute.xlu1 %555 }
  0xae   : > { %v562_v27 = vpop.permute.xlu0 %561  ;;  %v558_v28 = vpop.permute.xlu1 %557 }
  0xaf   : > { %v565_v29 = vsel %vm563_vm1, %v560_v25, %v562_v27  ;;  %v564_v30 = vsel %vm563_vm1, %v556_v26, %v558_v28  ;;  %v1846_v25 = vld [vmem:[%s2240_s4 + $0x88] sm:$0xff]  }
  0xb0   : > { %1684 = vmatprep.subr.bf16.mxu0 %v565_v29 }
  0xb1   : > { %1685 = vmatpush3.bf16.msra.mxu0 %v565_v29 }
  0xb2   : > { %v639_v31 = vpop.permute.xlu0 %638  ;;  %1686 = vmatprep.subr.bf16.mxu0 %v564_v30  ;;  %v641_v32 = vpop.permute.xlu1 %640 }
  0xb3   : > { %v644_v33 = vsel %vm642_vm2, %v639_v31, %v641_v32 }
  0xb4   : > { %1692 = vmatprep.subr.bf16.mxu1 %v644_v33 }
  0xb5   : > { %1687 = vmatpush3.bf16.msra.mxu0 %v564_v30  ;;  %1693 = vmatpush3.bf16.msra.mxu1 %v644_v33 }
  0xb6   : > { %v722_v36 = vpop.permute.xlu0 %721  ;;  %v724_v37 = vpop.permute.xlu1 %723 }
  0xb7   : > { %v727_v38 = vsel %vm725_vm3, %v722_v36, %v724_v37 }
  0xb8   : > { %1689 = vmatmul.mubr.msk.bf16.vlgmr.msra.gmra.mxu0 %vm568_vm0, %v1830_v34  ;;  %1700 = vmatprep.subr.bf16.mxu0 %v727_v38 }
  0xb9   : > { %1704 = vmatprep.mubr.msk.bf16.mxu0 %vm568_vm0, %v1833_v35  ;;  %1701 = vmatpush3.bf16.msra.mxu0 %v727_v38 }
  0xba   : > { %v635_v39 = vpop.permute.xlu0 %634  ;;  %v637_v40 = vpop.permute.xlu1 %636 }
  0xbb   : > { %v643_v41 = vsel %vm642_vm2, %v635_v39, %v637_v40 }
  0xbc   : > { %1694 = vmatprep.subr.bf16.mxu1 %v643_v41 }
  0xbd   : > { %1695 = vmatpush3.bf16.msra.mxu1 %v643_v41 }
  0xbe   : > { %v718_v43 = vpop.permute.xlu0 %717  ;;  %v720_v45 = vpop.permute.xlu1 %719 }
  0xbf   : > { %v726_v46 = vsel %vm725_vm3, %v718_v43, %v720_v45 }
  0xc0   : > { %1702 = vmatprep.subr.bf16.mxu0 %v726_v46  ;;  %1697 = vmatmul.mubr.msk.bf16.vlgmr.msra.gmra.mxu1 %vm568_vm0, %v1832_v42 }
  0xc1   : > { %1703 = vmatpush3.bf16.msra.mxu0 %v726_v46  ;;  %1712 = vmatprep.mubr.msk.bf16.mxu1 %vm568_vm0, %v1835_v44 }
  0xc2   : > { %v809_v48 = vpop.permute.xlu0 %808  ;;  %v811_v49 = vpop.permute.xlu1 %810  ;;  %1716 = vmatprep.subr.bf16.mxu0 %v2074_v14 }
  0xc3   : > { %v814_v51 = vsel %vm812_vm4, %v809_v48, %v811_v49 }
  0xc4   : > { %1708 = vmatprep.subr.bf16.mxu1 %v814_v51  ;;  %1705 = vmatmul.mubr.msk.bf16.vlgmr.msra.gmra.mxu0 %vm568_vm0, %v1834_v47 }
  0xc5   : > { %1709 = vmatpush3.bf16.msra.mxu1 %v814_v51  ;;  %1717 = vmatpush3.bf16.msra.mxu0 %v2074_v14 }
  0xc6   : > { %v805_v52 = vpop.permute.xlu0 %804  ;;  %v807_v53 = vpop.permute.xlu1 %806  ;;  %1718 = vmatprep.subr.bf16.mxu0 %v2076_v15  ;;  %1720 = vmatprep.mubr.msk.bf16.mxu0 %vm568_vm0, %v1837_v50 }
  0xc7   : > { %v813_v54 = vsel %vm812_vm4, %v805_v52, %v807_v53 }
  0xc8   : > { %1710 = vmatprep.subr.bf16.mxu1 %v813_v54 }
  0xc9   : > { %1711 = vmatpush3.bf16.msra.mxu1 %v813_v54  ;;  %1719 = vmatpush3.bf16.msra.mxu0 %v2076_v15 }
  0xca   : > { %v970_v56 = vpop.permute.xlu0 %969  ;;  %v972_v58 = vpop.permute.xlu1 %971 }
  0xcb   : > { %v975_v61 = vsel %vm973_vm5, %v970_v56, %v972_v58 }
  0xcc   : > { %1713 = vmatmul.mubr.msk.bf16.vlgmr.msra.gmra.mxu1 %vm568_vm0, %v1836_v55  ;;  %1724 = vmatprep.subr.bf16.mxu1 %v975_v61 }
  0xcd   : > { %1725 = vmatpush3.bf16.msra.mxu1 %v975_v61  ;;  %1721 = vmatmul.mubr.msk.bf16.vlgmr.msra.gmra.mxu0 %vm568_vm0, %v1838_v57 }
  0xce   : > { %v1057_v62 = vpop.permute.xlu0 %1056  ;;  %v1059_v63 = vpop.permute.xlu1 %1058  ;;  %1728 = vmatprep.mubr.msk.bf16.mxu1 %vm568_vm0, %v1839_v59  ;;  %1736 = vmatprep.mubr.msk.bf16.mxu0 %vm568_vm0, %v1841_v60  ;;  %v1333_v60 = vlaneseq }
  0xcf   : > { %v1062_v0 = vsel %vm1060_vm6, %v1057_v62, %v1059_v63 }
  0xd0   : > { %1732 = vmatprep.subr.bf16.mxu0 %v1062_v0 }
  0xd1   : > { %1733 = vmatpush3.bf16.msra.mxu0 %v1062_v0 }
  0xd2   : > { %v966_v1 = vpop.permute.xlu0 %965  ;;  %v968_v2 = vpop.permute.xlu1 %967 }
  0xd3   : > { %v974_v3 = vsel %vm973_vm5, %v966_v1, %v968_v2  ;;  %v1330_v1 = vld [vmem:[%s488_s20] sm:$0x1] }
  0xd4   : > { %1726 = vmatprep.subr.bf16.mxu1 %v974_v3  ;;  %vm1331_vm9 = vcmp.gt.f32.partialorder %v1330_v1, 0.0 }
  0xd5   : > { %1727 = vmatpush3.bf16.msra.mxu1 %v974_v3 }
  0xd6   : > { %v1053_v5 = vpop.permute.xlu0 %1052  ;;  %v1055_v7 = vpop.permute.xlu1 %1054 }
  0xd7   : > { %v1061_v8 = vsel %vm1060_vm6, %v1053_v5, %v1055_v7  ;;  %v1334_v7 = vshrl.u32 %v1333_v60, 7 }
  0xd8   : > { %1729 = vmatmul.mubr.msk.bf16.vlgmr.msra.gmra.mxu1 %vm568_vm0, %v1840_v4  ;;  %1734 = vmatprep.subr.bf16.mxu0 %v1061_v8 }
  0xd9   : > { %1735 = vmatpush3.bf16.msra.mxu0 %v1061_v8  ;;  %1744 = vmatprep.mubr.msk.bf16.mxu1 %vm568_vm0, %v1843_v6 }
  0xda   : > { %v1144_v10 = vpop.permute.xlu0 %1143  ;;  %v1146_v12 = vpop.permute.xlu1 %1145 }
  0xdb   : > { %v1149_v13 = vsel %vm1147_vm7, %v1144_v10, %v1146_v12 }
  0xdc   : > { %1737 = vmatmul.mubr.msk.bf16.vlgmr.msra.gmra.mxu0 %vm568_vm0, %v1842_v9  ;;  %1740 = vmatprep.subr.bf16.mxu1 %v1149_v13 }
  0xdd   : > { %1741 = vmatpush3.bf16.msra.mxu1 %v1149_v13  ;;  %1752 = vmatprep.mubr.msk.bf16.mxu0 %vm568_vm0, %v1845_v11 }
  0xde   : > { %v1231_v14 = vpop.permute.xlu0 %1230  ;;  %v1233_v15 = vpop.permute.xlu1 %1232 }
  0xdf   : > { %v1236_v16 = vsel %vm1234_vm8, %v1231_v14, %v1233_v15 }
  0xe0   : > { %1748 = vmatprep.subr.bf16.mxu0 %v1236_v16 }
  0xe1   : > { %1749 = vmatpush3.bf16.msra.mxu0 %v1236_v16 }
  0xe2   : > { %v1140_v17 = vpop.permute.xlu0 %1139  ;;  %v1142_v18 = vpop.permute.xlu1 %1141 }
  0xe3   : > { %v1148_v19 = vsel %vm1147_vm7, %v1140_v17, %v1142_v18 }
  0xe4   : > { %1742 = vmatprep.subr.bf16.mxu1 %v1148_v19 }
  0xe5   : > { %1743 = vmatpush3.bf16.msra.mxu1 %v1148_v19 }
  0xe6   : > { %v1227_v22 = vpop.permute.xlu0 %1226  ;;  %v1229_v23 = vpop.permute.xlu1 %1228 }
  0xe7   : > { %v1235_v24 = vsel %vm1234_vm8, %v1227_v22, %v1229_v23  ;;  %v1332_v22 = vsel %vm1331_vm9, 1, %v1911_v20 }
  0xe8   : > { %1745 = vmatmul.mubr.msk.bf16.vlgmr.msra.gmra.mxu1 %vm568_vm0, %v1844_v21  ;;  %1750 = vmatprep.subr.bf16.mxu0 %v1235_v24  ;;  %v1335_v21 = vsub.s32 0, %v1334_v7 }
  0xe9   : > { %1751 = vmatpush3.bf16.msra.mxu0 %v1235_v24 }
  0xec   : > { %1753 = vmatmul.mubr.msk.bf16.vlgmr.msra.gmra.mxu0 %vm568_vm0, %v1846_v25 }
  0xf3   : > { %v1310_v0 = vpop.permute.xlu1 %1309  ;;  %v1305_v18 = vpop.permute.xlu0 %1304 }
  0xf7   : > { %v1315_v19 = vpop.permute.xlu1 %1314 }
 0x178   : > { %v1690_v26 = vpop.f32.mrf.mxu0 }
 0x17a   : > { %v609_v27 = vpop.f32.mrf.mxu0 }
 0x17c   : > { %v1691_v28 = vpop.f32.mrf.mxu0 }
 0x17e   : > { %v612_v29 = vpop.f32.mrf.mxu0 }
 0x180   : > { %v1698_v30 = vpop.f32.mrf.mxu1 }
 0x181   : > { %v696_v45 = vadd.f32 %v1698_v30, %v1690_v26 }
 0x182   : > { %v687_v31 = vpop.f32.mrf.mxu1 }
 0x183   : > { %v688_v47 = vadd.f32 %v687_v31, %v609_v27 }
 0x184   : > { %v1706_v32 = vpop.f32.mrf.mxu0  ;;  %v1699_v33 = vpop.f32.mrf.mxu1 }
 0x185   : > { %v787_v49 = vadd.f32 %v1706_v32, %v696_v45  ;;  %v699_v50 = vadd.f32 %v1699_v33, %v1691_v28 }
 0x186   : > { %v770_v34 = vpop.f32.mrf.mxu0  ;;  %v690_v35 = vpop.f32.mrf.mxu1 }
 0x187   : > { %v785_v53 = vadd.f32 %v770_v34, %v688_v47  ;;  %v691_v54 = vadd.f32 %v690_v35, %v612_v29  ;;  %v1336_v35 = vrot.slane %v1332_v22, %v1335_v21 }
 0x188   : > { %v1707_v36 = vpop.f32.mrf.mxu0 }
 0x189   : > { %v788_v55 = vadd.f32 %v1707_v36, %v699_v50  ;;  %vm1337_vm10 = vcmp.eq.s32.totalorder %v1336_v35, 1 }
 0x18a   : > { %v773_v37 = vpop.f32.mrf.mxu0 }
 0x18b   : > { %v786_v61 = vadd.f32 %v773_v37, %v691_v54 }
 0x18c   : > { %v1714_v38 = vpop.f32.mrf.mxu1 }
 0x18d   : > { %v1722_v40 = vpop.f32.mrf.mxu0  ;;  %v874_v56 = vadd.f32 %v1714_v38, %v787_v49 }
 0x18e   : > { %v857_v39 = vpop.f32.mrf.mxu1 }
 0x18f   : > { %v931_v42 = vpop.f32.mrf.mxu0  ;;  %v872_v59 = vadd.f32 %v857_v39, %v785_v53  ;;  %v948_v62 = vadd.f32 %v1722_v40, %v874_v56  ;;  %v1320_v40 = vpop.permute.xlu0 %1319 }
 0x190   : > { %v1715_v41 = vpop.f32.mrf.mxu1 }
 0x191   : > { %v1723_v44 = vpop.f32.mrf.mxu0  ;;  %v875_v63 = vadd.f32 %v1715_v41, %v788_v55  ;;  %v946_v4 = vadd.f32 %v931_v42, %v872_v59 }
 0x192   : > { %v860_v43 = vpop.f32.mrf.mxu1 }
 0x193   : > { %v934_v48 = vpop.f32.mrf.mxu0  ;;  %v873_v5 = vadd.f32 %v860_v43, %v786_v61  ;;  %v949_v9 = vadd.f32 %v1723_v44, %v875_v63 }
 0x195   : > { %v947_v14 = vadd.f32 %v934_v48, %v873_v5 }
 0x198   : > { %v1730_v46 = vpop.f32.mrf.mxu1 }
 0x199   : > { %v1035_v6 = vadd.f32 %v1730_v46, %v948_v62 }
 0x19a   : > { %v1018_v51 = vpop.f32.mrf.mxu1 }
 0x19b   : > { %v1033_v10 = vadd.f32 %v1018_v51, %v946_v4 }
 0x19c   : > { %v1738_v52 = vpop.f32.mrf.mxu0  ;;  %v1731_v57 = vpop.f32.mrf.mxu1 }
 0x19d   : > { %v1122_v11 = vadd.f32 %v1738_v52, %v1035_v6  ;;  %v1036_v15 = vadd.f32 %v1731_v57, %v949_v9 }
 0x19e   : > { %v1105_v58 = vpop.f32.mrf.mxu0  ;;  %v1021_v2 = vpop.f32.mrf.mxu1 }
 0x19f   : > { %v1120_v16 = vadd.f32 %v1105_v58, %v1033_v10  ;;  %v1034_v25 = vadd.f32 %v1021_v2, %v947_v14 }
 0x1a0   : > { %v1739_v3 = vpop.f32.mrf.mxu0 }
 0x1a1   : > { %v1123_v26 = vadd.f32 %v1739_v3, %v1036_v15 }
 0x1a2   : > { %v1108_v12 = vpop.f32.mrf.mxu0 }
 0x1a3   : > { %v1121_v31 = vadd.f32 %v1108_v12, %v1034_v25 }
 0x1a8   : > { %v1746_v8 = vpop.f32.mrf.mxu1 }
 0x1a9   : > { %v1209_v17 = vadd.f32 %v1746_v8, %v1122_v11 }
 0x1aa   : > { %v1192_v13 = vpop.f32.mrf.mxu1 }
 0x1ab   : > { %v1207_v27 = vadd.f32 %v1192_v13, %v1120_v16 }
 0x1ac   : > { %v1747_v23 = vpop.f32.mrf.mxu1  ;;  %v1754_v24 = vpop.f32.mrf.mxu0 }
 0x1ad   : > { %v1296_v28 = vadd.f32 %v1754_v24, %v1209_v17  ;;  %v1210_v32 = vadd.f32 %v1747_v23, %v1123_v26 }
 0x1ae   : > { %v1195_v29 = vpop.f32.mrf.mxu1  ;;  %v1279_v30 = vpop.f32.mrf.mxu0 }
 0x1af   : > { %v1294_v33 = vadd.f32 %v1279_v30, %v1207_v27  ;;  %v1324_v34 = vadd.f32 %v1315_v19, %v1296_v28  ;;  %v1208_v37 = vadd.f32 %v1195_v29, %v1121_v31 }
 0x1b0   : > { %v1755_v36 = vpop.f32.mrf.mxu0 }
 0x1b1   : > { %v1322_v38 = vadd.f32 %v1305_v18, %v1294_v33  ;;  %v1297_v39 = vadd.f32 %v1755_v36, %v1210_v32  ;;  %v1328_v41 = vmax.f32 %v1324_v34, 0.0 }
 0x1b2   : > { %v1282_v20 = vpop.f32.mrf.mxu0 }
 0x1b3   : > { %v1325_v42 = vadd.f32 %v1320_v40, %v1297_v39  ;;  %v1295_v43 = vadd.f32 %v1282_v20, %v1208_v37  ;;  %v1326_v44 = vmax.f32 %v1322_v38, 0.0  ;;  %v1340_v47 = vsel %vm1337_vm10, %v1328_v41, 0.0 }
 0x1b5   : > { %v1329_v45 = vmax.f32 %v1325_v42, 0.0  ;;  %v1323_v46 = vadd.f32 %v1310_v0, %v1295_v43  ;;  %v1338_v51 = vsel %vm1337_vm10, %v1326_v44, 0.0 }
 0x1b7   : > { %v1341_v48 = vsel %vm1337_vm10, %v1329_v45, 0.0  ;;  %v1327_v49 = vmax.f32 %v1323_v46, 0.0 }
 0x1b8   : > { %v1645_v50 = vpack.c.bf16 %v1341_v48, %v1340_v47  ;;  %1368 = sbr.rel (!%p2036_p12) target bundleno = 453 (0x1c5), region = 171 }
 0x1b9   : > { %v1339_v52 = vsel %vm1337_vm10, %v1327_v49, 0.0 }
 0x1ba   : > { %1647 = vst [vmem:[%s480_s12 + $0x8] sm:$0xff] %v1645_v50   ;;  %v1640_v53 = vpack.c.bf16 %v1339_v52, %v1338_v51 }
 0x1bc   : > { %1641 = vst [vmem:[%s480_s12] sm:$0xff] %v1640_v53  }
 0x1c1   : > { %v1392_v56 = vld [vmem:[%s480_s12 + $0x8] sm:$0xf]  ;;  %v1394_v57 = vld [vmem:[%s480_s12 + $0xc] sm:$0xf] }
 0x1c2   : > { %1629 = vst [vmem:[%s1470_s10 + $0x3c] sm:$0xf] %v1392_v56  ;;  %1630 = vst [vmem:[%s1470_s10 + $0x58] sm:$0xf] %v1394_v57 }
 0x1c3   : > { %v1388_v54 = vld [vmem:[%s480_s12] sm:$0xf]  ;;  %v1390_v55 = vld [vmem:[%s480_s12 + $0x4] sm:$0xf] }
 0x1c4   : > { %1627 = vst [vmem:[%s1470_s10 + $0x4] sm:$0xf] %v1388_v54  ;;  %1628 = vst [vmem:[%s1470_s10 + $0x20] sm:$0xf] %v1390_v55 }
 0x1c5 PF: > { %s2249_s18 = sld [smem:[#allocation7_spill]]  ;;  %p13_p5 = scmp.ge.s32.totalorder %s1983_s28, 8  }
 0x1c6   : > { %s2250_s15 = sld [smem:[#allocation6_spill]]  ;;  %s2251_s21 = smov %s1881_s22 }
 0x1c7   : > { %s2252_s22 = smov %s2043_s29  ;;  %s2253_s23 = smov %s1889_s24 }
 0x1c8   : > { %s2255_s25 = smov %s1897_s26  ;;  %s2257_s27 = smov %s1983_s28 }
 0x1c9   :  { %15 = sbr.rel (!%p13_p5) target bundleno = 4 (0x4), region = 270 }
 0x1cb   : > { %s2254_s24 = smov %s2249_s18 }
 0x1cc   : > { %s2256_s26 = smov %s2250_s15 }

// kernel: group_unit_pallas.10
= control target key start
LH: loop header
LB: loop body
LE: loop exit
PB: predicated region body
PF: predicated region fallthrough
CT: control target
= control target key end

     0   :  { %s2105_s24 = smov 0   ;;  %s2107_s25 = smov 0   ;;  %s2403_s0 = inlined_call_operand.vmem [shape: bf16[32,896], index: 0, kind: input, shape index: {}, may-alias: {0,1,2}]   ;;  %s2404_s1 = inlined_call_operand.vmem [shape: bf16[32,896], index: 1, kind: input, shape index: {}, may-alias: {0,1,2}]   ;;  %s2405_s2 = inlined_call_operand.vmem [shape: bf16[32,896], index: 2, kind: input, shape index: {}, may-alias: {0,1,2}]   ;;  %s2406_s3 = inlined_call_operand.vmem [shape: f32[1,896], index: 3, kind: input, shape index: {}]   ;;  %s2407_s4 = inlined_call_operand.vmem [shape: bf16[9,32,32], index: 4, kind: input, shape index: {}]   ;;  %s2408_s5 = inlined_call_operand.vmem [shape: f32[32,1], index: 5, kind: input, shape index: {}]   ;;  %s2409_s6 = inlined_call_operand.vmem [shape: bf16[32,896], index: 6, kind: input, shape index: {}]   ;;  %s2410_s7 = inlined_call_operand.vmem [shape: bf16[32,896], index: 7, kind: output, shape index: {}]  }
   0x1   :  { %s2109_s26 = smov 0   ;;  %s2111_s27 = smov 0  }
   0x2   :  { %s2113_s28 = smov 0   ;;  %s2115_s29 = smov 0  }
   0x3   :  { %s2117_s30 = smov 0  }
   0x4 LB: > { %s2141_s8 = sadd.s32 1, %s2054_s30   ;;  %s24_s10 = sadd.s32 1, %s2050_s29  ;;  %s2054_s30 = sphi %s2117_s30, %s2420_s30   ;;  %s2050_s29 = sphi %s2115_s29, %s2428_s29   ;;  %s2046_s28 = sphi %s2113_s28, %s2427_s28   ;;  %s2042_s27 = sphi %s2111_s27, %s2426_s27   ;;  %s2038_s26 = sphi %s2109_s26, %s2425_s26   ;;  %s2034_s25 = sphi %s2107_s25, %s2424_s25   ;;  %s2030_s24 = sphi %s2105_s24, %s2423_s24  }
   0x5   : > { %2413 = sst [smem:[#allocation7_spill]] %s2141_s8  ;;  %s21_s9 = ssub.s32 %s2054_s30, %s2141_s8 }
   0x6   : > { %p22_p0 = scmp.eq.s32.totalorder %s21_s9, 0  ;;  %p31_p1 = scmp.ne.s32.totalorder %s2050_s29, %s2046_s28 }
   0x7   : > { %p32_p2 = scmp.eq.s32.totalorder %s2054_s30, 0  ;;  %s48_s11 = sadd.s32 1, %s2141_s8 }
   0x8   : > { %s2151_s12 = scalar_select %p22_p0, %s2050_s29, %s24_s10  }
   0x9   : > { %p2155_p3 = por %p32_p2, %p31_p1  ;;  %s49_s14 = ssub.s32 %s2141_s8, %s48_s11 }
   0xa   : > { %2414 = sst [smem:[#allocation8_spill]] %s2151_s12  ;;  %p50_p4 = scmp.eq.s32.totalorder %s49_s14, 0 }
   0xb   : > { %s52_s15 = sadd.s32 1, %s2042_s27  ;;  %p59_p5 = scmp.ne.s32.totalorder %s2042_s27, %s2038_s26 }
   0xc   : > { %s75_s16 = sadd.s32 2, %s2054_s30  ;;  %s2177_s19 = sadd.s32 4294967295, %s2054_s30  }
   0xd   : > { %s2165_s17 = scalar_select %p50_p4, %s2042_s27, %s52_s15  }
   0xe   : > { %p2172_p6 = por %p59_p5, %p32_p2  ;;  %p76_p7 = scmp.lt.s32.totalorder %s75_s16, 6 }
   0xf   : > { %2416 = sst [smem:[#allocation9_spill]] %s2165_s17  ;;  %s78_s20 = sadd.s32 2, %s2141_s8 }
  0x10   : > { %s2430_s16 = smov (!%p76_p7, %s75_s16), 6  ;;  %p79_p8 = scmp.lt.s32.totalorder %s78_s20, 6 }
  0x11   : > { %p91_p9 = scmp.ne.s32.totalorder %s2034_s25, %s2030_s24  ;;  %p221_p10 = scmp.eq.s32.totalorder %s2177_s19, 5 }
  0x12   : > { %s2432_s20 = smov (!%p79_p8, %s78_s20), 6  ;;  %s84_s9 = sadd.s32 1, %s2034_s25 }
  0x13   : > { %p2187_p11 = por %p91_p9, %p32_p2  ;;  %p2194_p12 = por %p221_p10, %p59_p5 }
  0x14   : > { %s81_s23 = ssub.s32 %s2430_s16, %s2432_s20  ;;  %p1668_p0 = scmp.ge.s32.totalorder %s2054_s30, 6 }
  0x15   : > { %p82_p13 = scmp.eq.s32.totalorder %s81_s23, 0 }
  0x16   : > { %249 = sbr.rel (%p1668_p0) target bundleno = 51 (0x33), region = 24 }
  0x17   : > { %s2201_s10 = scalar_select %p82_p13, %s2034_s25, %s84_s9  }
  0x1b   : > { %252 = sbr.rel (!%p2155_p3) target bundleno = 33 (0x21), region = 28  ;;  %s254_s11 = sand.u32 (%p2155_p3), 1, %s2050_s29  }
  0x1c   : > { %s1670_s14 = sshll.u32 (%p2155_p3), %s2054_s30, 2  ;;  %s1669_s15 = sshll.u32 (%p2155_p3), %s254_s11, 4 }
  0x1d   : > { %s258_s8 = scalar_lea.vmem (%p2155_p3), %s2403_s0, %s1670_s14  ;;  %s256_s20 = scalar_lea.vmem (%p2155_p3), [#allocation2], %s1669_s15 }
  0x1e   : > { %v275_v0 = vld [vmem:[%s258_s8] sm:$0xf] (%p2155_p3)  ;;  %v277_v1 = vld [vmem:[%s258_s8 + $0x1c] sm:$0xf] (%p2155_p3)  ;;  %v279_v2 = vld [vmem:[%s258_s8 + $0x38] sm:$0xf] (%p2155_p3) }
  0x1f   : > { %276 = vst [vmem:[%s256_s20] sm:$0xf] (%p2155_p3), %v275_v0  ;;  %278 = vst [vmem:[%s256_s20 + $0x4] sm:$0xf] (%p2155_p3), %v277_v1  ;;  %v281_v3 = vld [vmem:[%s258_s8 + $0x54] sm:$0xf] (%p2155_p3) }
  0x20   : > { %280 = vst [vmem:[%s256_s20 + $0x8] sm:$0xf] %v279_v2  ;;  %282 = vst [vmem:[%s256_s20 + $0xc] sm:$0xf] %v281_v3 }
  0x21 PF: > { %314 = sbr.rel (!%p2172_p6) target bundleno = 39 (0x27), region = 69  ;;  %s316_s13 = sand.u32 (%p2172_p6), 1, %s2042_s27  }
  0x22   : > { %s1672_s23 = sshll.u32 (%p2172_p6), %s2054_s30, 2  ;;  %s1671_s9 = sshll.u32 (%p2172_p6), %s316_s13, 4 }
  0x23   : > { %s1562_s11 = scalar_lea.vmem (%p2172_p6), %s2404_s1, %s1672_s23  ;;  %s318_s14 = scalar_lea.vmem (%p2172_p6), [#allocation3], %s1671_s9 }
  0x24   : > { %v1673_v4 = vld [vmem:[%s1562_s11 + $0x4] sm:$0xf] (%p2172_p6)  ;;  %v1674_v5 = vld [vmem:[%s1562_s11 + $0x20] sm:$0xf] (%p2172_p6)  ;;  %v1675_v6 = vld [vmem:[%s1562_s11 + $0x3c] sm:$0xf] (%p2172_p6) }
  0x25   : > { %339 = vst [vmem:[%s318_s14] sm:$0xf] (%p2172_p6), %v1673_v4  ;;  %341 = vst [vmem:[%s318_s14 + $0x4] sm:$0xf] (%p2172_p6), %v1674_v5  ;;  %v1676_v7 = vld [vmem:[%s1562_s11 + $0x58] sm:$0xf] (%p2172_p6) }
  0x26   : > { %343 = vst [vmem:[%s318_s14 + $0x8] sm:$0xf] %v1675_v6  ;;  %345 = vst [vmem:[%s318_s14 + $0xc] sm:$0xf] %v1676_v7 }
  0x27 PF: > { %377 = sbr.rel (!%p2187_p11) target bundleno = 45 (0x2d), region = 110  ;;  %s379_s8 = sand.u32 (%p2187_p11), 1, %s2034_s25  }
  0x28   : > { %s1678_s15 = sshll.u32 (%p2187_p11), %s2430_s16, 2  ;;  %s1677_s20 = sshll.u32 (%p2187_p11), %s379_s8, 4 }
  0x29   : > { %s386_s12 = scalar_lea.vmem (%p2187_p11), %s2405_s2, %s1678_s15  ;;  %s381_s9 = scalar_lea.vmem (%p2187_p11), [#allocation4], %s1677_s20 }
  0x2a   : > { %v403_v8 = vld [vmem:[%s386_s12] sm:$0xf] (%p2187_p11)  ;;  %v405_v9 = vld [vmem:[%s386_s12 + $0x1c] sm:$0xf] (%p2187_p11)  ;;  %v407_v10 = vld [vmem:[%s386_s12 + $0x38] sm:$0xf] (%p2187_p11) }
  0x2b   : > { %404 = vst [vmem:[%s381_s9] sm:$0xf] (%p2187_p11), %v403_v8  ;;  %406 = vst [vmem:[%s381_s9 + $0x4] sm:$0xf] (%p2187_p11), %v405_v9  ;;  %v409_v11 = vld [vmem:[%s386_s12 + $0x54] sm:$0xf] (%p2187_p11) }
  0x2c   : > { %408 = vst [vmem:[%s381_s9 + $0x8] sm:$0xf] %v407_v10  ;;  %410 = vst [vmem:[%s381_s9 + $0xc] sm:$0xf] %v409_v11 }
  0x2d PF: > { %450 = sbr.rel (!%p2172_p6) target bundleno = 51 (0x33), region = 155  ;;  %s452_s16 = sand.u32 (%p2172_p6), 1, %s2042_s27  }
  0x2e   : > { %s1680_s21 = sshll.u32 (%p2172_p6), %s2054_s30, 2  ;;  %s1679_s17 = sshll.u32 (%p2172_p6), %s452_s16, 4 }
  0x2f   : > { %s1572_s8 = scalar_lea.vmem (%p2172_p6), %s2409_s6, %s1680_s21  ;;  %s454_s15 = scalar_lea.vmem (%p2172_p6), [#allocation5], %s1679_s17 }
  0x30   : > { %v1681_v12 = vld [vmem:[%s1572_s8 + $0x4] sm:$0xf] (%p2172_p6)  ;;  %v1682_v13 = vld [vmem:[%s1572_s8 + $0x20] sm:$0xf] (%p2172_p6)  ;;  %v1683_v14 = vld [vmem:[%s1572_s8 + $0x3c] sm:$0xf] (%p2172_p6) }
  0x31   : > { %475 = vst [vmem:[%s454_s15] sm:$0xf] (%p2172_p6), %v1681_v12  ;;  %477 = vst [vmem:[%s454_s15 + $0x4] sm:$0xf] (%p2172_p6), %v1682_v13  ;;  %v1684_v15 = vld [vmem:[%s1572_s8 + $0x58] sm:$0xf] (%p2172_p6) }
  0x32   : > { %479 = vst [vmem:[%s454_s15 + $0x8] sm:$0xf] %v1683_v14  ;;  %481 = vst [vmem:[%s454_s15 + $0xc] sm:$0xf] %v1684_v15 }
  0x33 PF: > { %p1685_p1 = scmp.ge.s32.totalorder %s2054_s30, 1  ;;  %p512_p2 = scmp.lt.s32.totalorder %s2054_s30, 7 }
  0x35   : > { %p513_p3 = pnand %p1685_p1, %p512_p2 }
  0x36   : > { %s519_s18 = sand.u32 (!%p513_p3), 1, %s2046_s28   ;;  %s526_s13 = sand.u32 (!%p513_p3), 1, %s2038_s26  }
  0x37   : > { %516 = sbr.rel (%p513_p3) target bundleno = 460 (0x1cc), region = 196  ;;  %s1686_s20 = sshll.u32 (!%p513_p3), %s519_s18, 4 }
  0x38   : > { %s2236_s23 = sshll.u32 (!%p513_p3), %s526_s13, 4  ;;  %s521_s12 = scalar_lea.vmem (!%p513_p3), [#allocation2], %s1686_s20 }
  0x39   : > { %s2056_s9 = smov (!%p513_p3), 18   ;;  %s528_s16 = scalar_lea.vmem (!%p513_p3), [#allocation3], %s2236_s23 }
  0x3a   : > { %s533_s30 = sand.u32 (!%p513_p3), 1, %s2030_s24   ;;  %s2057_s11 = smov (!%p513_p3), 19  }
  0x3b   : > { %s2247_s26 = sshll.u32 (!%p513_p3), %s533_s30, 4  ;;  %s2058_s8 = smov (!%p513_p3), 17  }
  0x3c   : > { %v1976_v16 = vld [vmem:[%s521_s12 + $0x8] sm:$0xff]   ;;  %v1977_v17 = vld [vmem:[%s521_s12] sm:$0xff]   ;;  %vm674_vm0 = vcmask 261120   ;;  %s535_s28 = scalar_lea.vmem [#allocation4], %s2247_s26  ;;  %s2059_s15 = smov 1   ;;  %v2064_v24 = vmov 0  }
  0x3d   : > { %665 = vrot.lane.b32.xlu0 %v1976_v16, %s2056_s9  ;;  %v2239_v18 = vld [vmem:[%s528_s16 + $0x8] sm:$0xff]   ;;  %661 = vrot.lane.b32.xlu1 %v1977_v17, %s2056_s9  ;;  %v2241_v19 = vld [vmem:[%s528_s16] sm:$0xff]   ;;  %s2060_s18 = smov 127   ;;  %s2061_s20 = smov 111   ;;  %vm669_vm1 = vcmask 146432   ;;  %vm748_vm2 = vcmask 154624  }
  0x3e   : > { %v1982_v20 = vld [vmem:[%s2407_s4 + $0x10] sm:$0xff]   ;;  %v1984_v21 = vld [vmem:[%s2407_s4] sm:$0xff]   ;;  %v1980_v22 = vld [vmem:[%s535_s28 + $0x8] sm:$0xff]   ;;  %s2062_s13 = smov 110   ;;  %s2063_s12 = smov 109   ;;  %1975 = vset.pattern.permute.xlu1 %v2064_v24  ;;  %1974 = vset.pattern.permute.xlu0 %v2064_v24  ;;  %vm831_vm3 = vcmask 138240  }
  0x3f   : > { %1841 = vmatprep.mubr.msk.bf16.mxu0 %vm674_vm0, %v1982_v20  ;;  %1849 = vmatprep.mubr.msk.bf16.mxu1 %vm674_vm0, %v1984_v21  ;;  %v1981_v23 = vld [vmem:[%s535_s28] sm:$0xff]   ;;  %v1405_v26 = vld [vmem:[%s2408_s5 + $0x8] sm:$0xff]  ;;  %v1407_v27 = vld [vmem:[%s2408_s5 + $0x18] sm:$0xff]  ;;  %vm918_vm4 = vcmask 7168   ;;  %vm1079_vm5 = vcmask 1039360   ;;  %vm1166_vm6 = vcmask 908288  }
  0x40   : > { %v1404_v25 = vld [vmem:[%s2408_s5] sm:$0xff]  ;;  %v1406_v28 = vld [vmem:[%s2408_s5 + $0x10] sm:$0xff]  ;;  %v1983_v38 = vld [vmem:[%s2407_s4 + $0x18] sm:$0xff]   ;;  %vm1253_vm7 = vcmask 900096   ;;  %vm1340_vm8 = vcmask 891904   ;;  %s590_s24 = sadd.s32 1, %s2177_s19 }
  0x41   : > { %667 = vrot.lane.b32.xlu0 %v2239_v18, %s2056_s9  ;;  %663 = vrot.lane.b32.xlu1 %v2241_v19, %s2056_s9  ;;  %v1986_v39 = vld [vmem:[%s2407_s4 + $0x20] sm:$0xff]   ;;  %v1985_v46 = vld [vmem:[%s2407_s4 + $0x8] sm:$0xff]   ;;  %p591_p4 = scmp.lt.s32.totalorder %s590_s24, 6 }
  0x42   : > { %v1988_v48 = vld [vmem:[%s2407_s4 + $0x30] sm:$0xff]   ;;  %v1987_v51 = vld [vmem:[%s2407_s4 + $0x28] sm:$0xff]   ;;  %v1990_v54 = vld [vmem:[%s2407_s4 + $0x40] sm:$0xff]  }
  0x43   : > { %v1989_v59 = vld [vmem:[%s2407_s4 + $0x38] sm:$0xff]   ;;  %v1991_v61 = vld [vmem:[%s2407_s4 + $0x48] sm:$0xff]   ;;  %v1992_v63 = vld [vmem:[%s2407_s4 + $0x50] sm:$0xff]   ;;  %s2434_s24 = smov (!%p591_p4, %s590_s24), 6 }
  0x44   : > { %v1994_v0 = vld [vmem:[%s2407_s4 + $0x60] sm:$0xff]   ;;  %v1993_v8 = vld [vmem:[%s2407_s4 + $0x58] sm:$0xff]   ;;  %v1996_v10 = vld [vmem:[%s2407_s4 + $0x70] sm:$0xff]  }
  0x45   : > { %744 = vrot.lane.b32.xlu0 %v1976_v16, %s2057_s11  ;;  %746 = vrot.lane.b32.xlu1 %v2239_v18, %s2057_s11  ;;  %v1995_v13 = vld [vmem:[%s2407_s4 + $0x68] sm:$0xff]   ;;  %v1998_v15 = vld [vmem:[%s2407_s4 + $0x80] sm:$0xff]  }
  0x49   : > { %827 = vrot.lane.b32.xlu0 %v1976_v16, %s2058_s8  ;;  %829 = vrot.lane.b32.xlu1 %v2239_v18, %s2058_s8 }
  0x4d   : > { %740 = vrot.lane.b32.xlu0 %v1977_v17, %s2057_s11  ;;  %742 = vrot.lane.b32.xlu1 %v2241_v19, %s2057_s11 }
  0x51   : > { %823 = vrot.lane.b32.xlu0 %v1977_v17, %s2058_s8  ;;  %825 = vrot.lane.b32.xlu1 %v2241_v19, %s2058_s8 }
  0x55   : > { %914 = vrot.lane.b32.xlu0 %v1976_v16, %s2059_s15  ;;  %916 = vrot.lane.b32.xlu1 %v2239_v18, %s2059_s15 }
  0x59   : > { %910 = vrot.lane.b32.xlu0 %v1977_v17, %s2059_s15  ;;  %912 = vrot.lane.b32.xlu1 %v2241_v19, %s2059_s15  ;;  %s593_s15 = scalar_lea.vmem %s2406_s3, %s2434_s24 }
  0x5d   : > { %1075 = vrot.lane.b32.xlu0 %v2239_v18, %s2060_s18  ;;  %1077 = vrot.lane.b32.xlu1 %v1980_v22, %s2060_s18 }
  0x61   : > { %1162 = vrot.lane.b32.xlu0 %v2239_v18, %s2061_s20  ;;  %1164 = vrot.lane.b32.xlu1 %v1980_v22, %s2061_s20 }
  0x65   : > { %1071 = vrot.lane.b32.xlu0 %v2241_v19, %s2060_s18  ;;  %1073 = vrot.lane.b32.xlu1 %v1981_v23, %s2060_s18  ;;  %s542_s18 = scalar_lea.vmem [#allocation5], %s2236_s23 }
  0x69   : > { %1158 = vrot.lane.b32.xlu0 %v2241_v19, %s2061_s20  ;;  %1160 = vrot.lane.b32.xlu1 %v1981_v23, %s2061_s20  ;;  %s585_s20 = scalar_lea.vmem [#allocation6], %s2236_s23 }
  0x6d   : > { %1249 = vrot.lane.b32.xlu0 %v2239_v18, %s2062_s13  ;;  %1251 = vrot.lane.b32.xlu1 %v1980_v22, %s2062_s13 }
  0x71   : > { %1336 = vrot.lane.b32.xlu0 %v2239_v18, %s2063_s12  ;;  %1338 = vrot.lane.b32.xlu1 %v1980_v22, %s2063_s12 }
  0x75   : > { %1245 = vrot.lane.b32.xlu0 %v2241_v19, %s2062_s13  ;;  %1247 = vrot.lane.b32.xlu1 %v1981_v23, %s2062_s13  ;;  %s1770_s13 = sshll.u32 (%p2194_p12), %s2177_s19, 2 }
  0x76   : > { %s1597_s16 = scalar_lea.vmem (%p2194_p12), %s2410_s7, %s1770_s13 }
  0x79   : > { %1332 = vrot.lane.b32.xlu0 %v2241_v19, %s2063_s12  ;;  %1334 = vrot.lane.b32.xlu1 %v1981_v23, %s2063_s12 }
  0x7d   : > { %1410 = vperm.xlu0 %1974, %v1404_v25   ;;  %1415 = vperm.xlu1 %1975, %v1405_v26   ;;  %v1997_v25 = vld [vmem:[%s2407_s4 + $0x78] sm:$0xff]  }
  0x81   : > { %1425 = vperm.xlu0 %1974, %v1407_v27   ;;  %1420 = vperm.xlu1 %1975, %v1406_v28  }
  0xaf   : > { %v666_v29 = vpop.permute.xlu0 %665  ;;  %v662_v30 = vpop.permute.xlu1 %661 }
  0xb3   : > { %v668_v31 = vpop.permute.xlu0 %667  ;;  %v664_v32 = vpop.permute.xlu1 %663 }
  0xb4   : > { %v671_v33 = vsel %vm669_vm1, %v666_v29, %v668_v31  ;;  %v670_v34 = vsel %vm669_vm1, %v662_v30, %v664_v32  ;;  %v1999_v29 = vld [vmem:[%s2407_s4 + $0x88] sm:$0xff]  }
  0xb5   : > { %1837 = vmatprep.subr.bf16.mxu0 %v671_v33 }
  0xb6   : > { %1838 = vmatpush3.bf16.msra.mxu0 %v671_v33 }
  0xb7   : > { %v745_v35 = vpop.permute.xlu0 %744  ;;  %1839 = vmatprep.subr.bf16.mxu0 %v670_v34  ;;  %v747_v36 = vpop.permute.xlu1 %746 }
  0xb8   : > { %v750_v37 = vsel %vm748_vm2, %v745_v35, %v747_v36 }
  0xb9   : > { %1845 = vmatprep.subr.bf16.mxu1 %v750_v37 }
  0xba   : > { %1840 = vmatpush3.bf16.msra.mxu0 %v670_v34  ;;  %1846 = vmatpush3.bf16.msra.mxu1 %v750_v37 }
  0xbb   : > { %v828_v40 = vpop.permute.xlu0 %827  ;;  %v830_v41 = vpop.permute.xlu1 %829 }
  0xbc   : > { %v833_v42 = vsel %vm831_vm3, %v828_v40, %v830_v41 }
  0xbd   : > { %1842 = vmatmul.mubr.msk.bf16.vlgmr.msra.gmra.mxu0 %vm674_vm0, %v1983_v38  ;;  %1853 = vmatprep.subr.bf16.mxu0 %v833_v42 }
  0xbe   : > { %1857 = vmatprep.mubr.msk.bf16.mxu0 %vm674_vm0, %v1986_v39  ;;  %1854 = vmatpush3.bf16.msra.mxu0 %v833_v42 }
  0xbf   : > { %v741_v43 = vpop.permute.xlu0 %740  ;;  %v743_v44 = vpop.permute.xlu1 %742 }
  0xc0   : > { %v749_v45 = vsel %vm748_vm2, %v741_v43, %v743_v44 }
  0xc1   : > { %1847 = vmatprep.subr.bf16.mxu1 %v749_v45 }
  0xc2   : > { %1848 = vmatpush3.bf16.msra.mxu1 %v749_v45 }
  0xc3   : > { %v824_v47 = vpop.permute.xlu0 %823  ;;  %v826_v49 = vpop.permute.xlu1 %825 }
  0xc4   : > { %v832_v50 = vsel %vm831_vm3, %v824_v47, %v826_v49 }
  0xc5   : > { %1855 = vmatprep.subr.bf16.mxu0 %v832_v50  ;;  %1850 = vmatmul.mubr.msk.bf16.vlgmr.msra.gmra.mxu1 %vm674_vm0, %v1985_v46 }
  0xc6   : > { %1856 = vmatpush3.bf16.msra.mxu0 %v832_v50  ;;  %1865 = vmatprep.mubr.msk.bf16.mxu1 %vm674_vm0, %v1988_v48 }
  0xc7   : > { %v915_v52 = vpop.permute.xlu0 %914  ;;  %v917_v53 = vpop.permute.xlu1 %916  ;;  %1869 = vmatprep.subr.bf16.mxu0 %v2239_v18 }
  0xc8   : > { %v920_v55 = vsel %vm918_vm4, %v915_v52, %v917_v53 }
  0xc9   : > { %1861 = vmatprep.subr.bf16.mxu1 %v920_v55  ;;  %1858 = vmatmul.mubr.msk.bf16.vlgmr.msra.gmra.mxu0 %vm674_vm0, %v1987_v51 }
  0xca   : > { %1862 = vmatpush3.bf16.msra.mxu1 %v920_v55  ;;  %1870 = vmatpush3.bf16.msra.mxu0 %v2239_v18 }
  0xcb   : > { %v911_v56 = vpop.permute.xlu0 %910  ;;  %v913_v57 = vpop.permute.xlu1 %912  ;;  %1871 = vmatprep.subr.bf16.mxu0 %v2241_v19  ;;  %1873 = vmatprep.mubr.msk.bf16.mxu0 %vm674_vm0, %v1990_v54 }
  0xcc   : > { %v919_v58 = vsel %vm918_vm4, %v911_v56, %v913_v57 }
  0xcd   : > { %1863 = vmatprep.subr.bf16.mxu1 %v919_v58 }
  0xce   : > { %1864 = vmatpush3.bf16.msra.mxu1 %v919_v58  ;;  %1872 = vmatpush3.bf16.msra.mxu0 %v2241_v19 }
  0xcf   : > { %v1076_v60 = vpop.permute.xlu0 %1075  ;;  %v1078_v62 = vpop.permute.xlu1 %1077 }
  0xd0   : > { %v1081_v1 = vsel %vm1079_vm5, %v1076_v60, %v1078_v62 }
  0xd1   : > { %1866 = vmatmul.mubr.msk.bf16.vlgmr.msra.gmra.mxu1 %vm674_vm0, %v1989_v59  ;;  %1877 = vmatprep.subr.bf16.mxu1 %v1081_v1 }
  0xd2   : > { %1878 = vmatpush3.bf16.msra.mxu1 %v1081_v1  ;;  %1874 = vmatmul.mubr.msk.bf16.vlgmr.msra.gmra.mxu0 %vm674_vm0, %v1991_v61 }
  0xd3   : > { %v1163_v2 = vpop.permute.xlu0 %1162  ;;  %v1165_v3 = vpop.permute.xlu1 %1164  ;;  %1881 = vmatprep.mubr.msk.bf16.mxu1 %vm674_vm0, %v1992_v63  ;;  %1889 = vmatprep.mubr.msk.bf16.mxu0 %vm674_vm0, %v1994_v0 }
  0xd4   : > { %v1168_v4 = vsel %vm1166_vm6, %v1163_v2, %v1165_v3 }
  0xd5   : > { %1885 = vmatprep.subr.bf16.mxu0 %v1168_v4 }
  0xd6   : > { %1886 = vmatpush3.bf16.msra.mxu0 %v1168_v4  ;;  %v1451_v4 = vlaneseq }
  0xd7   : > { %v1072_v5 = vpop.permute.xlu0 %1071  ;;  %v1074_v6 = vpop.permute.xlu1 %1073 }
  0xd8   : > { %v1080_v7 = vsel %vm1079_vm5, %v1072_v5, %v1074_v6 }
  0xd9   : > { %1879 = vmatprep.subr.bf16.mxu1 %v1080_v7 }
  0xda   : > { %1880 = vmatpush3.bf16.msra.mxu1 %v1080_v7  ;;  %v1448_v7 = vld [vmem:[%s593_s15] sm:$0x1] }
  0xdb   : > { %v1159_v9 = vpop.permute.xlu0 %1158  ;;  %v1161_v11 = vpop.permute.xlu1 %1160  ;;  %vm1449_vm9 = vcmp.gt.f32.partialorder %v1448_v7, 0.0 }
  0xdc   : > { %v1167_v12 = vsel %vm1166_vm6, %v1159_v9, %v1161_v11 }
  0xdd   : > { %1882 = vmatmul.mubr.msk.bf16.vlgmr.msra.gmra.mxu1 %vm674_vm0, %v1993_v8  ;;  %1887 = vmatprep.subr.bf16.mxu0 %v1167_v12 }
  0xde   : > { %1888 = vmatpush3.bf16.msra.mxu0 %v1167_v12  ;;  %1897 = vmatprep.mubr.msk.bf16.mxu1 %vm674_vm0, %v1996_v10 }
  0xdf   : > { %v1250_v14 = vpop.permute.xlu0 %1249  ;;  %v1252_v16 = vpop.permute.xlu1 %1251 }
  0xe0   : > { %v1255_v17 = vsel %vm1253_vm7, %v1250_v14, %v1252_v16 }
  0xe1   : > { %1890 = vmatmul.mubr.msk.bf16.vlgmr.msra.gmra.mxu0 %vm674_vm0, %v1995_v13  ;;  %1893 = vmatprep.subr.bf16.mxu1 %v1255_v17 }
  0xe2   : > { %1894 = vmatpush3.bf16.msra.mxu1 %v1255_v17  ;;  %1905 = vmatprep.mubr.msk.bf16.mxu0 %vm674_vm0, %v1998_v15  ;;  %v1452_v15 = vshrl.u32 %v1451_v4, 7 }
  0xe3   : > { %v1337_v18 = vpop.permute.xlu0 %1336  ;;  %v1339_v19 = vpop.permute.xlu1 %1338 }
  0xe4   : > { %v1342_v20 = vsel %vm1340_vm8, %v1337_v18, %v1339_v19 }
  0xe5   : > { %1901 = vmatprep.subr.bf16.mxu0 %v1342_v20 }
  0xe6   : > { %1902 = vmatpush3.bf16.msra.mxu0 %v1342_v20 }
  0xe7   : > { %v1246_v21 = vpop.permute.xlu0 %1245  ;;  %v1248_v22 = vpop.permute.xlu1 %1247 }
  0xe8   : > { %v1254_v23 = vsel %vm1253_vm7, %v1246_v21, %v1248_v22 }
  0xe9   : > { %1895 = vmatprep.subr.bf16.mxu1 %v1254_v23 }
  0xea   : > { %1896 = vmatpush3.bf16.msra.mxu1 %v1254_v23 }
  0xeb   : > { %v1333_v26 = vpop.permute.xlu0 %1332  ;;  %v1335_v27 = vpop.permute.xlu1 %1334 }
  0xec   : > { %v1341_v28 = vsel %vm1340_vm8, %v1333_v26, %v1335_v27 }
  0xed   : > { %1898 = vmatmul.mubr.msk.bf16.vlgmr.msra.gmra.mxu1 %vm674_vm0, %v1997_v25  ;;  %1903 = vmatprep.subr.bf16.mxu0 %v1341_v28 }
  0xee   : > { %1904 = vmatpush3.bf16.msra.mxu0 %v1341_v28 }
  0xf1   : > { %1906 = vmatmul.mubr.msk.bf16.vlgmr.msra.gmra.mxu0 %vm674_vm0, %v1999_v29 }
  0xf8   : > { %v1416_v3 = vpop.permute.xlu1 %1415  ;;  %v1411_v22 = vpop.permute.xlu0 %1410 }
  0xfc   : > { %v1421_v23 = vpop.permute.xlu1 %1420 }
 0x17d   : > { %v1843_v30 = vpop.f32.mrf.mxu0 }
 0x17f   : > { %v715_v31 = vpop.f32.mrf.mxu0 }
 0x181   : > { %v1844_v32 = vpop.f32.mrf.mxu0 }
 0x183   : > { %v718_v33 = vpop.f32.mrf.mxu0 }
 0x185   : > { %v1851_v34 = vpop.f32.mrf.mxu1 }
 0x186   : > { %v802_v49 = vadd.f32 %v1851_v34, %v1843_v30 }
 0x187   : > { %v793_v35 = vpop.f32.mrf.mxu1 }
 0x188   : > { %v794_v51 = vadd.f32 %v793_v35, %v715_v31  ;;  %v1799_v31 = vld [vmem:[%s542_s18 + $0x8] sm:$0xff]  }
 0x189   : > { %v1859_v36 = vpop.f32.mrf.mxu0  ;;  %v1852_v37 = vpop.f32.mrf.mxu1 }
 0x18a   : > { %v893_v53 = vadd.f32 %v1859_v36, %v802_v49  ;;  %v805_v54 = vadd.f32 %v1852_v37, %v1844_v32  ;;  %v1453_v32 = vsub.s32 0, %v1452_v15  ;;  %v1426_v49 = vpop.permute.xlu0 %1425 }
 0x18b   : > { %v876_v38 = vpop.f32.mrf.mxu0  ;;  %v796_v39 = vpop.f32.mrf.mxu1 }
 0x18c   : > { %v891_v57 = vadd.f32 %v876_v38, %v794_v51  ;;  %v797_v58 = vadd.f32 %v796_v39, %v718_v33  ;;  %v1450_v33 = vsel %vm1449_vm9, 1, %v2064_v24  ;;  %v1782_v39 = vld [vmem:[%s542_s18] sm:$0xff]  }
 0x18d   : > { %v1860_v40 = vpop.f32.mrf.mxu0 }
 0x18e   : > { %v894_v59 = vadd.f32 %v1860_v40, %v805_v54 }
 0x18f   : > { %v879_v41 = vpop.f32.mrf.mxu0 }
 0x190   : > { %v892_v0 = vadd.f32 %v879_v41, %v797_v58  ;;  %v1787_v41 = vunpack.c.l.bf16 %v1799_v31 }
 0x191   : > { %v1867_v42 = vpop.f32.mrf.mxu1 }
 0x192   : > { %v1875_v44 = vpop.f32.mrf.mxu0  ;;  %v980_v60 = vadd.f32 %v1867_v42, %v893_v53 }
 0x193   : > { %v963_v43 = vpop.f32.mrf.mxu1 }
 0x194   : > { %v1037_v46 = vpop.f32.mrf.mxu0  ;;  %v978_v63 = vadd.f32 %v963_v43, %v891_v57  ;;  %v1054_v1 = vadd.f32 %v1875_v44, %v980_v60  ;;  %v1784_v57 = vunpack.c.h.bf16 %v1782_v39 }
 0x195   : > { %v1868_v45 = vpop.f32.mrf.mxu1 }
 0x196   : > { %v1876_v48 = vpop.f32.mrf.mxu0  ;;  %v981_v2 = vadd.f32 %v1868_v45, %v894_v59  ;;  %v1052_v8 = vadd.f32 %v1037_v46, %v978_v63 }
 0x197   : > { %v966_v47 = vpop.f32.mrf.mxu1 }
 0x198   : > { %v1040_v52 = vpop.f32.mrf.mxu0  ;;  %v979_v9 = vadd.f32 %v966_v47, %v892_v0  ;;  %v1055_v12 = vadd.f32 %v1876_v48, %v981_v2  ;;  %v1454_v47 = vrot.slane %v1450_v33, %v1453_v32  ;;  %v1783_v48 = vunpack.c.l.bf16 %v1782_v39 }
 0x19a   : > { %v1053_v18 = vadd.f32 %v1040_v52, %v979_v9  ;;  %v1788_v52 = vunpack.c.h.bf16 %v1799_v31  ;;  %vm1455_vm10 = vcmp.eq.s32.totalorder %v1454_v47, 1 }
 0x19d   : > { %v1883_v50 = vpop.f32.mrf.mxu1 }
 0x19e   : > { %v1141_v10 = vadd.f32 %v1883_v50, %v1054_v1 }
 0x19f   : > { %v1124_v55 = vpop.f32.mrf.mxu1 }
 0x1a0   : > { %v1139_v13 = vadd.f32 %v1124_v55, %v1052_v8 }
 0x1a1   : > { %v1891_v56 = vpop.f32.mrf.mxu0  ;;  %v1884_v61 = vpop.f32.mrf.mxu1 }
 0x1a2   : > { %v1228_v14 = vadd.f32 %v1891_v56, %v1141_v10  ;;  %v1142_v19 = vadd.f32 %v1884_v61, %v1055_v12 }
 0x1a3   : > { %v1211_v62 = vpop.f32.mrf.mxu0  ;;  %v1127_v5 = vpop.f32.mrf.mxu1 }
 0x1a4   : > { %v1226_v20 = vadd.f32 %v1211_v62, %v1139_v13  ;;  %v1140_v27 = vadd.f32 %v1127_v5, %v1053_v18 }
 0x1a5   : > { %v1892_v6 = vpop.f32.mrf.mxu0 }
 0x1a6   : > { %v1229_v28 = vadd.f32 %v1892_v6, %v1142_v19 }
 0x1a7   : > { %v1214_v16 = vpop.f32.mrf.mxu0 }
 0x1a8   : > { %v1227_v36 = vadd.f32 %v1214_v16, %v1140_v27 }
 0x1ad   : > { %v1899_v11 = vpop.f32.mrf.mxu1 }
 0x1ae   : > { %v1315_v21 = vadd.f32 %v1899_v11, %v1228_v14 }
 0x1af   : > { %v1298_v17 = vpop.f32.mrf.mxu1 }
 0x1b0   : > { %v1313_v29 = vadd.f32 %v1298_v17, %v1226_v20 }
 0x1b1   : > { %v1900_v25 = vpop.f32.mrf.mxu1  ;;  %v1907_v26 = vpop.f32.mrf.mxu0 }
 0x1b2   : > { %v1402_v30 = vadd.f32 %v1907_v26, %v1315_v21  ;;  %v1316_v37 = vadd.f32 %v1900_v25, %v1229_v28 }
 0x1b3   : > { %v1301_v34 = vpop.f32.mrf.mxu1  ;;  %v1385_v35 = vpop.f32.mrf.mxu0 }
 0x1b4   : > { %v1400_v38 = vadd.f32 %v1385_v35, %v1313_v29  ;;  %v1430_v40 = vadd.f32 %v1421_v23, %v1402_v30  ;;  %v1314_v43 = vadd.f32 %v1301_v34, %v1227_v36 }
 0x1b5   : > { %v1908_v42 = vpop.f32.mrf.mxu0 }
 0x1b6   : > { %v1428_v44 = vadd.f32 %v1411_v22, %v1400_v38  ;;  %v1434_v45 = vmul.f32 0.1, %v1430_v40  ;;  %v1403_v46 = vadd.f32 %v1908_v42, %v1316_v37 }
 0x1b7   : > { %v1388_v50 = vpop.f32.mrf.mxu0 }
 0x1b8   : > { %v1432_v51 = vmul.f32 0.1, %v1428_v44  ;;  %v1431_v24 = vadd.f32 %v1426_v49, %v1403_v46  ;;  %v1401_v53 = vadd.f32 %v1388_v50, %v1314_v43  ;;  %v1446_v54 = vadd.f32 %v1787_v41, %v1434_v45 }
 0x1ba   : > { %v1435_v55 = vmul.f32 0.1, %v1431_v24  ;;  %v1429_v56 = vadd.f32 %v1416_v3, %v1401_v53  ;;  %v1444_v58 = vadd.f32 %v1783_v48, %v1432_v51  ;;  %v1458_v61 = vsel %vm1455_vm10, %v1446_v54, 0.0 }
 0x1bc   : > { %v1447_v59 = vadd.f32 %v1788_v52, %v1435_v55  ;;  %v1433_v60 = vmul.f32 0.1, %v1429_v56  ;;  %v1456_v1 = vsel %vm1455_vm10, %v1444_v58, 0.0 }
 0x1be   : > { %v1459_v62 = vsel %vm1455_vm10, %v1447_v59, 0.0  ;;  %v1445_v63 = vadd.f32 %v1784_v57, %v1433_v60 }
 0x1bf   : > { %v1797_v0 = vpack.c.bf16 %v1459_v62, %v1458_v61  ;;  %1486 = sbr.rel (!%p2194_p12) target bundleno = 460 (0x1cc), region = 216 }
 0x1c0   : > { %v1457_v2 = vsel %vm1455_vm10, %v1445_v63, 0.0 }
 0x1c1   : > { %1800 = vst [vmem:[%s585_s20 + $0x8] sm:$0xff] %v1797_v0   ;;  %v1792_v4 = vpack.c.bf16 %v1457_v2, %v1456_v1 }
 0x1c3   : > { %1793 = vst [vmem:[%s585_s20] sm:$0xff] %v1792_v4  }
 0x1c8   : > { %v1510_v6 = vld [vmem:[%s585_s20 + $0x8] sm:$0xf]  ;;  %v1512_v7 = vld [vmem:[%s585_s20 + $0xc] sm:$0xf] }
 0x1c9   : > { %1773 = vst [vmem:[%s1597_s16 + $0x3c] sm:$0xf] %v1510_v6  ;;  %1774 = vst [vmem:[%s1597_s16 + $0x58] sm:$0xf] %v1512_v7 }
 0x1ca   : > { %v1506_v3 = vld [vmem:[%s585_s20] sm:$0xf]  ;;  %v1508_v5 = vld [vmem:[%s585_s20 + $0x4] sm:$0xf] }
 0x1cb   : > { %1771 = vst [vmem:[%s1597_s16 + $0x4] sm:$0xf] %v1506_v3  ;;  %1772 = vst [vmem:[%s1597_s16 + $0x20] sm:$0xf] %v1508_v5 }
 0x1cc PF: > { %s2420_s30 = sld [smem:[#allocation7_spill]]  ;;  %s2423_s24 = smov %s2034_s25 }
 0x1cd   : > { %s2421_s22 = sld [smem:[#allocation9_spill]]  ;;  %s2424_s25 = smov %s2201_s10 }
 0x1ce   : > { %s2422_s19 = sld [smem:[#allocation8_spill]]  ;;  %s2425_s26 = smov %s2042_s27 }
 0x1cf   : > { %s2427_s28 = smov %s2050_s29 }
 0x1d2   : > { %p14_p5 = scmp.ge.s32.totalorder %s2420_s30, 8  }
 0x1d3   : > { %s2426_s27 = smov %s2421_s22 }
 0x1d4   : > { %s2428_s29 = smov %s2422_s19  ;;  %16 = sbr.rel (!%p14_p5) target bundleno = 4 (0x4), region = 323 }

// kernel: group_unit_pallas.11
= control target key start
LH: loop header
LB: loop body
LE: loop exit
PB: predicated region body
PF: predicated region fallthrough
CT: control target
= control target key end

     0   :  { %s1194_s27 = smov 0   ;;  %s1196_s28 = smov 0   ;;  %s1340_s0 = inlined_call_operand.vmem [shape: bf16[32,896], index: 0, kind: input, shape index: {}]   ;;  %s1341_s1 = inlined_call_operand.vmem [shape: f32[1,896], index: 1, kind: input, shape index: {}]   ;;  %s1342_s2 = inlined_call_operand.vmem [shape: f32[896,2], index: 2, kind: input, shape index: {}]   ;;  %s1343_s3 = inlined_call_operand.vmem [shape: bf16[32,32], index: 3, kind: input, shape index: {}]   ;;  %s1344_s4 = inlined_call_operand.vmem [shape: f32[32,1], index: 4, kind: input, shape index: {}]   ;;  %s1345_s5 = inlined_call_operand.vmem [shape: bf16[32,32], index: 5, kind: input, shape index: {}]   ;;  %s1346_s6 = inlined_call_operand.vmem [shape: f32[32,1], index: 6, kind: input, shape index: {}]   ;;  %s1347_s7 = inlined_call_operand.vmem [shape: bf16[32,896], index: 7, kind: output, shape index: {0}]   ;;  %s1348_s8 = inlined_call_operand.vmem [shape: f32[6,32,2], index: 8, kind: output, shape index: {1}]  }
   0x1   :  { %s1198_s29 = smov 0  }
   0x2 LB: > { %s1210_s30 = sadd.s32 4294967295, %s1146_s29   ;;  %s1213_s9 = sadd.s32 1, %s1146_s29   ;;  %s1146_s29 = sphi %s1198_s29, %s1352_s29   ;;  %s1142_s28 = sphi %s1196_s28, %s1351_s28   ;;  %s1138_s27 = sphi %s1194_s27, %s1350_s27  }
   0x3   : > { %s24_s10 = sadd.s32 1, %s1213_s9  ;;  %s28_s11 = sadd.s32 1, %s1142_s28 }
   0x4   : > { %s25_s12 = ssub.s32 %s1213_s9, %s24_s10  ;;  %p35_p0 = scmp.ne.s32.totalorder %s1142_s28, %s1138_s27 }
   0x5   : > { %p26_p1 = scmp.eq.s32.totalorder %s25_s12, 0  ;;  %p36_p2 = scmp.eq.s32.totalorder %s1146_s29, 0 }
   0x6   : > { %p207_p3 = scmp.eq.s32.totalorder %s1210_s30, 5  ;;  %p951_p6 = scmp.ge.s32.totalorder %s1146_s29, 6 }
   0x7   : > { %s1223_s13 = scalar_select %p26_p1, %s1142_s28, %s28_s11  }
   0x8   : > { %p37_p4 = por %p36_p2, %p35_p0  ;;  %p1225_p5 = por %p207_p3, %p35_p0 }
   0x9   : > { %267 = sbr.rel (%p951_p6) target bundleno = 20 (0x14), region = 32 }
   0xe   : > { %270 = sbr.rel (!%p37_p4) target bundleno = 20 (0x14), region = 36  ;;  %s272_s15 = sand.u32 (%p37_p4), 1, %s1142_s28  }
   0xf   : > { %s953_s16 = sshll.u32 (%p37_p4), %s1146_s29, 2  ;;  %s952_s17 = sshll.u32 (%p37_p4), %s272_s15, 4 }
  0x10   : > { %s867_s20 = scalar_lea.vmem (%p37_p4), %s1340_s0, %s953_s16  ;;  %s274_s21 = scalar_lea.vmem (%p37_p4), [#allocation2], %s952_s17 }
  0x11   : > { %v954_v0 = vld [vmem:[%s867_s20 + $0x4] sm:$0xf] (%p37_p4)  ;;  %v955_v1 = vld [vmem:[%s867_s20 + $0x20] sm:$0xf] (%p37_p4)  ;;  %v956_v2 = vld [vmem:[%s867_s20 + $0x3c] sm:$0xf] (%p37_p4) }
  0x12   : > { %295 = vst [vmem:[%s274_s21] sm:$0xf] (%p37_p4), %v954_v0  ;;  %297 = vst [vmem:[%s274_s21 + $0x4] sm:$0xf] (%p37_p4), %v955_v1  ;;  %v957_v3 = vld [vmem:[%s867_s20 + $0x58] sm:$0xf] (%p37_p4) }
  0x13   : > { %299 = vst [vmem:[%s274_s21 + $0x8] sm:$0xf] %v956_v2  ;;  %301 = vst [vmem:[%s274_s21 + $0xc] sm:$0xf] %v957_v3 }
  0x14 PF: > { %p958_p7 = scmp.ge.s32.totalorder %s1146_s29, 1  ;;  %p351_p8 = scmp.lt.s32.totalorder %s1146_s29, 7 }
  0x16   : > { %p352_p9 = pnand %p958_p7, %p351_p8 }
  0x17   : > { %s358_s22 = sand.u32 (!%p352_p9), 1, %s1138_s27   ;;  %s991_s12 = sshll.u32 (!%p352_p9), %s1210_s30, 4 }
  0x18   : > { %355 = sbr.rel (%p352_p9) target bundleno = 652 (0x28c), region = 85  ;;  %s1241_s25 = sshll.u32 (!%p352_p9), %s358_s22, 4 }
  0x19   : > { %s360_s11 = scalar_lea.vmem (!%p352_p9), [#allocation2], %s1241_s25  ;;  %s992_s15 = sadd.s32 (!%p352_p9), 16, %s991_s12 }
  0x1a   : > { %p413_p10 = scmp.lt.s32.totalorder (!%p352_p9), %s992_s15, 111  ;;  %s406_s22 = sadd.s32 (!%p352_p9), 1, %s1210_s30 }
  0x1b   : > { %p407_p11 = scmp.lt.s32.totalorder (!%p352_p9), %s406_s22, 6  ;;  %s397_s10 = scalar_lea.vmem (!%p352_p9), [#allocation3], %s1241_s25 }
  0x1c   : > { %p420_p12 = scmp.lt.s32.totalorder (!%p352_p9), %s1210_s30, 5 }
  0x1d   : > { %v1120_v4 = vld [vmem:[%s1343_s3] sm:$0xff]   ;;  %vm480_vm0 = vcmask 261120   ;;  %v436_v5 = vld [vmem:[%s1344_s4 + $0x10] sm:$0xff]  ;;  %v1118_v6 = vld [vmem:[%s360_s11 + $0x8] sm:$0xff]   ;;  %v1148_v7 = vmov 0   ;;  %s1354_s15 = smov (!%p413_p10, %s992_s15), 111  ;;  %v638_v53 = vlaneseq }
  0x1e   : > { %1041 = vmatprep.mubr.msk.bf16.mxu1 %vm480_vm0, %v1120_v4  ;;  %1116 = vset.pattern.permute.xlu0 %v1148_v7  ;;  %v1119_v8 = vld [vmem:[%s360_s11] sm:$0xff]   ;;  %v437_v9 = vld [vmem:[%s1344_s4 + $0x18] sm:$0xff]  ;;  %v435_v11 = vld [vmem:[%s1344_s4 + $0x8] sm:$0xff]  ;;  %s962_s16 = sshll.u32 %s1354_s15, 3  ;;  %s1356_s22 = smov (!%p407_p11, %s406_s22), 6  ;;  %vm768_vm3 = vcmask 15360  }
  0x1f   : > { %1117 = vset.pattern.permute.xlu1 %v1148_v7  ;;  %450 = vperm.xlu0 %1116, %v436_v5   ;;  %v434_v10 = vld [vmem:[%s1344_s4] sm:$0xff]  ;;  %v1121_v12 = vld [vmem:[%s1343_s3 + $0x8] sm:$0xff]   ;;  %v548_v15 = vld [vmem:[%s1346_s6 + $0x10] sm:$0xff]  ;;  %s1283_s19 = scalar_lea.vmem %s1342_s2, %s962_s16  ;;  %s409_s26 = scalar_lea.vmem %s1341_s1, %s1356_s22  ;;  %v639_v55 = vshrl.u32 %v638_v53, 7 }
  0x20   : > { %1037 = vmatprep.subr.bf16.mxu1 %v1118_v6  ;;  %440 = vperm.xlu1 %1117, %v434_v10   ;;  %v546_v13 = vld [vmem:[%s1346_s6] sm:$0xff]  ;;  %v547_v14 = vld [vmem:[%s1346_s6 + $0x8] sm:$0xff]  ;;  %v549_v16 = vld [vmem:[%s1346_s6 + $0x18] sm:$0xff]  ;;  %s421_s11 = scalar_select %p420_p12, %s1210_s30, 5 }
  0x21   : > { %1038 = vmatpush3.bf16.msra.mxu1 %v1118_v6  ;;  %v1122_v17 = vld [vmem:[%s1345_s5] sm:$0xff]   ;;  %v682_v18 = vld [vmem:[%s1283_s19 + $0x78] sm:$0xff]  ;;  %v681_v19 = vld [vmem:[%s1283_s19 + $0x70] sm:$0xff]  ;;  %v640_v56 = vsub.s32 0, %v639_v55  ;;  %s984_s25 = sshll.u32 (%p1225_p5), %s1210_s30, 2 }
  0x22   : > { %1039 = vmatprep.subr.bf16.mxu1 %v1119_v8  ;;  %1053 = vmatprep.subr.mxu0 %v682_v18  ;;  %v680_v20 = vld [vmem:[%s1283_s19 + $0x68] sm:$0xff]  ;;  %v679_v21 = vld [vmem:[%s1283_s19 + $0x60] sm:$0xff]  ;;  %v678_v22 = vld [vmem:[%s1283_s19 + $0x58] sm:$0xff]  ;;  %s993_s27 = sshll.u32 %s421_s11, 5  ;;  %s893_s18 = scalar_lea.vmem (%p1225_p5), %s1347_s7, %s984_s25 }
  0x23   : > { %455 = vperm.xlu0 %1116, %v437_v9   ;;  %1054 = vmatpush3.msra.mxu0 %v682_v18  ;;  %v677_v23 = vld [vmem:[%s1283_s19 + $0x50] sm:$0xff]  ;;  %v676_v24 = vld [vmem:[%s1283_s19 + $0x48] sm:$0xff]  ;;  %v675_v25 = vld [vmem:[%s1283_s19 + $0x40] sm:$0xff]  ;;  %s424_s15 = scalar_lea.vmem %s1348_s8, %s993_s27 }
  0x24   : > { %445 = vperm.xlu1 %1117, %v435_v11   ;;  %1055 = vmatprep.subr.mxu0 %v681_v19  ;;  %v674_v26 = vld [vmem:[%s1283_s19 + $0x38] sm:$0xff]  ;;  %v673_v27 = vld [vmem:[%s1283_s19 + $0x30] sm:$0xff]  ;;  %v672_v28 = vld [vmem:[%s1283_s19 + $0x28] sm:$0xff] }
  0x25   : > { %1040 = vmatpush3.bf16.msra.mxu1 %v1119_v8  ;;  %1056 = vmatpush3.msra.mxu0 %v681_v19  ;;  %v671_v29 = vld [vmem:[%s1283_s19 + $0x20] sm:$0xff]  ;;  %v1123_v48 = vld [vmem:[%s1345_s5 + $0x8] sm:$0xff]   ;;  %v670_v49 = vld [vmem:[%s1283_s19 + $0x18] sm:$0xff] }
  0x26   : > { %1057 = vmatprep.subr.mxu0 %v680_v20  ;;  %v669_v50 = vld [vmem:[%s1283_s19 + $0x10] sm:$0xff]  ;;  %v668_v51 = vld [vmem:[%s1283_s19 + $0x8] sm:$0xff]  ;;  %v667_v52 = vld [vmem:[%s1283_s19] sm:$0xff] }
  0x27   : > { %552 = vperm.xlu0 %1116, %v546_v13   ;;  %1058 = vmatpush3.msra.mxu0 %v680_v20  ;;  %v635_v54 = vld [vmem:[%s409_s26] sm:$0x1] }
  0x28   : > { %1042 = vmatmul.mubr.msk.bf16.vlgmr.msra.gmra.mxu1 %vm480_vm0, %v1121_v12  ;;  %557 = vperm.xlu1 %1117, %v547_v14   ;;  %vm636_vm1 = vcmp.gt.f32.partialorder %v635_v54, 0.0 }
  0x29   : > { %1049 = vmatprep.mubr.msk.bf16.mxu1 %vm480_vm0, %v1122_v17  ;;  %1059 = vmatprep.subr.mxu0 %v679_v21  ;;  %v637_v58 = vsel %vm636_vm1, 1, %v1148_v7 }
  0x2a   : > { %1060 = vmatpush3.msra.mxu0 %v679_v21  ;;  %v641_v60 = vrot.slane %v637_v58, %v640_v56 }
  0x2b   : > { %562 = vperm.xlu0 %1116, %v548_v15   ;;  %1061 = vmatprep.subr.mxu0 %v678_v22 }
  0x2c   : > { %567 = vperm.xlu1 %1117, %v549_v16   ;;  %1062 = vmatpush3.msra.mxu0 %v678_v22  ;;  %vm642_vm2 = vcmp.eq.s32.totalorder %v641_v60, 1 }
  0x2d   : > { %1063 = vmatprep.subr.mxu0 %v677_v23 }
  0x2e   : > { %1064 = vmatpush3.msra.mxu0 %v677_v23 }
  0x2f   : > { %1065 = vmatprep.subr.mxu0 %v676_v24 }
  0x30   : > { %1066 = vmatpush3.msra.mxu0 %v676_v24 }
  0x31   : > { %1067 = vmatprep.subr.mxu0 %v675_v25 }
  0x32   : > { %1068 = vmatpush3.msra.mxu0 %v675_v25 }
  0x33   : > { %1069 = vmatprep.subr.mxu0 %v674_v26 }
  0x34   : > { %1070 = vmatpush3.msra.mxu0 %v674_v26 }
  0x35   : > { %1071 = vmatprep.subr.mxu0 %v673_v27 }
  0x36   : > { %1072 = vmatpush3.msra.mxu0 %v673_v27 }
  0x37   : > { %1073 = vmatprep.subr.mxu0 %v672_v28 }
  0x38   : > { %1074 = vmatpush3.msra.mxu0 %v672_v28 }
  0x39   : > { %1075 = vmatprep.subr.mxu0 %v671_v29 }
  0x3a   : > { %1076 = vmatpush3.msra.mxu0 %v671_v29 }
  0x3b   : > { %1077 = vmatprep.subr.mxu0 %v670_v49 }
  0x3c   : > { %1078 = vmatpush3.msra.mxu0 %v670_v49 }
  0x3d   : > { %1079 = vmatprep.subr.mxu0 %v669_v50 }
  0x3e   : > { %1080 = vmatpush3.msra.mxu0 %v669_v50 }
  0x3f   : > { %1081 = vmatprep.subr.mxu0 %v668_v51 }
  0x40   : > { %1082 = vmatpush3.msra.mxu0 %v668_v51 }
  0x41   : > { %1083 = vmatprep.subr.mxu0 %v667_v52 }
  0x42   : > { %1084 = vmatpush3.msra.mxu0 %v667_v52 }
  0x9a   : > { %v451_v30 = vpop.permute.xlu0 %450 }
  0x9b   : > { %v441_v31 = vpop.permute.xlu1 %440 }
  0x9e   : > { %v456_v35 = vpop.permute.xlu0 %455 }
  0x9f   : > { %v446_v39 = vpop.permute.xlu1 %445 }
  0xa2   : > { %v553_v57 = vpop.permute.xlu0 %552 }
  0xa3   : > { %v558_v59 = vpop.permute.xlu1 %557 }
  0xa6   : > { %v563_v62 = vpop.permute.xlu0 %562 }
  0xa7   : > { %v568_v2 = vpop.permute.xlu1 %567 }
  0xe8   : > { %v1043_v32 = vpop.f32.mrf.mxu1 }
  0xe9   : > { %v530_v34 = vadd.f32 %v1043_v32, %v451_v30 }
  0xea   : > { %v521_v33 = vpop.f32.mrf.mxu1 }
  0xeb   : > { %v522_v37 = vadd.f32 %v521_v33, %v441_v31  ;;  %v538_v41 = vmax.f32 %v530_v34, 0.0 }
  0xec   : > { %v1044_v36 = vpop.f32.mrf.mxu1 }
  0xed   : > { %v533_v38 = vadd.f32 %v1044_v36, %v456_v35  ;;  %v536_v44 = vmax.f32 %v522_v37, 0.0 }
  0xee   : > { %v524_v40 = vpop.f32.mrf.mxu1 }
  0xef   : > { %v539_v42 = vmax.f32 %v533_v38, 0.0  ;;  %v525_v43 = vadd.f32 %v524_v40, %v446_v39 }
  0xf1   : > { %v545_v45 = vpack.c.bf16 %v539_v42, %v538_v41  ;;  %v537_v46 = vmax.f32 %v525_v43, 0.0 }
  0xf3   : > { %v544_v47 = vpack.c.bf16 %v537_v46, %v536_v44  ;;  %1045 = vmatprep.subr.bf16.mxu1 %v545_v45 }
  0xf4   : > { %1046 = vmatpush3.bf16.msra.mxu1 %v545_v45 }
  0xf5   : > { %1047 = vmatprep.subr.bf16.mxu1 %v544_v47 }
  0xf8   : > { %1048 = vmatpush3.bf16.msra.mxu1 %v544_v47 }
  0xfb   : > { %1050 = vmatmul.mubr.msk.bf16.vlgmr.msra.gmra.mxu1 %vm480_vm0, %v1123_v48 }
 0x1bb   : > { %v1051_v61 = vpop.f32.mrf.mxu1 }
 0x1bc   : > { %v629_v0 = vadd.f32 %v1051_v61, %v563_v62 }
 0x1bd   : > { %v620_v63 = vpop.f32.mrf.mxu1 }
 0x1be   : > { %v621_v1 = vadd.f32 %v620_v63, %v553_v57  ;;  %v645_v6 = vsel %vm642_vm2, %v629_v0, 0.0 }
 0x1bf   : > { %v1052_v3 = vpop.f32.mrf.mxu1 }
 0x1c0   : > { %v632_v4 = vadd.f32 %v1052_v3, %v568_v2  ;;  %1085 = vmatprep.mubr.msk.f32.mxu0 %vm642_vm2, %v621_v1  ;;  %v643_v10 = vsel %vm642_vm2, %v621_v1, 0.0 }
 0x1c1   : > { %v623_v5 = vpop.f32.mrf.mxu1 }
 0x1c2   : > { %v646_v7 = vsel %vm642_vm2, %v632_v4, 0.0  ;;  %v624_v8 = vadd.f32 %v623_v5, %v558_v59 }
 0x1c3   : > { %v1006_v9 = vpack.c.bf16 %v646_v7, %v645_v6 }
 0x1c4   : > { %v644_v11 = vsel %vm642_vm2, %v624_v8, 0.0  ;;  %1086 = vmatmul.mubr.msk.f32.vlgmr.msra.gmra.mxu0 %vm642_vm2, %v624_v8 }
 0x1c5   : > { %1008 = vst [vmem:[%s397_s10 + $0x8] sm:$0xff] %v1006_v9   ;;  %v1001_v12 = vpack.c.bf16 %v644_v11, %v643_v10  ;;  %1088 = vmatprep.mubr.msk.f32.mxu0 %vm642_vm2, %v629_v0 }
 0x1c7   : > { %1002 = vst [vmem:[%s397_s10] sm:$0xff] %v1001_v12  }
 0x1c8   : > { %1089 = vmatmul.mubr.msk.f32.gmra.mxu0 %vm642_vm2, %v632_v4 }
 0x1cc   : > { %v808_v19 = vld [vmem:[%s397_s10 + $0x8] sm:$0xf] (%p1225_p5)  ;;  %v810_v20 = vld [vmem:[%s397_s10 + $0xc] sm:$0xf] (%p1225_p5) }
 0x1cd   : > { %987 = vst [vmem:[%s893_s18 + $0x3c] sm:$0xf] (%p1225_p5), %v808_v19  ;;  %988 = vst [vmem:[%s893_s18 + $0x58] sm:$0xf] (%p1225_p5), %v810_v20 }
 0x1ce   : > { %v804_v17 = vld [vmem:[%s397_s10] sm:$0xf] (%p1225_p5)  ;;  %v806_v18 = vld [vmem:[%s397_s10 + $0x4] sm:$0xf] (%p1225_p5) }
 0x1cf   : > { %985 = vst [vmem:[%s893_s18 + $0x4] sm:$0xf] (%p1225_p5), %v804_v17  ;;  %986 = vst [vmem:[%s893_s18 + $0x20] sm:$0xf] (%p1225_p5), %v806_v18 }
 0x284   : > { %v1087_v13 = vpop.f32.mrf.mxu0 }
 0x285   : > { %770 = vst.msk [vmem:[%s424_s15 + $0x8] sm:$0xff] %vm768_vm3, %v1087_v13 }
 0x286   : > { %v749_v14 = vpop.f32.mrf.mxu0 }
 0x287   : > { %769 = vst.msk [vmem:[%s424_s15] sm:$0xff] %vm768_vm3, %v749_v14  ;;  %784 = sbr.rel (!%p1225_p5) target bundleno = 652 (0x28c), region = 93 }
 0x288   : > { %v1090_v15 = vpop.f32.mrf.mxu0 }
 0x289   : > { %772 = vst.msk [vmem:[%s424_s15 + $0x18] sm:$0xff] %vm768_vm3, %v1090_v15 }
 0x28a   : > { %v759_v16 = vpop.f32.mrf.mxu0 }
 0x28b   : > { %771 = vst.msk [vmem:[%s424_s15 + $0x10] sm:$0xff] %vm768_vm3, %v759_v16 }
 0x28c PF: > { %p16_p13 = scmp.ge.s32.totalorder %s1213_s9, 8   ;;  %s1350_s27 = smov %s1142_s28 }
 0x28d   : > { %s1351_s28 = smov %s1223_s13  ;;  %s1352_s29 = smov %s1213_s9 }
 0x28e   :  { %18 = sbr.rel (!%p16_p13) target bundleno = 2 (0x2), region = 183 }

// kernel: group_unit_pallas.15
= control target key start
LH: loop header
LB: loop body
LE: loop exit
PB: predicated region body
PF: predicated region fallthrough
CT: control target
= control target key end

     0   :  { %s1984_s30 = smov 0   ;;  %s1986_s10 = smov 0   ;;  %s2264_s0 = inlined_call_operand.vmem [shape: bf16[32,896], index: 0, kind: input, shape index: {}, may-alias: {0,1,2}]   ;;  %s2265_s1 = inlined_call_operand.vmem [shape: bf16[32,896], index: 1, kind: input, shape index: {}, may-alias: {0,1,2}]   ;;  %s2266_s2 = inlined_call_operand.vmem [shape: bf16[32,896], index: 2, kind: input, shape index: {}, may-alias: {0,1,2}]   ;;  %s2267_s3 = inlined_call_operand.vmem [shape: bf16[32,896], index: 3, kind: input, shape index: {}, may-alias: {3,4,5}]   ;;  %s2268_s4 = inlined_call_operand.vmem [shape: bf16[32,896], index: 4, kind: input, shape index: {}, may-alias: {3,4,5}]   ;;  %s2269_s5 = inlined_call_operand.vmem [shape: bf16[32,896], index: 5, kind: input, shape index: {}, may-alias: {3,4,5}]   ;;  %s2270_s6 = inlined_call_operand.vmem [shape: f32[1,896], index: 6, kind: input, shape index: {}]   ;;  %s2271_s7 = inlined_call_operand.vmem [shape: bf16[9,8,32], index: 7, kind: input, shape index: {}]   ;;  %s2272_s8 = inlined_call_operand.vmem [shape: f32[8,1], index: 8, kind: input, shape index: {}]   ;;  %s2273_s9 = inlined_call_operand.vmem [shape: bf16[8,896], index: 9, kind: output, shape index: {}]  }
   0x1   :  { %s1988_s11 = smov 0   ;;  %s1990_s12 = smov 0  }
   0x2   :  { %s1992_s13 = smov 0   ;;  %s1994_s14 = smov 0  }
   0x3   :  { %s1996_s15 = smov 0  }
   0x4 LB: > { %s2021_s17 = sadd.s32 1, %s1921_s15   ;;  %s26_s19 = sadd.s32 1, %s1917_s14  ;;  %s1921_s15 = sphi %s1996_s15, %s2283_s15   ;;  %s1917_s14 = sphi %s1994_s14, %s2291_s14   ;;  %s1913_s13 = sphi %s1992_s13, %s2290_s13   ;;  %s1909_s12 = sphi %s1990_s12, %s2289_s12   ;;  %s1905_s11 = sphi %s1988_s11, %s2288_s11   ;;  %s1901_s10 = sphi %s1986_s10, %s2287_s10   ;;  %s1897_s30 = sphi %s1984_s30, %s2286_s30  }
   0x5   : > { %2276 = sst [smem:[#allocation8_spill]] %s2021_s17  ;;  %s23_s18 = ssub.s32 %s1921_s15, %s2021_s17 }
   0x6   : > { %p24_p0 = scmp.eq.s32.totalorder %s23_s18, 0  ;;  %p33_p1 = scmp.ne.s32.totalorder %s1917_s14, %s1913_s13 }
   0x7   : > { %p34_p2 = scmp.eq.s32.totalorder %s1921_s15, 0  ;;  %s50_s20 = sadd.s32 1, %s2021_s17 }
   0x8   : > { %s2031_s21 = scalar_select %p24_p0, %s1917_s14, %s26_s19  }
   0x9   : > { %p2035_p3 = por %p34_p2, %p33_p1  ;;  %s51_s23 = ssub.s32 %s2021_s17, %s50_s20 }
   0xa   : > { %2277 = sst [smem:[#allocation9_spill]] %s2031_s21  ;;  %p52_p4 = scmp.eq.s32.totalorder %s51_s23, 0 }
   0xb   : > { %s54_s24 = sadd.s32 1, %s1909_s12  ;;  %p61_p5 = scmp.ne.s32.totalorder %s1909_s12, %s1905_s11 }
   0xc   : > { %s77_s25 = sadd.s32 2, %s1921_s15  ;;  %s80_s28 = sadd.s32 2, %s2021_s17 }
   0xd   : > { %s2045_s26 = scalar_select %p52_p4, %s1909_s12, %s54_s24  }
   0xe   : > { %p2049_p6 = por %p61_p5, %p34_p2  ;;  %p78_p7 = scmp.lt.s32.totalorder %s77_s25, 6 }
   0xf   : > { %2279 = sst [smem:[#allocation10_spill]] %s2045_s26  ;;  %p81_p8 = scmp.lt.s32.totalorder %s80_s28, 6 }
  0x10   : > { %s2293_s25 = smov (!%p78_p7, %s77_s25), 6  ;;  %p93_p9 = scmp.ne.s32.totalorder %s1901_s10, %s1897_s30 }
  0x11   : > { %s2295_s28 = smov (!%p81_p8, %s80_s28), 6  ;;  %s86_s19 = sadd.s32 1, %s1901_s10 }
  0x12   : > { %p2060_p10 = por %p93_p9, %p34_p2  ;;  %s83_s18 = ssub.s32 %s2293_s25, %s2295_s28 }
  0x13   : > { %p84_p11 = scmp.eq.s32.totalorder %s83_s18, 0  ;;  %p1628_p12 = scmp.ge.s32.totalorder %s1921_s15, 6 }
  0x15   : > { %s2067_s20 = scalar_select %p84_p11, %s1901_s10, %s86_s19  }
  0x16   : > { %309 = sbr.rel (%p1628_p12) target bundleno = 63 (0x3f), region = 24 }
  0x1b   : > { %312 = sbr.rel (!%p2035_p3) target bundleno = 33 (0x21), region = 28  ;;  %s314_s23 = sand.u32 (%p2035_p3), 1, %s1917_s14  }
  0x1c   : > { %s1630_s24 = sshll.u32 (%p2035_p3), %s1921_s15, 2  ;;  %s1629_s16 = sshll.u32 (%p2035_p3), %s314_s23, 4 }
  0x1d   : > { %s318_s17 = scalar_lea.vmem (%p2035_p3), %s2264_s0, %s1630_s24  ;;  %s316_s28 = scalar_lea.vmem (%p2035_p3), [#allocation2], %s1629_s16 }
  0x1e   : > { %v335_v0 = vld [vmem:[%s318_s17] sm:$0xf] (%p2035_p3)  ;;  %v337_v1 = vld [vmem:[%s318_s17 + $0x1c] sm:$0xf] (%p2035_p3)  ;;  %v339_v2 = vld [vmem:[%s318_s17 + $0x38] sm:$0xf] (%p2035_p3) }
  0x1f   : > { %336 = vst [vmem:[%s316_s28] sm:$0xf] (%p2035_p3), %v335_v0  ;;  %338 = vst [vmem:[%s316_s28 + $0x4] sm:$0xf] (%p2035_p3), %v337_v1  ;;  %v341_v3 = vld [vmem:[%s318_s17 + $0x54] sm:$0xf] (%p2035_p3) }
  0x20   : > { %340 = vst [vmem:[%s316_s28 + $0x8] sm:$0xf] %v339_v2  ;;  %342 = vst [vmem:[%s316_s28 + $0xc] sm:$0xf] %v341_v3 }
  0x21 PF: > { %374 = sbr.rel (!%p2049_p6) target bundleno = 39 (0x27), region = 69  ;;  %s376_s18 = sand.u32 (%p2049_p6), 1, %s1909_s12  }
  0x22   : > { %s1632_s19 = sshll.u32 (%p2049_p6), %s1921_s15, 2  ;;  %s1631_s23 = sshll.u32 (%p2049_p6), %s376_s18, 4 }
  0x23   : > { %s1491_s24 = scalar_lea.vmem (%p2049_p6), %s2265_s1, %s1632_s19  ;;  %s378_s16 = scalar_lea.vmem (%p2049_p6), [#allocation3], %s1631_s23 }
  0x24   : > { %v1633_v4 = vld [vmem:[%s1491_s24 + $0x4] sm:$0xf] (%p2049_p6)  ;;  %v1634_v5 = vld [vmem:[%s1491_s24 + $0x20] sm:$0xf] (%p2049_p6)  ;;  %v1635_v6 = vld [vmem:[%s1491_s24 + $0x3c] sm:$0xf] (%p2049_p6) }
  0x25   : > { %399 = vst [vmem:[%s378_s16] sm:$0xf] (%p2049_p6), %v1633_v4  ;;  %401 = vst [vmem:[%s378_s16 + $0x4] sm:$0xf] (%p2049_p6), %v1634_v5  ;;  %v1636_v7 = vld [vmem:[%s1491_s24 + $0x58] sm:$0xf] (%p2049_p6) }
  0x26   : > { %403 = vst [vmem:[%s378_s16 + $0x8] sm:$0xf] %v1635_v6  ;;  %405 = vst [vmem:[%s378_s16 + $0xc] sm:$0xf] %v1636_v7 }
  0x27 PF: > { %437 = sbr.rel (!%p2060_p10) target bundleno = 45 (0x2d), region = 110  ;;  %s439_s17 = sand.u32 (%p2060_p10), 1, %s1901_s10  }
  0x28   : > { %s1638_s28 = sshll.u32 (%p2060_p10), %s2293_s25, 2  ;;  %s1637_s18 = sshll.u32 (%p2060_p10), %s439_s17, 4 }
  0x29   : > { %s446_s26 = scalar_lea.vmem (%p2060_p10), %s2266_s2, %s1638_s28  ;;  %s441_s23 = scalar_lea.vmem (%p2060_p10), [#allocation4], %s1637_s18 }
  0x2a   : > { %v463_v8 = vld [vmem:[%s446_s26] sm:$0xf] (%p2060_p10)  ;;  %v465_v9 = vld [vmem:[%s446_s26 + $0x1c] sm:$0xf] (%p2060_p10)  ;;  %v467_v10 = vld [vmem:[%s446_s26 + $0x38] sm:$0xf] (%p2060_p10) }
  0x2b   : > { %464 = vst [vmem:[%s441_s23] sm:$0xf] (%p2060_p10), %v463_v8  ;;  %466 = vst [vmem:[%s441_s23 + $0x4] sm:$0xf] (%p2060_p10), %v465_v9  ;;  %v469_v11 = vld [vmem:[%s446_s26 + $0x54] sm:$0xf] (%p2060_p10) }
  0x2c   : > { %468 = vst [vmem:[%s441_s23 + $0x8] sm:$0xf] %v467_v10  ;;  %470 = vst [vmem:[%s441_s23 + $0xc] sm:$0xf] %v469_v11 }
  0x2d PF: > { %502 = sbr.rel (!%p2035_p3) target bundleno = 51 (0x33), region = 151  ;;  %s504_s24 = sand.u32 (%p2035_p3), 1, %s1917_s14  }
  0x2e   : > { %s1640_s16 = sshll.u32 (%p2035_p3), %s1921_s15, 2  ;;  %s1639_s17 = sshll.u32 (%p2035_p3), %s504_s24, 4 }
  0x2f   : > { %s508_s19 = scalar_lea.vmem (%p2035_p3), %s2267_s3, %s1640_s16  ;;  %s506_s18 = scalar_lea.vmem (%p2035_p3), [#allocation5], %s1639_s17 }
  0x30   : > { %v525_v12 = vld [vmem:[%s508_s19] sm:$0xf] (%p2035_p3)  ;;  %v527_v13 = vld [vmem:[%s508_s19 + $0x1c] sm:$0xf] (%p2035_p3)  ;;  %v529_v14 = vld [vmem:[%s508_s19 + $0x38] sm:$0xf] (%p2035_p3) }
  0x31   : > { %526 = vst [vmem:[%s506_s18] sm:$0xf] (%p2035_p3), %v525_v12  ;;  %528 = vst [vmem:[%s506_s18 + $0x4] sm:$0xf] (%p2035_p3), %v527_v13  ;;  %v531_v15 = vld [vmem:[%s508_s19 + $0x54] sm:$0xf] (%p2035_p3) }
  0x32   : > { %530 = vst [vmem:[%s506_s18 + $0x8] sm:$0xf] %v529_v14  ;;  %532 = vst [vmem:[%s506_s18 + $0xc] sm:$0xf] %v531_v15 }
  0x33 PF: > { %564 = sbr.rel (!%p2049_p6) target bundleno = 57 (0x39), region = 192  ;;  %s566_s22 = sand.u32 (%p2049_p6), 1, %s1909_s12  }
  0x34   : > { %s1642_s26 = sshll.u32 (%p2049_p6), %s1921_s15, 2  ;;  %s1641_s23 = sshll.u32 (%p2049_p6), %s566_s22, 4 }
  0x35   : > { %s1504_s21 = scalar_lea.vmem (%p2049_p6), %s2268_s4, %s1642_s26  ;;  %s568_s17 = scalar_lea.vmem (%p2049_p6), [#allocation6], %s1641_s23 }
  0x36   : > { %v1643_v16 = vld [vmem:[%s1504_s21 + $0x4] sm:$0xf] (%p2049_p6)  ;;  %v1644_v17 = vld [vmem:[%s1504_s21 + $0x20] sm:$0xf] (%p2049_p6)  ;;  %v1645_v18 = vld [vmem:[%s1504_s21 + $0x3c] sm:$0xf] (%p2049_p6) }
  0x37   : > { %589 = vst [vmem:[%s568_s17] sm:$0xf] (%p2049_p6), %v1643_v16  ;;  %591 = vst [vmem:[%s568_s17 + $0x4] sm:$0xf] (%p2049_p6), %v1644_v17  ;;  %v1646_v19 = vld [vmem:[%s1504_s21 + $0x58] sm:$0xf] (%p2049_p6) }
  0x38   : > { %593 = vst [vmem:[%s568_s17 + $0x8] sm:$0xf] %v1645_v18  ;;  %595 = vst [vmem:[%s568_s17 + $0xc] sm:$0xf] %v1646_v19 }
  0x39 PF: > { %627 = sbr.rel (!%p2060_p10) target bundleno = 63 (0x3f), region = 233  ;;  %s629_s27 = sand.u32 (%p2060_p10), 1, %s1901_s10  }
  0x3a   : > { %s1648_s28 = sshll.u32 (%p2060_p10), %s2293_s25, 2  ;;  %s1647_s19 = sshll.u32 (%p2060_p10), %s629_s27, 4 }
  0x3b   : > { %s636_s26 = scalar_lea.vmem (%p2060_p10), %s2269_s5, %s1648_s28  ;;  %s631_s23 = scalar_lea.vmem (%p2060_p10), [#allocation7], %s1647_s19 }
  0x3c   : > { %v653_v20 = vld [vmem:[%s636_s26] sm:$0xf] (%p2060_p10)  ;;  %v655_v21 = vld [vmem:[%s636_s26 + $0x1c] sm:$0xf] (%p2060_p10)  ;;  %v657_v22 = vld [vmem:[%s636_s26 + $0x38] sm:$0xf] (%p2060_p10) }
  0x3d   : > { %654 = vst [vmem:[%s631_s23] sm:$0xf] (%p2060_p10), %v653_v20  ;;  %656 = vst [vmem:[%s631_s23 + $0x4] sm:$0xf] (%p2060_p10), %v655_v21  ;;  %v659_v23 = vld [vmem:[%s636_s26 + $0x54] sm:$0xf] (%p2060_p10) }
  0x3e   : > { %658 = vst [vmem:[%s631_s23 + $0x8] sm:$0xf] %v657_v22  ;;  %660 = vst [vmem:[%s631_s23 + $0xc] sm:$0xf] %v659_v23 }
  0x3f PF: > { %p1649_p13 = scmp.ge.s32.totalorder %s1921_s15, 1  ;;  %p699_p0 = scmp.lt.s32.totalorder %s1921_s15, 7 }
  0x41   : > { %p700_p1 = pnand %p1649_p13, %p699_p0 }
  0x42   : > { %s706_s25 = sand.u32 (!%p700_p1), 1, %s1913_s13   ;;  %s713_s24 = sand.u32 (!%p700_p1), 1, %s1905_s11  }
  0x43   : > { %703 = sbr.rel (%p700_p1) target bundleno = 456 (0x1c8), region = 278  ;;  %s1650_s29 = sshll.u32 (!%p700_p1), %s706_s25, 4 }
  0x44   : > { %s708_s16 = scalar_lea.vmem (!%p700_p1), [#allocation2], %s1650_s29  ;;  %s1651_s21 = sshll.u32 (!%p700_p1), %s713_s24, 4 }
  0x45   : > { %s729_s17 = scalar_lea.vmem (!%p700_p1), [#allocation5], %s1650_s29  ;;  %s715_s27 = scalar_lea.vmem (!%p700_p1), [#allocation3], %s1651_s21 }
  0x46   : > { %s1924_s28 = smov (!%p700_p1), 18   ;;  %s736_s11 = scalar_lea.vmem (!%p700_p1), [#allocation6], %s1651_s21 }
  0x47   : > { %s720_s13 = sand.u32 (!%p700_p1), 1, %s1897_s30   ;;  %s1926_s30 = smov (!%p700_p1), 19  }
  0x48   : > { %v1923_v24 = vmov 0.0   ;;  %v1855_v25 = vld [vmem:[%s708_s16 + $0x8] sm:$0xff]   ;;  %v1857_v27 = vld [vmem:[%s708_s16] sm:$0xff]   ;;  %s2121_s19 = sshll.u32 %s720_s13, 4  ;;  %vm1925_vm0 = vmmov 0   ;;  %s1927_s26 = smov 17  }
  0x49   : > { %1715 = vmatprep.subr.bf16.mxu0 %v1923_v24  ;;  %1723 = vmatprep.subr.bf16.mxu1 %v1923_v24  ;;  %v1856_v26 = vld [vmem:[%s729_s17 + $0x8] sm:$0xff]   ;;  %v1858_v29 = vld [vmem:[%s729_s17] sm:$0xff]   ;;  %s722_s18 = scalar_lea.vmem [#allocation4], %s2121_s19  ;;  %s743_s22 = scalar_lea.vmem [#allocation7], %s2121_s19  ;;  %v1933_v43 = vmov 0   ;;  %vm937_vm1 = vcmask 146432  }
  0x4a   : > { %v919_v28 = vadd.bf16 %v1856_v26, %v1855_v25  ;;  %v1859_v30 = vld [vmem:[%s715_s27 + $0x8] sm:$0xff]   ;;  %v916_v31 = vadd.bf16 %v1858_v29, %v1857_v27  ;;  %v1861_v33 = vld [vmem:[%s715_s27] sm:$0xff]   ;;  %1719 = vmatprep.mubr.msk.bf16.mxu0 %vm1925_vm0, %v1923_v24  ;;  %1727 = vmatprep.mubr.msk.bf16.mxu1 %vm1925_vm0, %v1923_v24  ;;  %s1928_s23 = smov 1   ;;  %s1929_s25 = smov 127   ;;  %vm994_vm2 = vcmask 154624   ;;  %vm942_vm3 = vcmask 261120  }
  0x4b   : > { %v1860_v32 = vld [vmem:[%s736_s11 + $0x8] sm:$0xff]   ;;  %v1862_v35 = vld [vmem:[%s736_s11] sm:$0xff]   ;;  %s1930_s29 = smov 111   ;;  %s1931_s24 = smov 110   ;;  %1854 = vset.pattern.permute.xlu0 %v1933_v43  ;;  %vm1052_vm4 = vcmask 138240   ;;  %vm1111_vm5 = vcmask 7168  }
  0x4c   : > { %933 = vrot.lane.b32.xlu0 %v919_v28, %s1924_s28  ;;  %929 = vrot.lane.b32.xlu1 %v916_v31, %s1924_s28  ;;  %v2118_v34 = vadd.bf16 %v1860_v32, %v1859_v30  ;;  %v2124_v36 = vadd.bf16 %v1862_v35, %v1861_v33  ;;  %v1863_v37 = vld [vmem:[%s722_s18 + $0x8] sm:$0xff]   ;;  %v1865_v40 = vld [vmem:[%s722_s18] sm:$0xff]   ;;  %s1932_s16 = smov 109   ;;  %vm1218_vm6 = vcmask 1039360   ;;  %vm1277_vm7 = vcmask 908288   ;;  %s2282_s11 = sadd.s32 4294967295, %s1921_s15  }
  0x4d   : > { %v1864_v38 = vld [vmem:[%s743_s22 + $0x8] sm:$0xff]   ;;  %v1866_v41 = vld [vmem:[%s743_s22] sm:$0xff]   ;;  %vm1336_vm8 = vcmask 900096   ;;  %vm1395_vm9 = vcmask 891904   ;;  %s808_s13 = sadd.s32 1, %s2282_s11 }
  0x4e   : > { %v921_v39 = vadd.bf16 %v1864_v38, %v1863_v37  ;;  %v918_v42 = vadd.bf16 %v1866_v41, %v1865_v40  ;;  %v1444_v44 = vld [vmem:[%s2272_s8] sm:$0xff]  ;;  %v1672_v2 = vld [vmem:[%s2271_s7 + $0x8] sm:$0xf]  ;;  %v1674_v9 = vld [vmem:[%s2271_s7 + $0xc] sm:$0xf]  ;;  %p809_p2 = scmp.lt.s32.totalorder %s808_s13, 6 }
  0x4f   : > { %v1669_v53 = vld [vmem:[%s2271_s7 + $0x4] sm:$0xf]  ;;  %v922_v62 = vld [vmem:[%s2271_s7] sm:$0xf]  ;;  %v1676_v10 = vld [vmem:[%s2271_s7 + $0x10] sm:$0xf] }
  0x50   : > { %935 = vrot.lane.b32.xlu0 %v2118_v34, %s1924_s28  ;;  %931 = vrot.lane.b32.xlu1 %v2124_v36, %s1924_s28  ;;  %v1678_v20 = vld [vmem:[%s2271_s7 + $0x14] sm:$0xf]  ;;  %v1680_v25 = vld [vmem:[%s2271_s7 + $0x18] sm:$0xf]  ;;  %s2297_s13 = smov (!%p809_p2, %s808_s13), 6 }
  0x51   : > { %v1682_v35 = vld [vmem:[%s2271_s7 + $0x1c] sm:$0xf]  ;;  %v1684_v38 = vld [vmem:[%s2271_s7 + $0x20] sm:$0xf]  ;;  %s811_s22 = scalar_lea.vmem %s2270_s6, %s2297_s13  ;;  %s1656_s15 = sshll.u32 %s2297_s13, 2 }
  0x54   : > { %990 = vrot.lane.b32.xlu0 %v919_v28, %s1926_s30  ;;  %992 = vrot.lane.b32.xlu1 %v2118_v34, %s1926_s30 }
  0x58   : > { %1048 = vrot.lane.b32.xlu0 %v919_v28, %s1927_s26  ;;  %1050 = vrot.lane.b32.xlu1 %v2118_v34, %s1927_s26 }
  0x5c   : > { %986 = vrot.lane.b32.xlu0 %v916_v31, %s1926_s30  ;;  %988 = vrot.lane.b32.xlu1 %v2124_v36, %s1926_s30 }
  0x60   : > { %1044 = vrot.lane.b32.xlu0 %v916_v31, %s1927_s26  ;;  %1046 = vrot.lane.b32.xlu1 %v2124_v36, %s1927_s26 }
  0x64   : > { %1107 = vrot.lane.b32.xlu0 %v919_v28, %s1928_s23  ;;  %1109 = vrot.lane.b32.xlu1 %v2118_v34, %s1928_s23 }
  0x68   : > { %1103 = vrot.lane.b32.xlu0 %v916_v31, %s1928_s23  ;;  %1105 = vrot.lane.b32.xlu1 %v2124_v36, %s1928_s23  ;;  %s817_s23 = scalar_lea.vmem %s2273_s9, %s1656_s15 }
  0x6c   : > { %1214 = vrot.lane.b32.xlu0 %v2118_v34, %s1929_s25  ;;  %1216 = vrot.lane.b32.xlu1 %v921_v39, %s1929_s25 }
  0x70   : > { %1273 = vrot.lane.b32.xlu0 %v2118_v34, %s1930_s29  ;;  %1275 = vrot.lane.b32.xlu1 %v921_v39, %s1930_s29 }
  0x74   : > { %1210 = vrot.lane.b32.xlu0 %v2124_v36, %s1929_s25  ;;  %1212 = vrot.lane.b32.xlu1 %v918_v42, %s1929_s25 }
  0x78   : > { %1269 = vrot.lane.b32.xlu0 %v2124_v36, %s1930_s29  ;;  %1271 = vrot.lane.b32.xlu1 %v918_v42, %s1930_s29 }
  0x7c   : > { %1332 = vrot.lane.b32.xlu0 %v2118_v34, %s1931_s24  ;;  %1334 = vrot.lane.b32.xlu1 %v921_v39, %s1931_s24 }
  0x80   : > { %1391 = vrot.lane.b32.xlu0 %v2118_v34, %s1932_s16  ;;  %1393 = vrot.lane.b32.xlu1 %v921_v39, %s1932_s16 }
  0x84   : > { %1328 = vrot.lane.b32.xlu0 %v2124_v36, %s1931_s24  ;;  %1330 = vrot.lane.b32.xlu1 %v918_v42, %s1931_s24 }
  0x88   : > { %1387 = vrot.lane.b32.xlu0 %v2124_v36, %s1932_s16  ;;  %1389 = vrot.lane.b32.xlu1 %v918_v42, %s1932_s16 }
  0x8c   : > { %1447 = vperm.xlu0 %1854, %v1444_v44  }
  0xbe   : > { %v934_v45 = vpop.permute.xlu0 %933  ;;  %v930_v46 = vpop.permute.xlu1 %929 }
  0xc2   : > { %v936_v47 = vpop.permute.xlu0 %935  ;;  %v932_v49 = vpop.permute.xlu1 %931 }
  0xc3   : > { %v939_v48 = vsel %vm937_vm1, %v934_v45, %v936_v47  ;;  %v938_v51 = vsel %vm937_vm1, %v930_v46, %v932_v49 }
  0xc4   : > { %1716 = vmatpush3.bf16.msra.mxu0 %v939_v48 }
  0xc5   : > { %1717 = vmatprep.subr.bf16.mxu0 %v1923_v24 }
  0xc6   : > { %v991_v50 = vpop.permute.xlu0 %990  ;;  %v993_v52 = vpop.permute.xlu1 %992 }
  0xc7   : > { %v996_v54 = vsel %vm994_vm2, %v991_v50, %v993_v52 }
  0xc8   : > { %1718 = vmatpush3.bf16.msra.mxu0 %v938_v51  ;;  %1724 = vmatpush3.bf16.msra.mxu1 %v996_v54 }
  0xc9   : > { %1731 = vmatprep.subr.bf16.mxu0 %v1923_v24  ;;  %1725 = vmatprep.subr.bf16.mxu1 %v1923_v24 }
  0xca   : > { %v1049_v55 = vpop.permute.xlu0 %1048  ;;  %v1051_v56 = vpop.permute.xlu1 %1050 }
  0xcb   : > { %1720 = vmatmul.mubr.msk.bf16.vlgmr.msra.gmra.mxu0 %vm942_vm3, %v1669_v53  ;;  %v1054_v57 = vsel %vm1052_vm4, %v1049_v55, %v1051_v56 }
  0xcc   : > { %1735 = vmatprep.mubr.msk.bf16.mxu0 %vm1925_vm0, %v1923_v24  ;;  %1732 = vmatpush3.bf16.msra.mxu0 %v1054_v57 }
  0xcd   : > { %1733 = vmatprep.subr.bf16.mxu0 %v1923_v24 }
  0xce   : > { %v987_v58 = vpop.permute.xlu0 %986  ;;  %v989_v59 = vpop.permute.xlu1 %988 }
  0xcf   : > { %v995_v60 = vsel %vm994_vm2, %v987_v58, %v989_v59 }
  0xd0   : > { %1726 = vmatpush3.bf16.msra.mxu1 %v995_v60 }
  0xd1   : > { %1739 = vmatprep.subr.bf16.mxu1 %v1923_v24 }
  0xd2   : > { %v1045_v61 = vpop.permute.xlu0 %1044  ;;  %v1047_v63 = vpop.permute.xlu1 %1046 }
  0xd3   : > { %v1053_v0 = vsel %vm1052_vm4, %v1045_v61, %v1047_v63  ;;  %1728 = vmatmul.mubr.msk.bf16.vlgmr.msra.gmra.mxu1 %vm942_vm3, %v922_v62 }
  0xd4   : > { %1734 = vmatpush3.bf16.msra.mxu0 %v1053_v0  ;;  %1743 = vmatprep.mubr.msk.bf16.mxu1 %vm1925_vm0, %v1923_v24 }
  0xd5   : > { %1747 = vmatprep.subr.bf16.mxu0 %v1923_v24 }
  0xd6   : > { %v1108_v1 = vpop.permute.xlu0 %1107  ;;  %v1110_v3 = vpop.permute.xlu1 %1109 }
  0xd7   : > { %v1113_v4 = vsel %vm1111_vm5, %v1108_v1, %v1110_v3  ;;  %1736 = vmatmul.mubr.msk.bf16.vlgmr.msra.gmra.mxu0 %vm942_vm3, %v1672_v2  ;;  %v1454_v1 = vlaneseq }
  0xd8   : > { %1740 = vmatpush3.bf16.msra.mxu1 %v1113_v4  ;;  %1748 = vmatpush3.bf16.msra.mxu0 %v2118_v34 }
  0xd9   : > { %1741 = vmatprep.subr.bf16.mxu1 %v1923_v24  ;;  %1749 = vmatprep.subr.bf16.mxu0 %v1923_v24 }
  0xda   : > { %v1104_v5 = vpop.permute.xlu0 %1103  ;;  %v1106_v6 = vpop.permute.xlu1 %1105  ;;  %1751 = vmatprep.mubr.msk.bf16.mxu0 %vm1925_vm0, %v1923_v24 }
  0xdb   : > { %v1112_v7 = vsel %vm1111_vm5, %v1104_v5, %v1106_v6  ;;  %v1451_v5 = vld [vmem:[%s811_s22] sm:$0x1] }
  0xdc   : > { %1742 = vmatpush3.bf16.msra.mxu1 %v1112_v7  ;;  %1750 = vmatpush3.bf16.msra.mxu0 %v2124_v36  ;;  %v1455_v7 = vshrl.u32 %v1454_v1, 7  ;;  %vm1452_vm10 = vcmp.gt.f32.partialorder %v1451_v5, 0.0 }
  0xdd   : > { %1755 = vmatprep.subr.bf16.mxu1 %v1923_v24  ;;  %1763 = vmatprep.subr.bf16.mxu0 %v1923_v24 }
  0xde   : > { %v1215_v8 = vpop.permute.xlu0 %1214  ;;  %v1217_v11 = vpop.permute.xlu1 %1216 }
  0xdf   : > { %v1220_v12 = vsel %vm1218_vm6, %v1215_v8, %v1217_v11  ;;  %1744 = vmatmul.mubr.msk.bf16.vlgmr.msra.gmra.mxu1 %vm942_vm3, %v1674_v9  ;;  %1752 = vmatmul.mubr.msk.bf16.vlgmr.msra.gmra.mxu0 %vm942_vm3, %v1676_v10  ;;  %v1456_v10 = vsub.s32 0, %v1455_v7  ;;  %v1453_v11 = vsel %vm1452_vm10, 1, %v1933_v43 }
  0xe0   : > { %1756 = vmatpush3.bf16.msra.mxu1 %v1220_v12  ;;  %1759 = vmatprep.mubr.msk.bf16.mxu1 %vm1925_vm0, %v1923_v24 }
  0xe1   : > { %1757 = vmatprep.subr.bf16.mxu1 %v1923_v24  ;;  %1767 = vmatprep.mubr.msk.bf16.mxu0 %vm1925_vm0, %v1923_v24 }
  0xe2   : > { %v1274_v13 = vpop.permute.xlu0 %1273  ;;  %v1276_v14 = vpop.permute.xlu1 %1275 }
  0xe3   : > { %v1279_v15 = vsel %vm1277_vm7, %v1274_v13, %v1276_v14 }
  0xe4   : > { %1764 = vmatpush3.bf16.msra.mxu0 %v1279_v15  ;;  %v1457_v15 = vrot.slane %v1453_v11, %v1456_v10 }
  0xe5   : > { %1765 = vmatprep.subr.bf16.mxu0 %v1923_v24 }
  0xe6   : > { %v1211_v16 = vpop.permute.xlu0 %1210  ;;  %v1213_v17 = vpop.permute.xlu1 %1212  ;;  %vm1458_vm11 = vcmp.eq.s32.totalorder %v1457_v15, 1 }
  0xe7   : > { %v1219_v18 = vsel %vm1218_vm6, %v1211_v16, %v1213_v17 }
  0xe8   : > { %1758 = vmatpush3.bf16.msra.mxu1 %v1219_v18 }
  0xe9   : > { %1771 = vmatprep.subr.bf16.mxu1 %v1923_v24 }
  0xea   : > { %v1270_v19 = vpop.permute.xlu0 %1269  ;;  %v1272_v21 = vpop.permute.xlu1 %1271 }
  0xeb   : > { %v1278_v22 = vsel %vm1277_vm7, %v1270_v19, %v1272_v21  ;;  %1760 = vmatmul.mubr.msk.bf16.vlgmr.msra.gmra.mxu1 %vm942_vm3, %v1678_v20 }
  0xec   : > { %1766 = vmatpush3.bf16.msra.mxu0 %v1278_v22  ;;  %1775 = vmatprep.mubr.msk.bf16.mxu1 %vm1925_vm0, %v1923_v24 }
  0xed   : > { %1779 = vmatprep.subr.bf16.mxu0 %v1923_v24 }
  0xee   : > { %v1333_v23 = vpop.permute.xlu0 %1332  ;;  %v1335_v26 = vpop.permute.xlu1 %1334 }
  0xef   : > { %v1338_v27 = vsel %vm1336_vm8, %v1333_v23, %v1335_v26  ;;  %1768 = vmatmul.mubr.msk.bf16.vlgmr.msra.gmra.mxu0 %vm942_vm3, %v1680_v25 }
  0xf0   : > { %1772 = vmatpush3.bf16.msra.mxu1 %v1338_v27  ;;  %1783 = vmatprep.mubr.msk.bf16.mxu0 %vm1925_vm0, %v1923_v24 }
  0xf1   : > { %1773 = vmatprep.subr.bf16.mxu1 %v1923_v24 }
  0xf2   : > { %v1392_v28 = vpop.permute.xlu0 %1391  ;;  %v1394_v29 = vpop.permute.xlu1 %1393 }
  0xf3   : > { %v1397_v30 = vsel %vm1395_vm9, %v1392_v28, %v1394_v29 }
  0xf4   : > { %1780 = vmatpush3.bf16.msra.mxu0 %v1397_v30 }
  0xf5   : > { %1781 = vmatprep.subr.bf16.mxu0 %v1923_v24 }
  0xf6   : > { %v1329_v31 = vpop.permute.xlu0 %1328  ;;  %v1331_v32 = vpop.permute.xlu1 %1330 }
  0xf7   : > { %v1337_v33 = vsel %vm1336_vm8, %v1329_v31, %v1331_v32 }
  0xf8   : > { %1774 = vmatpush3.bf16.msra.mxu1 %v1337_v33 }
  0xfa   : > { %v1388_v34 = vpop.permute.xlu0 %1387  ;;  %v1390_v36 = vpop.permute.xlu1 %1389 }
  0xfb   : > { %v1396_v37 = vsel %vm1395_vm9, %v1388_v34, %v1390_v36  ;;  %1776 = vmatmul.mubr.msk.bf16.vlgmr.msra.gmra.mxu1 %vm942_vm3, %v1682_v35 }
  0xfc   : > { %1782 = vmatpush3.bf16.msra.mxu0 %v1396_v37 }
  0xff   : > { %1784 = vmatmul.mubr.msk.bf16.vlgmr.msra.gmra.mxu0 %vm942_vm3, %v1684_v38 }
 0x107   : > { %v1448_v18 = vpop.permute.xlu0 %1447 }
 0x18b   : > { %v980_v24 = vpop.f32.mrf.mxu0 }
 0x18d   : > { %v1721_v39 = vpop.f32.mrf.mxu0 }
 0x18f   : > { %v983_v40 = vpop.f32.mrf.mxu0 }
 0x191   : > { %v1722_v41 = vpop.f32.mrf.mxu0 }
 0x193   : > { %v1036_v42 = vpop.f32.mrf.mxu1 }
 0x194   : > { %v1037_v60 = vadd.f32 %v1036_v42, %v980_v24 }
 0x195   : > { %v1729_v44 = vpop.f32.mrf.mxu1 }
 0x197   : > { %v1094_v45 = vpop.f32.mrf.mxu0  ;;  %v1039_v46 = vpop.f32.mrf.mxu1 }
 0x198   : > { %v1100_v0 = vadd.f32 %v1094_v45, %v1037_v60 }
 0x199   : > { %v1737_v47 = vpop.f32.mrf.mxu0  ;;  %v1730_v48 = vpop.f32.mrf.mxu1 }
 0x19b   : > { %v1097_v49 = vpop.f32.mrf.mxu0 }
 0x19d   : > { %v1738_v50 = vpop.f32.mrf.mxu0 }
 0x19f   : > { %v1153_v51 = vpop.f32.mrf.mxu1  ;;  %v1199_v52 = vpop.f32.mrf.mxu0 }
 0x1a0   : > { %v1159_v6 = vadd.f32 %v1153_v51, %v1100_v0 }
 0x1a1   : > { %v1745_v53 = vpop.f32.mrf.mxu1  ;;  %v1753_v54 = vpop.f32.mrf.mxu0 }
 0x1a2   : > { %v1205_v9 = vadd.f32 %v1199_v52, %v1159_v6 }
 0x1a3   : > { %v1156_v55 = vpop.f32.mrf.mxu1  ;;  %v1202_v56 = vpop.f32.mrf.mxu0 }
 0x1a5   : > { %v1746_v57 = vpop.f32.mrf.mxu1  ;;  %v1754_v58 = vpop.f32.mrf.mxu0 }
 0x1ab   : > { %v1260_v59 = vpop.f32.mrf.mxu1 }
 0x1ac   : > { %v1266_v12 = vadd.f32 %v1260_v59, %v1205_v9 }
 0x1ad   : > { %v1761_v61 = vpop.f32.mrf.mxu1 }
 0x1af   : > { %v1319_v62 = vpop.f32.mrf.mxu0  ;;  %v1263_v63 = vpop.f32.mrf.mxu1 }
 0x1b0   : > { %v1325_v14 = vadd.f32 %v1319_v62, %v1266_v12 }
 0x1b1   : > { %v1769_v2 = vpop.f32.mrf.mxu0  ;;  %v1762_v3 = vpop.f32.mrf.mxu1 }
 0x1b3   : > { %v1322_v4 = vpop.f32.mrf.mxu0 }
 0x1b5   : > { %v1770_v8 = vpop.f32.mrf.mxu0 }
 0x1bb   : > { %v1378_v13 = vpop.f32.mrf.mxu1 }
 0x1bc   : > { %v1384_v17 = vadd.f32 %v1378_v13, %v1325_v14 }
 0x1bd   : > { %v1777_v16 = vpop.f32.mrf.mxu1 }
 0x1bf   : > { %v1381_v19 = vpop.f32.mrf.mxu1  ;;  %v1437_v20 = vpop.f32.mrf.mxu0 }
 0x1c0   : > { %v1443_v21 = vadd.f32 %v1437_v20, %v1384_v17 }
 0x1c1   : > { %v1778_v22 = vpop.f32.mrf.mxu1  ;;  %v1785_v23 = vpop.f32.mrf.mxu0 }
 0x1c2   : > { %v1450_v25 = vadd.f32 %v1448_v18, %v1443_v21 }
 0x1c3   : > { %v1440_v26 = vpop.f32.mrf.mxu0 }
 0x1c4   : > { %v1459_v43 = vsel %vm1458_vm11, %v1450_v25, 0.0 }
 0x1c5   : > { %v1460_v27 = vpack.c.bf16 %v1459_v43, %v1459_v43  ;;  %v1786_v28 = vpop.f32.mrf.mxu0 }
 0x1c7   : > { %1461 = vst [vmem:[%s817_s23] sm:$0xf] %v1460_v27 }
 0x1c8 PF: > { %s2283_s15 = sld [smem:[#allocation8_spill]]  ;;  %s2286_s30 = smov %s1901_s10 }
 0x1c9   : > { %s2284_s25 = sld [smem:[#allocation10_spill]]  ;;  %s2287_s10 = smov %s2067_s20 }
 0x1ca   : > { %s2285_s29 = sld [smem:[#allocation9_spill]]  ;;  %s2288_s11 = smov %s1909_s12 }
 0x1cb   : > { %s2290_s13 = smov %s1917_s14 }
 0x1ce   : > { %p16_p3 = scmp.ge.s32.totalorder %s2283_s15, 8  }
 0x1cf   : > { %s2289_s12 = smov %s2284_s25 }
 0x1d0   : > { %s2291_s14 = smov %s2285_s29  ;;  %18 = sbr.rel (!%p16_p3) target bundleno = 4 (0x4), region = 388 }

</bundles_post_ra>
